<compile_context>
chip_gen: v7x
topology: tpu7x:2x2x1
jax: 0.10.0
libtpu: 0.0.40
codegen_flags: <defaults>
</compile_context>

<pallas_src>
import functools

import jax
import jax.numpy as jnp
from jax.experimental import pallas as pl
from jax.experimental.pallas import tpu as pltpu

NUM_PARTS = 8          # sequence length after the MLP reshape
PART_FEA_DIM = 32      # channel dim
N_LAYERS = 4
HEADS = 4
FFN_DIM = 2 * PART_FEA_DIM
EPS = 1e-5             # nn.LayerNorm default eps
MAX_BATCH_TILE = 128   # batch elements per grid step -> matmul M = 8*128 = 1024


def _layernorm(x, gamma, beta):
    mean = jnp.mean(x, axis=-1, keepdims=True)
    var = jnp.mean(jnp.square(x - mean), axis=-1, keepdims=True)
    return (x - mean) * jax.lax.rsqrt(var + EPS) * gamma + beta


# ---------------------------------------------------------------------------
# Kernels
# ---------------------------------------------------------------------------
def mlp_kernel(x_ref, w_ref, b_ref, o_ref):
    # (TB, D) @ (D, NUM_PARTS*D) + (1, NUM_PARTS*D) -> lane-dense (TB, 256)
    o_ref[...] = (
        jnp.dot(x_ref[...], w_ref[...], preferred_element_type=jnp.float32)
        + b_ref[...]
    )


def att_stack_kernel(
    x_ref,
    wq_ref, bq_ref, wk_ref, wv_ref,
    wc_ref, bc_ref, g1_ref, be1_ref,
    wf1_ref, bf1_ref, wf2_ref, bf2_ref, g2_ref, be2_ref,
    o_ref,
    *, heads, num_parts, n_layers,
):
    # x block: (M, D) with M = TB * num_parts (rows grouped per batch element)
    xf = x_ref[...]
    m, d = xf.shape
    tb = m // num_parts
    dh = d // heads

    for li in range(n_layers):
        # ----- multi-head self attention (head loop, batched over TB) -----
        # residual + folded concat/V bias; per-head contributions accumulate in
        acc = xf + bc_ref[li]
        for h in range(heads):
            # per-head projection weights (pre-split on host) -> no lane slicing
            q = jnp.dot(xf, wq_ref[li, h], preferred_element_type=jnp.float32) + bq_ref[li, h]
            k = jnp.dot(xf, wk_ref[li, h], preferred_element_type=jnp.float32)
            v = jnp.dot(xf, wv_ref[li, h], preferred_element_type=jnp.float32)
            # layout-preserving split (last dim unchanged, inner factor = num_parts)
            q3 = q.reshape(tb, num_parts, dh)
            k3 = k.reshape(tb, num_parts, dh)
            v3 = v.reshape(tb, num_parts, dh)
            # batched attention over the batch tile (scale folded into Wq/bq;
            # K bias dropped: it is a softmax-invariant per-query constant)
            s = jnp.einsum("bqd,bkd->bqk", q3, k3,
                           preferred_element_type=jnp.float32)
            s = s - jnp.max(s, axis=-1, keepdims=True)
            p = jnp.exp(s)
            p = p / jnp.sum(p, axis=-1, keepdims=True)
            o3 = jnp.einsum("bqk,bkd->bqd", p, v3,
                            preferred_element_type=jnp.float32)
            # per-head slice of the concat projection -> no lane-axis concat
            acc = acc + jnp.dot(o3.reshape(m, dh), wc_ref[li, h],
                                preferred_element_type=jnp.float32)

        x1 = _layernorm(acc, g1_ref[li], be1_ref[li])

        # FFN (Linear -> ReLU -> Linear); dropout p=0.0 is identity
        h1 = jnp.maximum(
            jnp.dot(x1, wf1_ref[li], preferred_element_type=jnp.float32) + bf1_ref[li],
            0.0,
        )
        ffn = jnp.dot(h1, wf2_ref[li], preferred_element_type=jnp.float32) + bf2_ref[li]
        xf = _layernorm(x1 + ffn, g2_ref[li], be2_ref[li])

    o_ref[...] = xf


# ---------------------------------------------------------------------------
# Wrappers
# ---------------------------------------------------------------------------
_LAYER_PARAM_ORDER = (
    "wq", "bq", "wk", "wv",
    "wc", "bc", "g1", "be1",
    "wf1", "bf1", "wf2", "bf2", "g2", "be2",
)


def mlp_forward(x, w, b, tb):
    bp, d = x.shape
    nd = w.shape[1]
    return pl.pallas_call(
        mlp_kernel,
        out_shape=jax.ShapeDtypeStruct((bp, nd), jnp.float32),
        grid=(bp // tb,),
        in_specs=[
            pl.BlockSpec((tb, d), lambda i: (i, 0)),
            pl.BlockSpec((d, nd), lambda i: (0, 0)),
            pl.BlockSpec((1, nd), lambda i: (0, 0)),
        ],
        out_specs=pl.BlockSpec((tb, nd), lambda i: (i, 0)),
        compiler_params=pltpu.CompilerParams(dimension_semantics=("parallel",)),
    )(x, w, b)


def att_stack_forward(xf, kparams, tb):
    m, d = xf.shape
    weights = [kparams[name] for name in _LAYER_PARAM_ORDER]
    block_rows = tb * NUM_PARTS

    in_specs = [pl.BlockSpec((block_rows, d), lambda i: (i, 0))]
    # Whole stacked weight arrays with constant index_maps -> DMA'd once.
    in_specs += [
        pl.BlockSpec(w.shape, lambda i, nd=w.ndim: (0,) * nd) for w in weights
    ]

    kernel = functools.partial(
        att_stack_kernel, heads=HEADS, num_parts=NUM_PARTS, n_layers=N_LAYERS
    )
    return pl.pallas_call(
        kernel,
        out_shape=jax.ShapeDtypeStruct((m, d), jnp.float32),
        grid=(m // block_rows,),
        in_specs=in_specs,
        out_specs=pl.BlockSpec((block_rows, d), lambda i: (i, 0)),
        compiler_params=pltpu.CompilerParams(dimension_semantics=("parallel",)),
    )(xf, *weights)


def decnet_forward(x, kparams, max_batch_tile=MAX_BATCH_TILE):
    b, d = x.shape
    tb = min(b, max_batch_tile)
    bp = pl.cdiv(b, tb) * tb
    if bp != b:
        x = jnp.pad(x, ((0, bp - b), (0, 0)))

    y = mlp_forward(x, kparams["mlp_w"], kparams["mlp_b"], tb)   # (Bp, L*D)
    xf = y.reshape(bp * NUM_PARTS, d)                            # row-major view
    out = att_stack_forward(xf, kparams, tb)                     # (Bp*L, D)
    return out.reshape(bp, NUM_PARTS, d)[:b]


# ---------------------------------------------------------------------------
# One-time parameter transform: stack over layers, split q/k/v/concat per head,
# fold the 1/sqrt(dh) attention scale into Wq / bq, drop the K bias (softmax
# shift-invariance over keys), fold the V bias into the concat bias.
# ---------------------------------------------------------------------------
def prepare_kernel_params(params):
    d, h, nl = PART_FEA_DIM, HEADS, N_LAYERS
    dh = d // h
    scale = dh ** (-0.5)

    def stack(name):
        return jnp.stack([lp[name] for lp in params["layers"]], axis=0)

    def split_out_heads(w):          # (NL, D, D) -> (NL, H, D, dh) (output channels)
        return w.reshape(nl, d, h, dh).transpose(0, 2, 1, 3)

    def split_out_heads_bias(bb):    # (NL, 1, D) -> (NL, H, 1, dh)
        return bb.reshape(nl, 1, h, dh).transpose(0, 2, 1, 3)

    wc = stack("wc")                                   # (NL, D, D)
    bv = stack("bv")                                   # (NL, 1, D)
    bc = stack("bc")                                   # (NL, 1, D)
    # p @ (xWv + bv) = p @ xWv + bv  (softmax rows sum to 1)  =>  bc' = bc + bv @ Wc
    bc_folded = bc + jnp.einsum("lod,ldc->loc", bv, wc)

    return {
        "mlp_w": params["mlp_w"],
        "mlp_b": params["mlp_b"],
        "wq": split_out_heads(stack("wq") * scale),
        "bq": split_out_heads_bias(stack("bq") * scale),
        "wk": split_out_heads(stack("wk")),            # bk dropped (exact)
        "wv": split_out_heads(stack("wv")),            # bv folded into bc
        "wc": wc.reshape(nl, h, dh, d),                # split the *input* channels
        "bc": bc_folded,
        "g1": stack("g1"), "be1": stack("be1"),
        "wf1": stack("wf1"), "bf1": stack("bf1"),
        "wf2": stack("wf2"), "bf2": stack("bf2"),
        "g2": stack("g2"), "be2": stack("be2"),
    }


# ---------------------------------------------------------------------------
# Deterministic parameter init (synthetic; matches shapes of the PyTorch module)
# ---------------------------------------------------------------------------
def init_params(key):
    D = PART_FEA_DIM
    FFN = FFN_DIM

    def nrm(k, shape, scale=0.05):
        return jax.random.normal(k, shape, dtype=jnp.float32) * scale

    keys = jax.random.split(key, 2 + N_LAYERS)
    params = {
        "mlp_w": nrm(keys[0], (D, NUM_PARTS * D)),
        "mlp_b": nrm(keys[1], (1, NUM_PARTS * D), 0.01),
        "layers": [],
    }
    for li in range(N_LAYERS):
        lk = jax.random.split(keys[2 + li], 10)
        params["layers"].append({
            "wq": nrm(lk[0], (D, D)), "bq": nrm(lk[1], (1, D), 0.01),
            "wk": nrm(lk[2], (D, D)), "bk": nrm(lk[3], (1, D), 0.01),
            "wv": nrm(lk[4], (D, D)), "bv": nrm(lk[5], (1, D), 0.01),
            "wc": nrm(lk[6], (D, D)), "bc": nrm(lk[7], (1, D), 0.01),
            "g1": jnp.ones((1, D), jnp.float32), "be1": jnp.zeros((1, D), jnp.float32),
            "wf1": nrm(lk[8], (D, FFN)), "bf1": jnp.zeros((1, FFN), jnp.float32),
            "wf2": nrm(lk[9], (FFN, D)), "bf2": jnp.zeros((1, D), jnp.float32),
            "g2": jnp.ones((1, D), jnp.float32), "be2": jnp.zeros((1, D), jnp.float32),
        })
    return params


# ---------------------------------------------------------------------------
# Pure-JAX reference (mirrors the PyTorch forward) for correctness check
# ---------------------------------------------------------------------------
def decnet_reference(x, params):
    B = x.shape[0]
    D = PART_FEA_DIM
    x = (x @ params["mlp_w"] + params["mlp_b"]).reshape(B, NUM_PARTS, D)
    dh = D // HEADS
    scale = dh ** (-0.5)

    def ln(y, g, b):
        m = jnp.mean(y, axis=-1, keepdims=True)
        v = jnp.mean((y - m) ** 2, axis=-1, keepdims=True)
        return (y - m) / jnp.sqrt(v + EPS) * g + b

    for lp in params["layers"]:
        b_, l_, c_ = x.shape
        q = x @ lp["wq"] + lp["bq"]
        k = x @ lp["wk"] + lp["bk"]
        v = x @ lp["wv"] + lp["bv"]
        q = q.reshape(b_, l_, HEADS, dh).transpose(0, 2, 1, 3) * scale
        k = k.reshape(b_, l_, HEADS, dh).transpose(0, 2, 1, 3)
        v = v.reshape(b_, l_, HEADS, dh).transpose(0, 2, 1, 3)
        att = jax.nn.softmax(q @ k.transpose(0, 1, 3, 2), axis=-1)
        o = (att @ v).transpose(0, 2, 1, 3).reshape(b_, l_, c_)
        x = ln(x + o @ lp["wc"] + lp["bc"], lp["g1"], lp["be1"])
        ffn = jnp.maximum(x @ lp["wf1"] + lp["bf1"], 0.0) @ lp["wf2"] + lp["bf2"]
        x = ln(x + ffn, lp["g2"], lp["be2"])
    return x


# ---------------------------------------------------------------------------
if __name__ == "__main__":
    key = jax.random.PRNGKey(0)
    pkey, xkey = jax.random.split(key)
    params = init_params(pkey)
    kparams = prepare_kernel_params(params)   # one-time weight transform

    B = 2
    x = jax.random.normal(xkey, (B, PART_FEA_DIM), dtype=jnp.float32)

    fwd = jax.jit(decnet_forward)
    out = jax.block_until_ready(fwd(x, kparams))

    ref = decnet_reference(x, params)
    assert out.shape == (B, NUM_PARTS, PART_FEA_DIM)
    assert jnp.allclose(out, ref, rtol=1e-3, atol=1e-3), "mismatch vs reference"

    print("KERNEL_OK")
</pallas_src>

<mosaic_0001>
module attributes {stable_mosaic.version = 11 : i64} {
  func.func @mlp_kernel(%arg0: i32, %arg1: memref<2x32xf32, #tpu.memory_space<vmem>>, %arg2: memref<32x256xf32, #tpu.memory_space<vmem>>, %arg3: memref<1x256xf32, #tpu.memory_space<vmem>>, %arg4: memref<2x256xf32, #tpu.memory_space<vmem>>) attributes {dimension_semantics = [#tpu.dimension_semantics<parallel>], iteration_bounds = array<i64: 1>, scalar_prefetch = 0 : i64, scratch_operands = 0 : i64, tpu.core_type = #tpu.core_type<tc>, window_params = [{transform_indices = @transform_0, window_bounds = array<i64: 2, 32>}, {pipeline_mode = #tpu.pipeline_mode<synchronous>, transform_indices = @transform_1, window_bounds = array<i64: 32, 256>}, {pipeline_mode = #tpu.pipeline_mode<synchronous>, transform_indices = @transform_2, window_bounds = array<i64: 1, 256>}, {transform_indices = @transform_3, window_bounds = array<i64: 2, 256>}]} {
    %c0 = arith.constant 0 : index
    %c0_0 = arith.constant 0 : index
    %0 = vector.load %arg1[%c0, %c0_0] : memref<2x32xf32, #tpu.memory_space<vmem>>, vector<2x32xf32>
    %c0_1 = arith.constant 0 : index
    %c0_2 = arith.constant 0 : index
    %1 = vector.load %arg2[%c0_1, %c0_2] : memref<32x256xf32, #tpu.memory_space<vmem>>, vector<32x256xf32>
    %cst = arith.constant dense<0.000000e+00> : vector<2x256xf32>
    %2 = tpu.matmul %0, %1, %cst {dimension_numbers = #tpu.dot_dimension_numbers<[1], [0], [0], [1], [0, 0, 1, 1], [], []>} : vector<2x32xf32>, vector<32x256xf32>, vector<2x256xf32> -> vector<2x256xf32>
    %c0_3 = arith.constant 0 : index
    %c0_4 = arith.constant 0 : index
    %3 = vector.load %arg3[%c0_3, %c0_4] : memref<1x256xf32, #tpu.memory_space<vmem>>, vector<1x256xf32>
    %4 = vector.broadcast %3 : vector<1x256xf32> to vector<2x256xf32>
    %5 = arith.addf %2, %4 : vector<2x256xf32>
    %c0_5 = arith.constant 0 : index
    %c0_6 = arith.constant 0 : index
    %6 = vector.load %arg4[%c0_5, %c0_6] : memref<2x256xf32, #tpu.memory_space<vmem>>, vector<2x256xf32>
    tpu.vector_store %arg4[%c0_5, %c0_6], %5 {strides = array<i32>} : memref<2x256xf32, #tpu.memory_space<vmem>>, vector<2x256xf32>,
    return
  }
  func.func @transform_0(%arg0: i32) -> (i32, i32) {
    %c0_i32 = arith.constant 0 : i32
    %c0_i32_0 = arith.constant 0 : i32
    return %arg0, %c0_i32 : i32, i32
  }
  func.func @transform_1(%arg0: i32) -> (i32, i32) {
    %c0_i32 = arith.constant 0 : i32
    %c0_i32_0 = arith.constant 0 : i32
    %c0_i32_1 = arith.constant 0 : i32
    return %c0_i32, %c0_i32_0 : i32, i32
  }
  func.func @transform_2(%arg0: i32) -> (i32, i32) {
    %c0_i32 = arith.constant 0 : i32
    %c0_i32_0 = arith.constant 0 : i32
    %c0_i32_1 = arith.constant 0 : i32
    return %c0_i32, %c0_i32_0 : i32, i32
  }
  func.func @transform_3(%arg0: i32) -> (i32, i32) {
    %c0_i32 = arith.constant 0 : i32
    %c0_i32_0 = arith.constant 0 : i32
    return %arg0, %c0_i32 : i32, i32
  }
}

module attributes {stable_mosaic.version = 11 : i64} {
  func.func @att_stack_kernel(%arg0: i32, %arg1: memref<16x32xf32, #tpu.memory_space<vmem>>, %arg2: memref<4x4x32x8xf32, #tpu.memory_space<vmem>>, %arg3: memref<4x4x1x8xf32, #tpu.memory_space<vmem>>, %arg4: memref<4x4x32x8xf32, #tpu.memory_space<vmem>>, %arg5: memref<4x4x32x8xf32, #tpu.memory_space<vmem>>, %arg6: memref<4x4x8x32xf32, #tpu.memory_space<vmem>>, %arg7: memref<4x1x32xf32, #tpu.memory_space<vmem>>, %arg8: memref<4x1x32xf32, #tpu.memory_space<vmem>>, %arg9: memref<4x1x32xf32, #tpu.memory_space<vmem>>, %arg10: memref<4x32x64xf32, #tpu.memory_space<vmem>>, %arg11: memref<4x1x64xf32, #tpu.memory_space<vmem>>, %arg12: memref<4x64x32xf32, #tpu.memory_space<vmem>>, %arg13: memref<4x1x32xf32, #tpu.memory_space<vmem>>, %arg14: memref<4x1x32xf32, #tpu.memory_space<vmem>>, %arg15: memref<4x1x32xf32, #tpu.memory_space<vmem>>, %arg16: memref<16x32xf32, #tpu.memory_space<vmem>>) attributes {dimension_semantics = [#tpu.dimension_semantics<parallel>], iteration_bounds = array<i64: 1>, scalar_prefetch = 0 : i64, scratch_operands = 0 : i64, tpu.core_type = #tpu.core_type<tc>, window_params = [{transform_indices = @transform_0, window_bounds = array<i64: 16, 32>}, {pipeline_mode = #tpu.pipeline_mode<synchronous>, transform_indices = @transform_1, window_bounds = array<i64: 4, 4, 32, 8>}, {pipeline_mode = #tpu.pipeline_mode<synchronous>, transform_indices = @transform_2, window_bounds = array<i64: 4, 4, 1, 8>}, {pipeline_mode = #tpu.pipeline_mode<synchronous>, transform_indices = @transform_3, window_bounds = array<i64: 4, 4, 32, 8>}, {pipeline_mode = #tpu.pipeline_mode<synchronous>, transform_indices = @transform_4, window_bounds = array<i64: 4, 4, 32, 8>}, {pipeline_mode = #tpu.pipeline_mode<synchronous>, transform_indices = @transform_5, window_bounds = array<i64: 4, 4, 8, 32>}, {pipeline_mode = #tpu.pipeline_mode<synchronous>, transform_indices = @transform_6, window_bounds = array<i64: 4, 1, 32>}, {pipeline_mode = #tpu.pipeline_mode<synchronous>, transform_indices = @transform_7, window_bounds = array<i64: 4, 1, 32>}, {pipeline_mode = #tpu.pipeline_mode<synchronous>, transform_indices = @transform_8, window_bounds = array<i64: 4, 1, 32>}, {pipeline_mode = #tpu.pipeline_mode<synchronous>, transform_indices = @transform_9, window_bounds = array<i64: 4, 32, 64>}, {pipeline_mode = #tpu.pipeline_mode<synchronous>, transform_indices = @transform_10, window_bounds = array<i64: 4, 1, 64>}, {pipeline_mode = #tpu.pipeline_mode<synchronous>, transform_indices = @transform_11, window_bounds = array<i64: 4, 64, 32>}, {pipeline_mode = #tpu.pipeline_mode<synchronous>, transform_indices = @transform_12, window_bounds = array<i64: 4, 1, 32>}, {pipeline_mode = #tpu.pipeline_mode<synchronous>, transform_indices = @transform_13, window_bounds = array<i64: 4, 1, 32>}, {pipeline_mode = #tpu.pipeline_mode<synchronous>, transform_indices = @transform_14, window_bounds = array<i64: 4, 1, 32>}, {transform_indices = @transform_15, window_bounds = array<i64: 16, 32>}]} {
    %c0 = arith.constant 0 : index
    %c0_0 = arith.constant 0 : index
    %0 = vector.load %arg1[%c0, %c0_0] : memref<16x32xf32, #tpu.memory_space<vmem>>, vector<16x32xf32>
    %c0_1 = arith.constant 0 : index
    %c0_2 = arith.constant 0 : index
    %c0_3 = arith.constant 0 : index
    %1 = vector.load %arg7[%c0_1, %c0_2, %c0_3] : memref<4x1x32xf32, #tpu.memory_space<vmem>>, vector<1x1x32xf32>
    %2 = vector.shape_cast %1 : vector<1x1x32xf32> to vector<1x32xf32>
    %3 = vector.broadcast %2 : vector<1x32xf32> to vector<16x32xf32>
    %4 = arith.addf %0, %3 : vector<16x32xf32>
    %c0_4 = arith.constant 0 : index
    %c0_5 = arith.constant 0 : index
    %c0_6 = arith.constant 0 : index
    %c0_7 = arith.constant 0 : index
    %5 = vector.load %arg2[%c0_4, %c0_5, %c0_6, %c0_7] : memref<4x4x32x8xf32, #tpu.memory_space<vmem>>, vector<1x1x32x8xf32>
    %6 = vector.shape_cast %5 : vector<1x1x32x8xf32> to vector<32x8xf32>
    %cst = arith.constant dense<0.000000e+00> : vector<16x8xf32>
    %7 = tpu.matmul %0, %6, %cst {dimension_numbers = #tpu.dot_dimension_numbers<[1], [0], [0], [1], [0, 0, 1, 1], [], []>} : vector<16x32xf32>, vector<32x8xf32>, vector<16x8xf32> -> vector<16x8xf32>
    %c0_8 = arith.constant 0 : index
    %c0_9 = arith.constant 0 : index
    %c0_10 = arith.constant 0 : index
    %c0_11 = arith.constant 0 : index
    %8 = vector.load %arg3[%c0_8, %c0_9, %c0_10, %c0_11] : memref<4x4x1x8xf32, #tpu.memory_space<vmem>>, vector<1x1x1x8xf32>
    %9 = vector.shape_cast %8 : vector<1x1x1x8xf32> to vector<1x8xf32>
    %10 = vector.broadcast %9 : vector<1x8xf32> to vector<16x8xf32>
    %11 = arith.addf %7, %10 : vector<16x8xf32>
    %c0_12 = arith.constant 0 : index
    %c0_13 = arith.constant 0 : index
    %c0_14 = arith.constant 0 : index
    %c0_15 = arith.constant 0 : index
    %12 = vector.load %arg4[%c0_12, %c0_13, %c0_14, %c0_15] : memref<4x4x32x8xf32, #tpu.memory_space<vmem>>, vector<1x1x32x8xf32>
    %13 = vector.shape_cast %12 : vector<1x1x32x8xf32> to vector<32x8xf32>
    %cst_16 = arith.constant dense<0.000000e+00> : vector<16x8xf32>
    %14 = tpu.matmul %0, %13, %cst_16 {dimension_numbers = #tpu.dot_dimension_numbers<[1], [0], [0], [1], [0, 0, 1, 1], [], []>} : vector<16x32xf32>, vector<32x8xf32>, vector<16x8xf32> -> vector<16x8xf32>
    %c0_17 = arith.constant 0 : index
    %c0_18 = arith.constant 0 : index
    %c0_19 = arith.constant 0 : index
    %c0_20 = arith.constant 0 : index
    %15 = vector.load %arg5[%c0_17, %c0_18, %c0_19, %c0_20] : memref<4x4x32x8xf32, #tpu.memory_space<vmem>>, vector<1x1x32x8xf32>
    %16 = vector.shape_cast %15 : vector<1x1x32x8xf32> to vector<32x8xf32>
    %cst_21 = arith.constant dense<0.000000e+00> : vector<16x8xf32>
    %17 = tpu.matmul %0, %16, %cst_21 {dimension_numbers = #tpu.dot_dimension_numbers<[1], [0], [0], [1], [0, 0, 1, 1], [], []>} : vector<16x32xf32>, vector<32x8xf32>, vector<16x8xf32> -> vector<16x8xf32>
    %18 = vector.shape_cast %11 : vector<16x8xf32> to vector<2x8x8xf32>
    %19 = vector.shape_cast %14 : vector<16x8xf32> to vector<2x8x8xf32>
    %20 = vector.shape_cast %17 : vector<16x8xf32> to vector<2x8x8xf32>
    "tpu.trace_start"() <{level = 10 : i32, message = "bqd,bkd->bqk"}> : () -> ()
    %cst_22 = arith.constant dense<0.000000e+00> : vector<2x8x8xf32>
    %21 = tpu.matmul %18, %19, %cst_22 {dimension_numbers = #tpu.dot_dimension_numbers<[2], [2], [1], [1], [0, 0, 0, 1, 1, 1], [0], [0]>} : vector<2x8x8xf32>, vector<2x8x8xf32>, vector<2x8x8xf32> -> vector<2x8x8xf32>
    "tpu.trace_stop"() : () -> ()
    %cst_23 = arith.constant dense<0xFF800000> : vector<2x8xf32>
    %22 = vector.multi_reduction <maximumf>, %21, %cst_23 [2] : vector<2x8x8xf32> to vector<2x8xf32>
    %23 = vector.shape_cast %22 : vector<2x8xf32> to vector<2x8x1xf32>
    %24 = vector.broadcast %23 : vector<2x8x1xf32> to vector<2x8x8xf32>
    %25 = arith.subf %21, %24 : vector<2x8x8xf32>
    %26 = math.exp %25 : vector<2x8x8xf32>
    %cst_24 = arith.constant dense<0.000000e+00> : vector<2x8xf32>
    %27 = vector.multi_reduction <add>, %26, %cst_24 [2] : vector<2x8x8xf32> to vector<2x8xf32>
    %28 = vector.shape_cast %27 : vector<2x8xf32> to vector<2x8x1xf32>
    %29 = vector.broadcast %28 : vector<2x8x1xf32> to vector<2x8x8xf32>
    %30 = arith.divf %26, %29 : vector<2x8x8xf32>
    "tpu.trace_start"() <{level = 10 : i32, message = "bqk,bkd->bqd"}> : () -> ()
    %cst_25 = arith.constant dense<0.000000e+00> : vector<2x8x8xf32>
    %31 = tpu.matmul %30, %20, %cst_25 {dimension_numbers = #tpu.dot_dimension_numbers<[2], [1], [1], [2], [0, 0, 0, 1, 1, 2], [0], [0]>} : vector<2x8x8xf32>, vector<2x8x8xf32>, vector<2x8x8xf32> -> vector<2x8x8xf32>
    "tpu.trace_stop"() : () -> ()
    %32 = vector.shape_cast %31 : vector<2x8x8xf32> to vector<16x8xf32>
    %c0_26 = arith.constant 0 : index
    %c0_27 = arith.constant 0 : index
    %c0_28 = arith.constant 0 : index
    %c0_29 = arith.constant 0 : index
    %33 = vector.load %arg6[%c0_26, %c0_27, %c0_28, %c0_29] : memref<4x4x8x32xf32, #tpu.memory_space<vmem>>, vector<1x1x8x32xf32>
    %34 = vector.shape_cast %33 : vector<1x1x8x32xf32> to vector<8x32xf32>
    %cst_30 = arith.constant dense<0.000000e+00> : vector<16x32xf32>
    %35 = tpu.matmul %32, %34, %cst_30 {dimension_numbers = #tpu.dot_dimension_numbers<[1], [0], [0], [1], [0, 0, 1, 1], [], []>} : vector<16x8xf32>, vector<8x32xf32>, vector<16x32xf32> -> vector<16x32xf32>
    %36 = arith.addf %4, %35 : vector<16x32xf32>
    %c0_31 = arith.constant 0 : index
    %c1 = arith.constant 1 : index
    %c0_32 = arith.constant 0 : index
    %c0_33 = arith.constant 0 : index
    %37 = vector.load %arg2[%c0_31, %c1, %c0_32, %c0_33] : memref<4x4x32x8xf32, #tpu.memory_space<vmem>>, vector<1x1x32x8xf32>
    %38 = vector.shape_cast %37 : vector<1x1x32x8xf32> to vector<32x8xf32>
    %cst_34 = arith.constant dense<0.000000e+00> : vector<16x8xf32>
    %39 = tpu.matmul %0, %38, %cst_34 {dimension_numbers = #tpu.dot_dimension_numbers<[1], [0], [0], [1], [0, 0, 1, 1], [], []>} : vector<16x32xf32>, vector<32x8xf32>, vector<16x8xf32> -> vector<16x8xf32>
    %c0_35 = arith.constant 0 : index
    %c1_36 = arith.constant 1 : index
    %c0_37 = arith.constant 0 : index
    %c0_38 = arith.constant 0 : index
    %40 = vector.load %arg3[%c0_35, %c1_36, %c0_37, %c0_38] : memref<4x4x1x8xf32, #tpu.memory_space<vmem>>, vector<1x1x1x8xf32>
    %41 = vector.shape_cast %40 : vector<1x1x1x8xf32> to vector<1x8xf32>
    %42 = vector.broadcast %41 : vector<1x8xf32> to vector<16x8xf32>
    %43 = arith.addf %39, %42 : vector<16x8xf32>
    %c0_39 = arith.constant 0 : index
    %c1_40 = arith.constant 1 : index
    %c0_41 = arith.constant 0 : index
    %c0_42 = arith.constant 0 : index
    %44 = vector.load %arg4[%c0_39, %c1_40, %c0_41, %c0_42] : memref<4x4x32x8xf32, #tpu.memory_space<vmem>>, vector<1x1x32x8xf32>
    %45 = vector.shape_cast %44 : vector<1x1x32x8xf32> to vector<32x8xf32>
    %cst_43 = arith.constant dense<0.000000e+00> : vector<16x8xf32>
    %46 = tpu.matmul %0, %45, %cst_43 {dimension_numbers = #tpu.dot_dimension_numbers<[1], [0], [0], [1], [0, 0, 1, 1], [], []>} : vector<16x32xf32>, vector<32x8xf32>, vector<16x8xf32> -> vector<16x8xf32>
    %c0_44 = arith.constant 0 : index
    %c1_45 = arith.constant 1 : index
    %c0_46 = arith.constant 0 : index
    %c0_47 = arith.constant 0 : index
    %47 = vector.load %arg5[%c0_44, %c1_45, %c0_46, %c0_47] : memref<4x4x32x8xf32, #tpu.memory_space<vmem>>, vector<1x1x32x8xf32>
    %48 = vector.shape_cast %47 : vector<1x1x32x8xf32> to vector<32x8xf32>
    %cst_48 = arith.constant dense<0.000000e+00> : vector<16x8xf32>
    %49 = tpu.matmul %0, %48, %cst_48 {dimension_numbers = #tpu.dot_dimension_numbers<[1], [0], [0], [1], [0, 0, 1, 1], [], []>} : vector<16x32xf32>, vector<32x8xf32>, vector<16x8xf32> -> vector<16x8xf32>
    %50 = vector.shape_cast %43 : vector<16x8xf32> to vector<2x8x8xf32>
    %51 = vector.shape_cast %46 : vector<16x8xf32> to vector<2x8x8xf32>
    %52 = vector.shape_cast %49 : vector<16x8xf32> to vector<2x8x8xf32>
    "tpu.trace_start"() <{level = 10 : i32, message = "bqd,bkd->bqk"}> : () -> ()
    %cst_49 = arith.constant dense<0.000000e+00> : vector<2x8x8xf32>
    %53 = tpu.matmul %50, %51, %cst_49 {dimension_numbers = #tpu.dot_dimension_numbers<[2], [2], [1], [1], [0, 0, 0, 1, 1, 1], [0], [0]>} : vector<2x8x8xf32>, vector<2x8x8xf32>, vector<2x8x8xf32> -> vector<2x8x8xf32>
    "tpu.trace_stop"() : () -> ()
    %cst_50 = arith.constant dense<0xFF800000> : vector<2x8xf32>
    %54 = vector.multi_reduction <maximumf>, %53, %cst_50 [2] : vector<2x8x8xf32> to vector<2x8xf32>
    %55 = vector.shape_cast %54 : vector<2x8xf32> to vector<2x8x1xf32>
    %56 = vector.broadcast %55 : vector<2x8x1xf32> to vector<2x8x8xf32>
    %57 = arith.subf %53, %56 : vector<2x8x8xf32>
    %58 = math.exp %57 : vector<2x8x8xf32>
    %cst_51 = arith.constant dense<0.000000e+00> : vector<2x8xf32>
    %59 = vector.multi_reduction <add>, %58, %cst_51 [2] : vector<2x8x8xf32> to vector<2x8xf32>
    %60 = vector.shape_cast %59 : vector<2x8xf32> to vector<2x8x1xf32>
    %61 = vector.broadcast %60 : vector<2x8x1xf32> to vector<2x8x8xf32>
    %62 = arith.divf %58, %61 : vector<2x8x8xf32>
    "tpu.trace_start"() <{level = 10 : i32, message = "bqk,bkd->bqd"}> : () -> ()
    %cst_52 = arith.constant dense<0.000000e+00> : vector<2x8x8xf32>
    %63 = tpu.matmul %62, %52, %cst_52 {dimension_numbers = #tpu.dot_dimension_numbers<[2], [1], [1], [2], [0, 0, 0, 1, 1, 2], [0], [0]>} : vector<2x8x8xf32>, vector<2x8x8xf32>, vector<2x8x8xf32> -> vector<2x8x8xf32>
    "tpu.trace_stop"() : () -> ()
    %64 = vector.shape_cast %63 : vector<2x8x8xf32> to vector<16x8xf32>
    %c0_53 = arith.constant 0 : index
    %c1_54 = arith.constant 1 : index
    %c0_55 = arith.constant 0 : index
    %c0_56 = arith.constant 0 : index
    %65 = vector.load %arg6[%c0_53, %c1_54, %c0_55, %c0_56] : memref<4x4x8x32xf32, #tpu.memory_space<vmem>>, vector<1x1x8x32xf32>
    %66 = vector.shape_cast %65 : vector<1x1x8x32xf32> to vector<8x32xf32>
    %cst_57 = arith.constant dense<0.000000e+00> : vector<16x32xf32>
    %67 = tpu.matmul %64, %66, %cst_57 {dimension_numbers = #tpu.dot_dimension_numbers<[1], [0], [0], [1], [0, 0, 1, 1], [], []>} : vector<16x8xf32>, vector<8x32xf32>, vector<16x32xf32> -> vector<16x32xf32>
    %68 = arith.addf %36, %67 : vector<16x32xf32>
    %c0_58 = arith.constant 0 : index
    %c2 = arith.constant 2 : index
    %c0_59 = arith.constant 0 : index
    %c0_60 = arith.constant 0 : index
    %69 = vector.load %arg2[%c0_58, %c2, %c0_59, %c0_60] : memref<4x4x32x8xf32, #tpu.memory_space<vmem>>, vector<1x1x32x8xf32>
    %70 = vector.shape_cast %69 : vector<1x1x32x8xf32> to vector<32x8xf32>
    %cst_61 = arith.constant dense<0.000000e+00> : vector<16x8xf32>
    %71 = tpu.matmul %0, %70, %cst_61 {dimension_numbers = #tpu.dot_dimension_numbers<[1], [0], [0], [1], [0, 0, 1, 1], [], []>} : vector<16x32xf32>, vector<32x8xf32>, vector<16x8xf32> -> vector<16x8xf32>
    %c0_62 = arith.constant 0 : index
    %c2_63 = arith.constant 2 : index
    %c0_64 = arith.constant 0 : index
    %c0_65 = arith.constant 0 : index
    %72 = vector.load %arg3[%c0_62, %c2_63, %c0_64, %c0_65] : memref<4x4x1x8xf32, #tpu.memory_space<vmem>>, vector<1x1x1x8xf32>
    %73 = vector.shape_cast %72 : vector<1x1x1x8xf32> to vector<1x8xf32>
    %74 = vector.broadcast %73 : vector<1x8xf32> to vector<16x8xf32>
    %75 = arith.addf %71, %74 : vector<16x8xf32>
    %c0_66 = arith.constant 0 : index
    %c2_67 = arith.constant 2 : index
    %c0_68 = arith.constant 0 : index
    %c0_69 = arith.constant 0 : index
    %76 = vector.load %arg4[%c0_66, %c2_67, %c0_68, %c0_69] : memref<4x4x32x8xf32, #tpu.memory_space<vmem>>, vector<1x1x32x8xf32>
    %77 = vector.shape_cast %76 : vector<1x1x32x8xf32> to vector<32x8xf32>
    %cst_70 = arith.constant dense<0.000000e+00> : vector<16x8xf32>
    %78 = tpu.matmul %0, %77, %cst_70 {dimension_numbers = #tpu.dot_dimension_numbers<[1], [0], [0], [1], [0, 0, 1, 1], [], []>} : vector<16x32xf32>, vector<32x8xf32>, vector<16x8xf32> -> vector<16x8xf32>
    %c0_71 = arith.constant 0 : index
    %c2_72 = arith.constant 2 : index
    %c0_73 = arith.constant 0 : index
    %c0_74 = arith.constant 0 : index
    %79 = vector.load %arg5[%c0_71, %c2_72, %c0_73, %c0_74] : memref<4x4x32x8xf32, #tpu.memory_space<vmem>>, vector<1x1x32x8xf32>
    %80 = vector.shape_cast %79 : vector<1x1x32x8xf32> to vector<32x8xf32>
    %cst_75 = arith.constant dense<0.000000e+00> : vector<16x8xf32>
    %81 = tpu.matmul %0, %80, %cst_75 {dimension_numbers = #tpu.dot_dimension_numbers<[1], [0], [0], [1], [0, 0, 1, 1], [], []>} : vector<16x32xf32>, vector<32x8xf32>, vector<16x8xf32> -> vector<16x8xf32>
    %82 = vector.shape_cast %75 : vector<16x8xf32> to vector<2x8x8xf32>
    %83 = vector.shape_cast %78 : vector<16x8xf32> to vector<2x8x8xf32>
    %84 = vector.shape_cast %81 : vector<16x8xf32> to vector<2x8x8xf32>
    "tpu.trace_start"() <{level = 10 : i32, message = "bqd,bkd->bqk"}> : () -> ()
    %cst_76 = arith.constant dense<0.000000e+00> : vector<2x8x8xf32>
    %85 = tpu.matmul %82, %83, %cst_76 {dimension_numbers = #tpu.dot_dimension_numbers<[2], [2], [1], [1], [0, 0, 0, 1, 1, 1], [0], [0]>} : vector<2x8x8xf32>, vector<2x8x8xf32>, vector<2x8x8xf32> -> vector<2x8x8xf32>
    "tpu.trace_stop"() : () -> ()
    %cst_77 = arith.constant dense<0xFF800000> : vector<2x8xf32>
    %86 = vector.multi_reduction <maximumf>, %85, %cst_77 [2] : vector<2x8x8xf32> to vector<2x8xf32>
    %87 = vector.shape_cast %86 : vector<2x8xf32> to vector<2x8x1xf32>
    %88 = vector.broadcast %87 : vector<2x8x1xf32> to vector<2x8x8xf32>
    %89 = arith.subf %85, %88 : vector<2x8x8xf32>
    %90 = math.exp %89 : vector<2x8x8xf32>
    %cst_78 = arith.constant dense<0.000000e+00> : vector<2x8xf32>
    %91 = vector.multi_reduction <add>, %90, %cst_78 [2] : vector<2x8x8xf32> to vector<2x8xf32>
    %92 = vector.shape_cast %91 : vector<2x8xf32> to vector<2x8x1xf32>
    %93 = vector.broadcast %92 : vector<2x8x1xf32> to vector<2x8x8xf32>
    %94 = arith.divf %90, %93 : vector<2x8x8xf32>
    "tpu.trace_start"() <{level = 10 : i32, message = "bqk,bkd->bqd"}> : () -> ()
    %cst_79 = arith.constant dense<0.000000e+00> : vector<2x8x8xf32>
    %95 = tpu.matmul %94, %84, %cst_79 {dimension_numbers = #tpu.dot_dimension_numbers<[2], [1], [1], [2], [0, 0, 0, 1, 1, 2], [0], [0]>} : vector<2x8x8xf32>, vector<2x8x8xf32>, vector<2x8x8xf32> -> vector<2x8x8xf32>
    "tpu.trace_stop"() : () -> ()
    %96 = vector.shape_cast %95 : vector<2x8x8xf32> to vector<16x8xf32>
    %c0_80 = arith.constant 0 : index
    %c2_81 = arith.constant 2 : index
    %c0_82 = arith.constant 0 : index
    %c0_83 = arith.constant 0 : index
    %97 = vector.load %arg6[%c0_80, %c2_81, %c0_82, %c0_83] : memref<4x4x8x32xf32, #tpu.memory_space<vmem>>, vector<1x1x8x32xf32>
    %98 = vector.shape_cast %97 : vector<1x1x8x32xf32> to vector<8x32xf32>
    %cst_84 = arith.constant dense<0.000000e+00> : vector<16x32xf32>
    %99 = tpu.matmul %96, %98, %cst_84 {dimension_numbers = #tpu.dot_dimension_numbers<[1], [0], [0], [1], [0, 0, 1, 1], [], []>} : vector<16x8xf32>, vector<8x32xf32>, vector<16x32xf32> -> vector<16x32xf32>
    %100 = arith.addf %68, %99 : vector<16x32xf32>
    %c0_85 = arith.constant 0 : index
    %c3 = arith.constant 3 : index
    %c0_86 = arith.constant 0 : index
    %c0_87 = arith.constant 0 : index
    %101 = vector.load %arg2[%c0_85, %c3, %c0_86, %c0_87] : memref<4x4x32x8xf32, #tpu.memory_space<vmem>>, vector<1x1x32x8xf32>
    %102 = vector.shape_cast %101 : vector<1x1x32x8xf32> to vector<32x8xf32>
    %cst_88 = arith.constant dense<0.000000e+00> : vector<16x8xf32>
    %103 = tpu.matmul %0, %102, %cst_88 {dimension_numbers = #tpu.dot_dimension_numbers<[1], [0], [0], [1], [0, 0, 1, 1], [], []>} : vector<16x32xf32>, vector<32x8xf32>, vector<16x8xf32> -> vector<16x8xf32>
    %c0_89 = arith.constant 0 : index
    %c3_90 = arith.constant 3 : index
    %c0_91 = arith.constant 0 : index
    %c0_92 = arith.constant 0 : index
    %104 = vector.load %arg3[%c0_89, %c3_90, %c0_91, %c0_92] : memref<4x4x1x8xf32, #tpu.memory_space<vmem>>, vector<1x1x1x8xf32>
    %105 = vector.shape_cast %104 : vector<1x1x1x8xf32> to vector<1x8xf32>
    %106 = vector.broadcast %105 : vector<1x8xf32> to vector<16x8xf32>
    %107 = arith.addf %103, %106 : vector<16x8xf32>
    %c0_93 = arith.constant 0 : index
    %c3_94 = arith.constant 3 : index
    %c0_95 = arith.constant 0 : index
    %c0_96 = arith.constant 0 : index
    %108 = vector.load %arg4[%c0_93, %c3_94, %c0_95, %c0_96] : memref<4x4x32x8xf32, #tpu.memory_space<vmem>>, vector<1x1x32x8xf32>
    %109 = vector.shape_cast %108 : vector<1x1x32x8xf32> to vector<32x8xf32>
    %cst_97 = arith.constant dense<0.000000e+00> : vector<16x8xf32>
    %110 = tpu.matmul %0, %109, %cst_97 {dimension_numbers = #tpu.dot_dimension_numbers<[1], [0], [0], [1], [0, 0, 1, 1], [], []>} : vector<16x32xf32>, vector<32x8xf32>, vector<16x8xf32> -> vector<16x8xf32>
    %c0_98 = arith.constant 0 : index
    %c3_99 = arith.constant 3 : index
    %c0_100 = arith.constant 0 : index
    %c0_101 = arith.constant 0 : index
    %111 = vector.load %arg5[%c0_98, %c3_99, %c0_100, %c0_101] : memref<4x4x32x8xf32, #tpu.memory_space<vmem>>, vector<1x1x32x8xf32>
    %112 = vector.shape_cast %111 : vector<1x1x32x8xf32> to vector<32x8xf32>
    %cst_102 = arith.constant dense<0.000000e+00> : vector<16x8xf32>
    %113 = tpu.matmul %0, %112, %cst_102 {dimension_numbers = #tpu.dot_dimension_numbers<[1], [0], [0], [1], [0, 0, 1, 1], [], []>} : vector<16x32xf32>, vector<32x8xf32>, vector<16x8xf32> -> vector<16x8xf32>
    %114 = vector.shape_cast %107 : vector<16x8xf32> to vector<2x8x8xf32>
    %115 = vector.shape_cast %110 : vector<16x8xf32> to vector<2x8x8xf32>
    %116 = vector.shape_cast %113 : vector<16x8xf32> to vector<2x8x8xf32>
    "tpu.trace_start"() <{level = 10 : i32, message = "bqd,bkd->bqk"}> : () -> ()
    %cst_103 = arith.constant dense<0.000000e+00> : vector<2x8x8xf32>
    %117 = tpu.matmul %114, %115, %cst_103 {dimension_numbers = #tpu.dot_dimension_numbers<[2], [2], [1], [1], [0, 0, 0, 1, 1, 1], [0], [0]>} : vector<2x8x8xf32>, vector<2x8x8xf32>, vector<2x8x8xf32> -> vector<2x8x8xf32>
    "tpu.trace_stop"() : () -> ()
    %cst_104 = arith.constant dense<0xFF800000> : vector<2x8xf32>
    %118 = vector.multi_reduction <maximumf>, %117, %cst_104 [2] : vector<2x8x8xf32> to vector<2x8xf32>
    %119 = vector.shape_cast %118 : vector<2x8xf32> to vector<2x8x1xf32>
    %120 = vector.broadcast %119 : vector<2x8x1xf32> to vector<2x8x8xf32>
    %121 = arith.subf %117, %120 : vector<2x8x8xf32>
    %122 = math.exp %121 : vector<2x8x8xf32>
    %cst_105 = arith.constant dense<0.000000e+00> : vector<2x8xf32>
    %123 = vector.multi_reduction <add>, %122, %cst_105 [2] : vector<2x8x8xf32> to vector<2x8xf32>
    %124 = vector.shape_cast %123 : vector<2x8xf32> to vector<2x8x1xf32>
    %125 = vector.broadcast %124 : vector<2x8x1xf32> to vector<2x8x8xf32>
    %126 = arith.divf %122, %125 : vector<2x8x8xf32>
    "tpu.trace_start"() <{level = 10 : i32, message = "bqk,bkd->bqd"}> : () -> ()
    %cst_106 = arith.constant dense<0.000000e+00> : vector<2x8x8xf32>
    %127 = tpu.matmul %126, %116, %cst_106 {dimension_numbers = #tpu.dot_dimension_numbers<[2], [1], [1], [2], [0, 0, 0, 1, 1, 2], [0], [0]>} : vector<2x8x8xf32>, vector<2x8x8xf32>, vector<2x8x8xf32> -> vector<2x8x8xf32>
    "tpu.trace_stop"() : () -> ()
    %128 = vector.shape_cast %127 : vector<2x8x8xf32> to vector<16x8xf32>
    %c0_107 = arith.constant 0 : index
    %c3_108 = arith.constant 3 : index
    %c0_109 = arith.constant 0 : index
    %c0_110 = arith.constant 0 : index
    %129 = vector.load %arg6[%c0_107, %c3_108, %c0_109, %c0_110] : memref<4x4x8x32xf32, #tpu.memory_space<vmem>>, vector<1x1x8x32xf32>
    %130 = vector.shape_cast %129 : vector<1x1x8x32xf32> to vector<8x32xf32>
    %cst_111 = arith.constant dense<0.000000e+00> : vector<16x32xf32>
    %131 = tpu.matmul %128, %130, %cst_111 {dimension_numbers = #tpu.dot_dimension_numbers<[1], [0], [0], [1], [0, 0, 1, 1], [], []>} : vector<16x8xf32>, vector<8x32xf32>, vector<16x32xf32> -> vector<16x32xf32>
    %132 = arith.addf %100, %131 : vector<16x32xf32>
    %c0_112 = arith.constant 0 : index
    %c0_113 = arith.constant 0 : index
    %c0_114 = arith.constant 0 : index
    %133 = vector.load %arg8[%c0_112, %c0_113, %c0_114] : memref<4x1x32xf32, #tpu.memory_space<vmem>>, vector<1x1x32xf32>
    %134 = vector.shape_cast %133 : vector<1x1x32xf32> to vector<1x32xf32>
    %c0_115 = arith.constant 0 : index
    %c0_116 = arith.constant 0 : index
    %c0_117 = arith.constant 0 : index
    %135 = vector.load %arg9[%c0_115, %c0_116, %c0_117] : memref<4x1x32xf32, #tpu.memory_space<vmem>>, vector<1x1x32xf32>
    %136 = vector.shape_cast %135 : vector<1x1x32xf32> to vector<1x32xf32>
    %cst_118 = arith.constant dense<0.000000e+00> : vector<16xf32>
    %137 = vector.multi_reduction <add>, %132, %cst_118 [1] : vector<16x32xf32> to vector<16xf32>
    %138 = vector.shape_cast %137 : vector<16xf32> to vector<16x1xf32>
    %cst_119 = arith.constant 3.200000e+01 : f32
    %139 = vector.broadcast %cst_119 : f32 to vector<16x1xf32>
    %140 = arith.divf %138, %139 : vector<16x1xf32>
    %141 = vector.broadcast %140 : vector<16x1xf32> to vector<16x32xf32>
    %142 = arith.subf %132, %141 : vector<16x32xf32>
    %143 = arith.mulf %142, %142 : vector<16x32xf32>
    %cst_120 = arith.constant dense<0.000000e+00> : vector<16xf32>
    %144 = vector.multi_reduction <add>, %143, %cst_120 [1] : vector<16x32xf32> to vector<16xf32>
    %145 = vector.shape_cast %144 : vector<16xf32> to vector<16x1xf32>
    %cst_121 = arith.constant 3.200000e+01 : f32
    %146 = vector.broadcast %cst_121 : f32 to vector<16x1xf32>
    %147 = arith.divf %145, %146 : vector<16x1xf32>
    %148 = vector.broadcast %140 : vector<16x1xf32> to vector<16x32xf32>
    %149 = arith.subf %132, %148 : vector<16x32xf32>
    %cst_122 = arith.constant 9.99999974E-6 : f32
    %150 = vector.broadcast %cst_122 : f32 to vector<16x1xf32>
    %151 = arith.addf %147, %150 : vector<16x1xf32>
    %152 = math.rsqrt %151 : vector<16x1xf32>
    %153 = vector.broadcast %152 : vector<16x1xf32> to vector<16x32xf32>
    %154 = arith.mulf %149, %153 : vector<16x32xf32>
    %155 = vector.broadcast %134 : vector<1x32xf32> to vector<16x32xf32>
    %156 = arith.mulf %154, %155 : vector<16x32xf32>
    %157 = vector.broadcast %136 : vector<1x32xf32> to vector<16x32xf32>
    %158 = arith.addf %156, %157 : vector<16x32xf32>
    %c0_123 = arith.constant 0 : index
    %c0_124 = arith.constant 0 : index
    %c0_125 = arith.constant 0 : index
    %159 = vector.load %arg10[%c0_123, %c0_124, %c0_125] : memref<4x32x64xf32, #tpu.memory_space<vmem>>, vector<1x32x64xf32>
    %160 = vector.shape_cast %159 : vector<1x32x64xf32> to vector<32x64xf32>
    %cst_126 = arith.constant dense<0.000000e+00> : vector<16x64xf32>
    %161 = tpu.matmul %158, %160, %cst_126 {dimension_numbers = #tpu.dot_dimension_numbers<[1], [0], [0], [1], [0, 0, 1, 1], [], []>} : vector<16x32xf32>, vector<32x64xf32>, vector<16x64xf32> -> vector<16x64xf32>
    %c0_127 = arith.constant 0 : index
    %c0_128 = arith.constant 0 : index
    %c0_129 = arith.constant 0 : index
    %162 = vector.load %arg11[%c0_127, %c0_128, %c0_129] : memref<4x1x64xf32, #tpu.memory_space<vmem>>, vector<1x1x64xf32>
    %163 = vector.shape_cast %162 : vector<1x1x64xf32> to vector<1x64xf32>
    %164 = vector.broadcast %163 : vector<1x64xf32> to vector<16x64xf32>
    %165 = arith.addf %161, %164 : vector<16x64xf32>
    %cst_130 = arith.constant 0.000000e+00 : f32
    %166 = vector.broadcast %cst_130 : f32 to vector<16x64xf32>
    %167 = arith.maximumf %165, %166 : vector<16x64xf32>
    %c0_131 = arith.constant 0 : index
    %c0_132 = arith.constant 0 : index
    %c0_133 = arith.constant 0 : index
    %168 = vector.load %arg12[%c0_131, %c0_132, %c0_133] : memref<4x64x32xf32, #tpu.memory_space<vmem>>, vector<1x64x32xf32>
    %169 = vector.shape_cast %168 : vector<1x64x32xf32> to vector<64x32xf32>
    %cst_134 = arith.constant dense<0.000000e+00> : vector<16x32xf32>
    %170 = tpu.matmul %167, %169, %cst_134 {dimension_numbers = #tpu.dot_dimension_numbers<[1], [0], [0], [1], [0, 0, 1, 1], [], []>} : vector<16x64xf32>, vector<64x32xf32>, vector<16x32xf32> -> vector<16x32xf32>
    %c0_135 = arith.constant 0 : index
    %c0_136 = arith.constant 0 : index
    %c0_137 = arith.constant 0 : index
    %171 = vector.load %arg13[%c0_135, %c0_136, %c0_137] : memref<4x1x32xf32, #tpu.memory_space<vmem>>, vector<1x1x32xf32>
    %172 = vector.shape_cast %171 : vector<1x1x32xf32> to vector<1x32xf32>
    %173 = vector.broadcast %172 : vector<1x32xf32> to vector<16x32xf32>
    %174 = arith.addf %170, %173 : vector<16x32xf32>
    %175 = arith.addf %158, %174 : vector<16x32xf32>
    %c0_138 = arith.constant 0 : index
    %c0_139 = arith.constant 0 : index
    %c0_140 = arith.constant 0 : index
    %176 = vector.load %arg14[%c0_138, %c0_139, %c0_140] : memref<4x1x32xf32, #tpu.memory_space<vmem>>, vector<1x1x32xf32>
    %177 = vector.shape_cast %176 : vector<1x1x32xf32> to vector<1x32xf32>
    %c0_141 = arith.constant 0 : index
    %c0_142 = arith.constant 0 : index
    %c0_143 = arith.constant 0 : index
    %178 = vector.load %arg15[%c0_141, %c0_142, %c0_143] : memref<4x1x32xf32, #tpu.memory_space<vmem>>, vector<1x1x32xf32>
    %179 = vector.shape_cast %178 : vector<1x1x32xf32> to vector<1x32xf32>
    %cst_144 = arith.constant dense<0.000000e+00> : vector<16xf32>
    %180 = vector.multi_reduction <add>, %175, %cst_144 [1] : vector<16x32xf32> to vector<16xf32>
    %181 = vector.shape_cast %180 : vector<16xf32> to vector<16x1xf32>
    %cst_145 = arith.constant 3.200000e+01 : f32
    %182 = vector.broadcast %cst_145 : f32 to vector<16x1xf32>
    %183 = arith.divf %181, %182 : vector<16x1xf32>
    %184 = vector.broadcast %183 : vector<16x1xf32> to vector<16x32xf32>
    %185 = arith.subf %175, %184 : vector<16x32xf32>
    %186 = arith.mulf %185, %185 : vector<16x32xf32>
    %cst_146 = arith.constant dense<0.000000e+00> : vector<16xf32>
    %187 = vector.multi_reduction <add>, %186, %cst_146 [1] : vector<16x32xf32> to vector<16xf32>
    %188 = vector.shape_cast %187 : vector<16xf32> to vector<16x1xf32>
    %cst_147 = arith.constant 3.200000e+01 : f32
    %189 = vector.broadcast %cst_147 : f32 to vector<16x1xf32>
    %190 = arith.divf %188, %189 : vector<16x1xf32>
    %191 = vector.broadcast %183 : vector<16x1xf32> to vector<16x32xf32>
    %192 = arith.subf %175, %191 : vector<16x32xf32>
    %cst_148 = arith.constant 9.99999974E-6 : f32
    %193 = vector.broadcast %cst_148 : f32 to vector<16x1xf32>
    %194 = arith.addf %190, %193 : vector<16x1xf32>
    %195 = math.rsqrt %194 : vector<16x1xf32>
    %196 = vector.broadcast %195 : vector<16x1xf32> to vector<16x32xf32>
    %197 = arith.mulf %192, %196 : vector<16x32xf32>
    %198 = vector.broadcast %177 : vector<1x32xf32> to vector<16x32xf32>
    %199 = arith.mulf %197, %198 : vector<16x32xf32>
    %200 = vector.broadcast %179 : vector<1x32xf32> to vector<16x32xf32>
    %201 = arith.addf %199, %200 : vector<16x32xf32>
    %c1_149 = arith.constant 1 : index
    %c0_150 = arith.constant 0 : index
    %c0_151 = arith.constant 0 : index
    %202 = vector.load %arg7[%c1_149, %c0_150, %c0_151] : memref<4x1x32xf32, #tpu.memory_space<vmem>>, vector<1x1x32xf32>
    %203 = vector.shape_cast %202 : vector<1x1x32xf32> to vector<1x32xf32>
    %204 = vector.broadcast %203 : vector<1x32xf32> to vector<16x32xf32>
    %205 = arith.addf %201, %204 : vector<16x32xf32>
    %c1_152 = arith.constant 1 : index
    %c0_153 = arith.constant 0 : index
    %c0_154 = arith.constant 0 : index
    %c0_155 = arith.constant 0 : index
    %206 = vector.load %arg2[%c1_152, %c0_153, %c0_154, %c0_155] : memref<4x4x32x8xf32, #tpu.memory_space<vmem>>, vector<1x1x32x8xf32>
    %207 = vector.shape_cast %206 : vector<1x1x32x8xf32> to vector<32x8xf32>
    %cst_156 = arith.constant dense<0.000000e+00> : vector<16x8xf32>
    %208 = tpu.matmul %201, %207, %cst_156 {dimension_numbers = #tpu.dot_dimension_numbers<[1], [0], [0], [1], [0, 0, 1, 1], [], []>} : vector<16x32xf32>, vector<32x8xf32>, vector<16x8xf32> -> vector<16x8xf32>
    %c1_157 = arith.constant 1 : index
    %c0_158 = arith.constant 0 : index
    %c0_159 = arith.constant 0 : index
    %c0_160 = arith.constant 0 : index
    %209 = vector.load %arg3[%c1_157, %c0_158, %c0_159, %c0_160] : memref<4x4x1x8xf32, #tpu.memory_space<vmem>>, vector<1x1x1x8xf32>
    %210 = vector.shape_cast %209 : vector<1x1x1x8xf32> to vector<1x8xf32>
    %211 = vector.broadcast %210 : vector<1x8xf32> to vector<16x8xf32>
    %212 = arith.addf %208, %211 : vector<16x8xf32>
    %c1_161 = arith.constant 1 : index
    %c0_162 = arith.constant 0 : index
    %c0_163 = arith.constant 0 : index
    %c0_164 = arith.constant 0 : index
    %213 = vector.load %arg4[%c1_161, %c0_162, %c0_163, %c0_164] : memref<4x4x32x8xf32, #tpu.memory_space<vmem>>, vector<1x1x32x8xf32>
    %214 = vector.shape_cast %213 : vector<1x1x32x8xf32> to vector<32x8xf32>
    %cst_165 = arith.constant dense<0.000000e+00> : vector<16x8xf32>
    %215 = tpu.matmul %201, %214, %cst_165 {dimension_numbers = #tpu.dot_dimension_numbers<[1], [0], [0], [1], [0, 0, 1, 1], [], []>} : vector<16x32xf32>, vector<32x8xf32>, vector<16x8xf32> -> vector<16x8xf32>
    %c1_166 = arith.constant 1 : index
    %c0_167 = arith.constant 0 : index
    %c0_168 = arith.constant 0 : index
    %c0_169 = arith.constant 0 : index
    %216 = vector.load %arg5[%c1_166, %c0_167, %c0_168, %c0_169] : memref<4x4x32x8xf32, #tpu.memory_space<vmem>>, vector<1x1x32x8xf32>
    %217 = vector.shape_cast %216 : vector<1x1x32x8xf32> to vector<32x8xf32>
    %cst_170 = arith.constant dense<0.000000e+00> : vector<16x8xf32>
    %218 = tpu.matmul %201, %217, %cst_170 {dimension_numbers = #tpu.dot_dimension_numbers<[1], [0], [0], [1], [0, 0, 1, 1], [], []>} : vector<16x32xf32>, vector<32x8xf32>, vector<16x8xf32> -> vector<16x8xf32>
    %219 = vector.shape_cast %212 : vector<16x8xf32> to vector<2x8x8xf32>
    %220 = vector.shape_cast %215 : vector<16x8xf32> to vector<2x8x8xf32>
    %221 = vector.shape_cast %218 : vector<16x8xf32> to vector<2x8x8xf32>
    "tpu.trace_start"() <{level = 10 : i32, message = "bqd,bkd->bqk"}> : () -> ()
    %cst_171 = arith.constant dense<0.000000e+00> : vector<2x8x8xf32>
    %222 = tpu.matmul %219, %220, %cst_171 {dimension_numbers = #tpu.dot_dimension_numbers<[2], [2], [1], [1], [0, 0, 0, 1, 1, 1], [0], [0]>} : vector<2x8x8xf32>, vector<2x8x8xf32>, vector<2x8x8xf32> -> vector<2x8x8xf32>
    "tpu.trace_stop"() : () -> ()
    %cst_172 = arith.constant dense<0xFF800000> : vector<2x8xf32>
    %223 = vector.multi_reduction <maximumf>, %222, %cst_172 [2] : vector<2x8x8xf32> to vector<2x8xf32>
    %224 = vector.shape_cast %223 : vector<2x8xf32> to vector<2x8x1xf32>
    %225 = vector.broadcast %224 : vector<2x8x1xf32> to vector<2x8x8xf32>
    %226 = arith.subf %222, %225 : vector<2x8x8xf32>
    %227 = math.exp %226 : vector<2x8x8xf32>
    %cst_173 = arith.constant dense<0.000000e+00> : vector<2x8xf32>
    %228 = vector.multi_reduction <add>, %227, %cst_173 [2] : vector<2x8x8xf32> to vector<2x8xf32>
    %229 = vector.shape_cast %228 : vector<2x8xf32> to vector<2x8x1xf32>
    %230 = vector.broadcast %229 : vector<2x8x1xf32> to vector<2x8x8xf32>
    %231 = arith.divf %227, %230 : vector<2x8x8xf32>
    "tpu.trace_start"() <{level = 10 : i32, message = "bqk,bkd->bqd"}> : () -> ()
    %cst_174 = arith.constant dense<0.000000e+00> : vector<2x8x8xf32>
    %232 = tpu.matmul %231, %221, %cst_174 {dimension_numbers = #tpu.dot_dimension_numbers<[2], [1], [1], [2], [0, 0, 0, 1, 1, 2], [0], [0]>} : vector<2x8x8xf32>, vector<2x8x8xf32>, vector<2x8x8xf32> -> vector<2x8x8xf32>
    "tpu.trace_stop"() : () -> ()
    %233 = vector.shape_cast %232 : vector<2x8x8xf32> to vector<16x8xf32>
    %c1_175 = arith.constant 1 : index
    %c0_176 = arith.constant 0 : index
    %c0_177 = arith.constant 0 : index
    %c0_178 = arith.constant 0 : index
    %234 = vector.load %arg6[%c1_175, %c0_176, %c0_177, %c0_178] : memref<4x4x8x32xf32, #tpu.memory_space<vmem>>, vector<1x1x8x32xf32>
    %235 = vector.shape_cast %234 : vector<1x1x8x32xf32> to vector<8x32xf32>
    %cst_179 = arith.constant dense<0.000000e+00> : vector<16x32xf32>
    %236 = tpu.matmul %233, %235, %cst_179 {dimension_numbers = #tpu.dot_dimension_numbers<[1], [0], [0], [1], [0, 0, 1, 1], [], []>} : vector<16x8xf32>, vector<8x32xf32>, vector<16x32xf32> -> vector<16x32xf32>
    %237 = arith.addf %205, %236 : vector<16x32xf32>
    %c1_180 = arith.constant 1 : index
    %c1_181 = arith.constant 1 : index
    %c0_182 = arith.constant 0 : index
    %c0_183 = arith.constant 0 : index
    %238 = vector.load %arg2[%c1_180, %c1_181, %c0_182, %c0_183] : memref<4x4x32x8xf32, #tpu.memory_space<vmem>>, vector<1x1x32x8xf32>
    %239 = vector.shape_cast %238 : vector<1x1x32x8xf32> to vector<32x8xf32>
    %cst_184 = arith.constant dense<0.000000e+00> : vector<16x8xf32>
    %240 = tpu.matmul %201, %239, %cst_184 {dimension_numbers = #tpu.dot_dimension_numbers<[1], [0], [0], [1], [0, 0, 1, 1], [], []>} : vector<16x32xf32>, vector<32x8xf32>, vector<16x8xf32> -> vector<16x8xf32>
    %c1_185 = arith.constant 1 : index
    %c1_186 = arith.constant 1 : index
    %c0_187 = arith.constant 0 : index
    %c0_188 = arith.constant 0 : index
    %241 = vector.load %arg3[%c1_185, %c1_186, %c0_187, %c0_188] : memref<4x4x1x8xf32, #tpu.memory_space<vmem>>, vector<1x1x1x8xf32>
    %242 = vector.shape_cast %241 : vector<1x1x1x8xf32> to vector<1x8xf32>
    %243 = vector.broadcast %242 : vector<1x8xf32> to vector<16x8xf32>
    %244 = arith.addf %240, %243 : vector<16x8xf32>
    %c1_189 = arith.constant 1 : index
    %c1_190 = arith.constant 1 : index
    %c0_191 = arith.constant 0 : index
    %c0_192 = arith.constant 0 : index
    %245 = vector.load %arg4[%c1_189, %c1_190, %c0_191, %c0_192] : memref<4x4x32x8xf32, #tpu.memory_space<vmem>>, vector<1x1x32x8xf32>
    %246 = vector.shape_cast %245 : vector<1x1x32x8xf32> to vector<32x8xf32>
    %cst_193 = arith.constant dense<0.000000e+00> : vector<16x8xf32>
    %247 = tpu.matmul %201, %246, %cst_193 {dimension_numbers = #tpu.dot_dimension_numbers<[1], [0], [0], [1], [0, 0, 1, 1], [], []>} : vector<16x32xf32>, vector<32x8xf32>, vector<16x8xf32> -> vector<16x8xf32>
    %c1_194 = arith.constant 1 : index
    %c1_195 = arith.constant 1 : index
    %c0_196 = arith.constant 0 : index
    %c0_197 = arith.constant 0 : index
    %248 = vector.load %arg5[%c1_194, %c1_195, %c0_196, %c0_197] : memref<4x4x32x8xf32, #tpu.memory_space<vmem>>, vector<1x1x32x8xf32>
    %249 = vector.shape_cast %248 : vector<1x1x32x8xf32> to vector<32x8xf32>
    %cst_198 = arith.constant dense<0.000000e+00> : vector<16x8xf32>
    %250 = tpu.matmul %201, %249, %cst_198 {dimension_numbers = #tpu.dot_dimension_numbers<[1], [0], [0], [1], [0, 0, 1, 1], [], []>} : vector<16x32xf32>, vector<32x8xf32>, vector<16x8xf32> -> vector<16x8xf32>
    %251 = vector.shape_cast %244 : vector<16x8xf32> to vector<2x8x8xf32>
    %252 = vector.shape_cast %247 : vector<16x8xf32> to vector<2x8x8xf32>
    %253 = vector.shape_cast %250 : vector<16x8xf32> to vector<2x8x8xf32>
    "tpu.trace_start"() <{level = 10 : i32, message = "bqd,bkd->bqk"}> : () -> ()
    %cst_199 = arith.constant dense<0.000000e+00> : vector<2x8x8xf32>
    %254 = tpu.matmul %251, %252, %cst_199 {dimension_numbers = #tpu.dot_dimension_numbers<[2], [2], [1], [1], [0, 0, 0, 1, 1, 1], [0], [0]>} : vector<2x8x8xf32>, vector<2x8x8xf32>, vector<2x8x8xf32> -> vector<2x8x8xf32>
    "tpu.trace_stop"() : () -> ()
    %cst_200 = arith.constant dense<0xFF800000> : vector<2x8xf32>
    %255 = vector.multi_reduction <maximumf>, %254, %cst_200 [2] : vector<2x8x8xf32> to vector<2x8xf32>
    %256 = vector.shape_cast %255 : vector<2x8xf32> to vector<2x8x1xf32>
    %257 = vector.broadcast %256 : vector<2x8x1xf32> to vector<2x8x8xf32>
    %258 = arith.subf %254, %257 : vector<2x8x8xf32>
    %259 = math.exp %258 : vector<2x8x8xf32>
    %cst_201 = arith.constant dense<0.000000e+00> : vector<2x8xf32>
    %260 = vector.multi_reduction <add>, %259, %cst_201 [2] : vector<2x8x8xf32> to vector<2x8xf32>
    %261 = vector.shape_cast %260 : vector<2x8xf32> to vector<2x8x1xf32>
    %262 = vector.broadcast %261 : vector<2x8x1xf32> to vector<2x8x8xf32>
    %263 = arith.divf %259, %262 : vector<2x8x8xf32>
    "tpu.trace_start"() <{level = 10 : i32, message = "bqk,bkd->bqd"}> : () -> ()
    %cst_202 = arith.constant dense<0.000000e+00> : vector<2x8x8xf32>
    %264 = tpu.matmul %263, %253, %cst_202 {dimension_numbers = #tpu.dot_dimension_numbers<[2], [1], [1], [2], [0, 0, 0, 1, 1, 2], [0], [0]>} : vector<2x8x8xf32>, vector<2x8x8xf32>, vector<2x8x8xf32> -> vector<2x8x8xf32>
    "tpu.trace_stop"() : () -> ()
    %265 = vector.shape_cast %264 : vector<2x8x8xf32> to vector<16x8xf32>
    %c1_203 = arith.constant 1 : index
    %c1_204 = arith.constant 1 : index
    %c0_205 = arith.constant 0 : index
    %c0_206 = arith.constant 0 : index
    %266 = vector.load %arg6[%c1_203, %c1_204, %c0_205, %c0_206] : memref<4x4x8x32xf32, #tpu.memory_space<vmem>>, vector<1x1x8x32xf32>
    %267 = vector.shape_cast %266 : vector<1x1x8x32xf32> to vector<8x32xf32>
    %cst_207 = arith.constant dense<0.000000e+00> : vector<16x32xf32>
    %268 = tpu.matmul %265, %267, %cst_207 {dimension_numbers = #tpu.dot_dimension_numbers<[1], [0], [0], [1], [0, 0, 1, 1], [], []>} : vector<16x8xf32>, vector<8x32xf32>, vector<16x32xf32> -> vector<16x32xf32>
    %269 = arith.addf %237, %268 : vector<16x32xf32>
    %c1_208 = arith.constant 1 : index
    %c2_209 = arith.constant 2 : index
    %c0_210 = arith.constant 0 : index
    %c0_211 = arith.constant 0 : index
    %270 = vector.load %arg2[%c1_208, %c2_209, %c0_210, %c0_211] : memref<4x4x32x8xf32, #tpu.memory_space<vmem>>, vector<1x1x32x8xf32>
    %271 = vector.shape_cast %270 : vector<1x1x32x8xf32> to vector<32x8xf32>
    %cst_212 = arith.constant dense<0.000000e+00> : vector<16x8xf32>
    %272 = tpu.matmul %201, %271, %cst_212 {dimension_numbers = #tpu.dot_dimension_numbers<[1], [0], [0], [1], [0, 0, 1, 1], [], []>} : vector<16x32xf32>, vector<32x8xf32>, vector<16x8xf32> -> vector<16x8xf32>
    %c1_213 = arith.constant 1 : index
    %c2_214 = arith.constant 2 : index
    %c0_215 = arith.constant 0 : index
    %c0_216 = arith.constant 0 : index
    %273 = vector.load %arg3[%c1_213, %c2_214, %c0_215, %c0_216] : memref<4x4x1x8xf32, #tpu.memory_space<vmem>>, vector<1x1x1x8xf32>
    %274 = vector.shape_cast %273 : vector<1x1x1x8xf32> to vector<1x8xf32>
    %275 = vector.broadcast %274 : vector<1x8xf32> to vector<16x8xf32>
    %276 = arith.addf %272, %275 : vector<16x8xf32>
    %c1_217 = arith.constant 1 : index
    %c2_218 = arith.constant 2 : index
    %c0_219 = arith.constant 0 : index
    %c0_220 = arith.constant 0 : index
    %277 = vector.load %arg4[%c1_217, %c2_218, %c0_219, %c0_220] : memref<4x4x32x8xf32, #tpu.memory_space<vmem>>, vector<1x1x32x8xf32>
    %278 = vector.shape_cast %277 : vector<1x1x32x8xf32> to vector<32x8xf32>
    %cst_221 = arith.constant dense<0.000000e+00> : vector<16x8xf32>
    %279 = tpu.matmul %201, %278, %cst_221 {dimension_numbers = #tpu.dot_dimension_numbers<[1], [0], [0], [1], [0, 0, 1, 1], [], []>} : vector<16x32xf32>, vector<32x8xf32>, vector<16x8xf32> -> vector<16x8xf32>
    %c1_222 = arith.constant 1 : index
    %c2_223 = arith.constant 2 : index
    %c0_224 = arith.constant 0 : index
    %c0_225 = arith.constant 0 : index
    %280 = vector.load %arg5[%c1_222, %c2_223, %c0_224, %c0_225] : memref<4x4x32x8xf32, #tpu.memory_space<vmem>>, vector<1x1x32x8xf32>
    %281 = vector.shape_cast %280 : vector<1x1x32x8xf32> to vector<32x8xf32>
    %cst_226 = arith.constant dense<0.000000e+00> : vector<16x8xf32>
    %282 = tpu.matmul %201, %281, %cst_226 {dimension_numbers = #tpu.dot_dimension_numbers<[1], [0], [0], [1], [0, 0, 1, 1], [], []>} : vector<16x32xf32>, vector<32x8xf32>, vector<16x8xf32> -> vector<16x8xf32>
    %283 = vector.shape_cast %276 : vector<16x8xf32> to vector<2x8x8xf32>
    %284 = vector.shape_cast %279 : vector<16x8xf32> to vector<2x8x8xf32>
    %285 = vector.shape_cast %282 : vector<16x8xf32> to vector<2x8x8xf32>
    "tpu.trace_start"() <{level = 10 : i32, message = "bqd,bkd->bqk"}> : () -> ()
    %cst_227 = arith.constant dense<0.000000e+00> : vector<2x8x8xf32>
    %286 = tpu.matmul %283, %284, %cst_227 {dimension_numbers = #tpu.dot_dimension_numbers<[2], [2], [1], [1], [0, 0, 0, 1, 1, 1], [0], [0]>} : vector<2x8x8xf32>, vector<2x8x8xf32>, vector<2x8x8xf32> -> vector<2x8x8xf32>
    "tpu.trace_stop"() : () -> ()
    %cst_228 = arith.constant dense<0xFF800000> : vector<2x8xf32>
    %287 = vector.multi_reduction <maximumf>, %286, %cst_228 [2] : vector<2x8x8xf32> to vector<2x8xf32>
    %288 = vector.shape_cast %287 : vector<2x8xf32> to vector<2x8x1xf32>
    %289 = vector.broadcast %288 : vector<2x8x1xf32> to vector<2x8x8xf32>
    %290 = arith.subf %286, %289 : vector<2x8x8xf32>
    %291 = math.exp %290 : vector<2x8x8xf32>
    %cst_229 = arith.constant dense<0.000000e+00> : vector<2x8xf32>
    %292 = vector.multi_reduction <add>, %291, %cst_229 [2] : vector<2x8x8xf32> to vector<2x8xf32>
    %293 = vector.shape_cast %292 : vector<2x8xf32> to vector<2x8x1xf32>
    %294 = vector.broadcast %293 : vector<2x8x1xf32> to vector<2x8x8xf32>
    %295 = arith.divf %291, %294 : vector<2x8x8xf32>
    "tpu.trace_start"() <{level = 10 : i32, message = "bqk,bkd->bqd"}> : () -> ()
    %cst_230 = arith.constant dense<0.000000e+00> : vector<2x8x8xf32>
    %296 = tpu.matmul %295, %285, %cst_230 {dimension_numbers = #tpu.dot_dimension_numbers<[2], [1], [1], [2], [0, 0, 0, 1, 1, 2], [0], [0]>} : vector<2x8x8xf32>, vector<2x8x8xf32>, vector<2x8x8xf32> -> vector<2x8x8xf32>
    "tpu.trace_stop"() : () -> ()
    %297 = vector.shape_cast %296 : vector<2x8x8xf32> to vector<16x8xf32>
    %c1_231 = arith.constant 1 : index
    %c2_232 = arith.constant 2 : index
    %c0_233 = arith.constant 0 : index
    %c0_234 = arith.constant 0 : index
    %298 = vector.load %arg6[%c1_231, %c2_232, %c0_233, %c0_234] : memref<4x4x8x32xf32, #tpu.memory_space<vmem>>, vector<1x1x8x32xf32>
    %299 = vector.shape_cast %298 : vector<1x1x8x32xf32> to vector<8x32xf32>
    %cst_235 = arith.constant dense<0.000000e+00> : vector<16x32xf32>
    %300 = tpu.matmul %297, %299, %cst_235 {dimension_numbers = #tpu.dot_dimension_numbers<[1], [0], [0], [1], [0, 0, 1, 1], [], []>} : vector<16x8xf32>, vector<8x32xf32>, vector<16x32xf32> -> vector<16x32xf32>
    %301 = arith.addf %269, %300 : vector<16x32xf32>
    %c1_236 = arith.constant 1 : index
    %c3_237 = arith.constant 3 : index
    %c0_238 = arith.constant 0 : index
    %c0_239 = arith.constant 0 : index
    %302 = vector.load %arg2[%c1_236, %c3_237, %c0_238, %c0_239] : memref<4x4x32x8xf32, #tpu.memory_space<vmem>>, vector<1x1x32x8xf32>
    %303 = vector.shape_cast %302 : vector<1x1x32x8xf32> to vector<32x8xf32>
    %cst_240 = arith.constant dense<0.000000e+00> : vector<16x8xf32>
    %304 = tpu.matmul %201, %303, %cst_240 {dimension_numbers = #tpu.dot_dimension_numbers<[1], [0], [0], [1], [0, 0, 1, 1], [], []>} : vector<16x32xf32>, vector<32x8xf32>, vector<16x8xf32> -> vector<16x8xf32>
    %c1_241 = arith.constant 1 : index
    %c3_242 = arith.constant 3 : index
    %c0_243 = arith.constant 0 : index
    %c0_244 = arith.constant 0 : index
    %305 = vector.load %arg3[%c1_241, %c3_242, %c0_243, %c0_244] : memref<4x4x1x8xf32, #tpu.memory_space<vmem>>, vector<1x1x1x8xf32>
    %306 = vector.shape_cast %305 : vector<1x1x1x8xf32> to vector<1x8xf32>
    %307 = vector.broadcast %306 : vector<1x8xf32> to vector<16x8xf32>
    %308 = arith.addf %304, %307 : vector<16x8xf32>
    %c1_245 = arith.constant 1 : index
    %c3_246 = arith.constant 3 : index
    %c0_247 = arith.constant 0 : index
    %c0_248 = arith.constant 0 : index
    %309 = vector.load %arg4[%c1_245, %c3_246, %c0_247, %c0_248] : memref<4x4x32x8xf32, #tpu.memory_space<vmem>>, vector<1x1x32x8xf32>
    %310 = vector.shape_cast %309 : vector<1x1x32x8xf32> to vector<32x8xf32>
    %cst_249 = arith.constant dense<0.000000e+00> : vector<16x8xf32>
    %311 = tpu.matmul %201, %310, %cst_249 {dimension_numbers = #tpu.dot_dimension_numbers<[1], [0], [0], [1], [0, 0, 1, 1], [], []>} : vector<16x32xf32>, vector<32x8xf32>, vector<16x8xf32> -> vector<16x8xf32>
    %c1_250 = arith.constant 1 : index
    %c3_251 = arith.constant 3 : index
    %c0_252 = arith.constant 0 : index
    %c0_253 = arith.constant 0 : index
    %312 = vector.load %arg5[%c1_250, %c3_251, %c0_252, %c0_253] : memref<4x4x32x8xf32, #tpu.memory_space<vmem>>, vector<1x1x32x8xf32>
    %313 = vector.shape_cast %312 : vector<1x1x32x8xf32> to vector<32x8xf32>
    %cst_254 = arith.constant dense<0.000000e+00> : vector<16x8xf32>
    %314 = tpu.matmul %201, %313, %cst_254 {dimension_numbers = #tpu.dot_dimension_numbers<[1], [0], [0], [1], [0, 0, 1, 1], [], []>} : vector<16x32xf32>, vector<32x8xf32>, vector<16x8xf32> -> vector<16x8xf32>
    %315 = vector.shape_cast %308 : vector<16x8xf32> to vector<2x8x8xf32>
    %316 = vector.shape_cast %311 : vector<16x8xf32> to vector<2x8x8xf32>
    %317 = vector.shape_cast %314 : vector<16x8xf32> to vector<2x8x8xf32>
    "tpu.trace_start"() <{level = 10 : i32, message = "bqd,bkd->bqk"}> : () -> ()
    %cst_255 = arith.constant dense<0.000000e+00> : vector<2x8x8xf32>
    %318 = tpu.matmul %315, %316, %cst_255 {dimension_numbers = #tpu.dot_dimension_numbers<[2], [2], [1], [1], [0, 0, 0, 1, 1, 1], [0], [0]>} : vector<2x8x8xf32>, vector<2x8x8xf32>, vector<2x8x8xf32> -> vector<2x8x8xf32>
    "tpu.trace_stop"() : () -> ()
    %cst_256 = arith.constant dense<0xFF800000> : vector<2x8xf32>
    %319 = vector.multi_reduction <maximumf>, %318, %cst_256 [2] : vector<2x8x8xf32> to vector<2x8xf32>
    %320 = vector.shape_cast %319 : vector<2x8xf32> to vector<2x8x1xf32>
    %321 = vector.broadcast %320 : vector<2x8x1xf32> to vector<2x8x8xf32>
    %322 = arith.subf %318, %321 : vector<2x8x8xf32>
    %323 = math.exp %322 : vector<2x8x8xf32>
    %cst_257 = arith.constant dense<0.000000e+00> : vector<2x8xf32>
    %324 = vector.multi_reduction <add>, %323, %cst_257 [2] : vector<2x8x8xf32> to vector<2x8xf32>
    %325 = vector.shape_cast %324 : vector<2x8xf32> to vector<2x8x1xf32>
    %326 = vector.broadcast %325 : vector<2x8x1xf32> to vector<2x8x8xf32>
    %327 = arith.divf %323, %326 : vector<2x8x8xf32>
    "tpu.trace_start"() <{level = 10 : i32, message = "bqk,bkd->bqd"}> : () -> ()
    %cst_258 = arith.constant dense<0.000000e+00> : vector<2x8x8xf32>
    %328 = tpu.matmul %327, %317, %cst_258 {dimension_numbers = #tpu.dot_dimension_numbers<[2], [1], [1], [2], [0, 0, 0, 1, 1, 2], [0], [0]>} : vector<2x8x8xf32>, vector<2x8x8xf32>, vector<2x8x8xf32> -> vector<2x8x8xf32>
    "tpu.trace_stop"() : () -> ()
    %329 = vector.shape_cast %328 : vector<2x8x8xf32> to vector<16x8xf32>
    %c1_259 = arith.constant 1 : index
    %c3_260 = arith.constant 3 : index
    %c0_261 = arith.constant 0 : index
    %c0_262 = arith.constant 0 : index
    %330 = vector.load %arg6[%c1_259, %c3_260, %c0_261, %c0_262] : memref<4x4x8x32xf32, #tpu.memory_space<vmem>>, vector<1x1x8x32xf32>
    %331 = vector.shape_cast %330 : vector<1x1x8x32xf32> to vector<8x32xf32>
    %cst_263 = arith.constant dense<0.000000e+00> : vector<16x32xf32>
    %332 = tpu.matmul %329, %331, %cst_263 {dimension_numbers = #tpu.dot_dimension_numbers<[1], [0], [0], [1], [0, 0, 1, 1], [], []>} : vector<16x8xf32>, vector<8x32xf32>, vector<16x32xf32> -> vector<16x32xf32>
    %333 = arith.addf %301, %332 : vector<16x32xf32>
    %c1_264 = arith.constant 1 : index
    %c0_265 = arith.constant 0 : index
    %c0_266 = arith.constant 0 : index
    %334 = vector.load %arg8[%c1_264, %c0_265, %c0_266] : memref<4x1x32xf32, #tpu.memory_space<vmem>>, vector<1x1x32xf32>
    %335 = vector.shape_cast %334 : vector<1x1x32xf32> to vector<1x32xf32>
    %c1_267 = arith.constant 1 : index
    %c0_268 = arith.constant 0 : index
    %c0_269 = arith.constant 0 : index
    %336 = vector.load %arg9[%c1_267, %c0_268, %c0_269] : memref<4x1x32xf32, #tpu.memory_space<vmem>>, vector<1x1x32xf32>
    %337 = vector.shape_cast %336 : vector<1x1x32xf32> to vector<1x32xf32>
    %cst_270 = arith.constant dense<0.000000e+00> : vector<16xf32>
    %338 = vector.multi_reduction <add>, %333, %cst_270 [1] : vector<16x32xf32> to vector<16xf32>
    %339 = vector.shape_cast %338 : vector<16xf32> to vector<16x1xf32>
    %cst_271 = arith.constant 3.200000e+01 : f32
    %340 = vector.broadcast %cst_271 : f32 to vector<16x1xf32>
    %341 = arith.divf %339, %340 : vector<16x1xf32>
    %342 = vector.broadcast %341 : vector<16x1xf32> to vector<16x32xf32>
    %343 = arith.subf %333, %342 : vector<16x32xf32>
    %344 = arith.mulf %343, %343 : vector<16x32xf32>
    %cst_272 = arith.constant dense<0.000000e+00> : vector<16xf32>
    %345 = vector.multi_reduction <add>, %344, %cst_272 [1] : vector<16x32xf32> to vector<16xf32>
    %346 = vector.shape_cast %345 : vector<16xf32> to vector<16x1xf32>
    %cst_273 = arith.constant 3.200000e+01 : f32
    %347 = vector.broadcast %cst_273 : f32 to vector<16x1xf32>
    %348 = arith.divf %346, %347 : vector<16x1xf32>
    %349 = vector.broadcast %341 : vector<16x1xf32> to vector<16x32xf32>
    %350 = arith.subf %333, %349 : vector<16x32xf32>
    %cst_274 = arith.constant 9.99999974E-6 : f32
    %351 = vector.broadcast %cst_274 : f32 to vector<16x1xf32>
    %352 = arith.addf %348, %351 : vector<16x1xf32>
    %353 = math.rsqrt %352 : vector<16x1xf32>
    %354 = vector.broadcast %353 : vector<16x1xf32> to vector<16x32xf32>
    %355 = arith.mulf %350, %354 : vector<16x32xf32>
    %356 = vector.broadcast %335 : vector<1x32xf32> to vector<16x32xf32>
    %357 = arith.mulf %355, %356 : vector<16x32xf32>
    %358 = vector.broadcast %337 : vector<1x32xf32> to vector<16x32xf32>
    %359 = arith.addf %357, %358 : vector<16x32xf32>
    %c1_275 = arith.constant 1 : index
    %c0_276 = arith.constant 0 : index
    %c0_277 = arith.constant 0 : index
    %360 = vector.load %arg10[%c1_275, %c0_276, %c0_277] : memref<4x32x64xf32, #tpu.memory_space<vmem>>, vector<1x32x64xf32>
    %361 = vector.shape_cast %360 : vector<1x32x64xf32> to vector<32x64xf32>
    %cst_278 = arith.constant dense<0.000000e+00> : vector<16x64xf32>
    %362 = tpu.matmul %359, %361, %cst_278 {dimension_numbers = #tpu.dot_dimension_numbers<[1], [0], [0], [1], [0, 0, 1, 1], [], []>} : vector<16x32xf32>, vector<32x64xf32>, vector<16x64xf32> -> vector<16x64xf32>
    %c1_279 = arith.constant 1 : index
    %c0_280 = arith.constant 0 : index
    %c0_281 = arith.constant 0 : index
    %363 = vector.load %arg11[%c1_279, %c0_280, %c0_281] : memref<4x1x64xf32, #tpu.memory_space<vmem>>, vector<1x1x64xf32>
    %364 = vector.shape_cast %363 : vector<1x1x64xf32> to vector<1x64xf32>
    %365 = vector.broadcast %364 : vector<1x64xf32> to vector<16x64xf32>
    %366 = arith.addf %362, %365 : vector<16x64xf32>
    %cst_282 = arith.constant 0.000000e+00 : f32
    %367 = vector.broadcast %cst_282 : f32 to vector<16x64xf32>
    %368 = arith.maximumf %366, %367 : vector<16x64xf32>
    %c1_283 = arith.constant 1 : index
    %c0_284 = arith.constant 0 : index
    %c0_285 = arith.constant 0 : index
    %369 = vector.load %arg12[%c1_283, %c0_284, %c0_285] : memref<4x64x32xf32, #tpu.memory_space<vmem>>, vector<1x64x32xf32>
    %370 = vector.shape_cast %369 : vector<1x64x32xf32> to vector<64x32xf32>
    %cst_286 = arith.constant dense<0.000000e+00> : vector<16x32xf32>
    %371 = tpu.matmul %368, %370, %cst_286 {dimension_numbers = #tpu.dot_dimension_numbers<[1], [0], [0], [1], [0, 0, 1, 1], [], []>} : vector<16x64xf32>, vector<64x32xf32>, vector<16x32xf32> -> vector<16x32xf32>
    %c1_287 = arith.constant 1 : index
    %c0_288 = arith.constant 0 : index
    %c0_289 = arith.constant 0 : index
    %372 = vector.load %arg13[%c1_287, %c0_288, %c0_289] : memref<4x1x32xf32, #tpu.memory_space<vmem>>, vector<1x1x32xf32>
    %373 = vector.shape_cast %372 : vector<1x1x32xf32> to vector<1x32xf32>
    %374 = vector.broadcast %373 : vector<1x32xf32> to vector<16x32xf32>
    %375 = arith.addf %371, %374 : vector<16x32xf32>
    %376 = arith.addf %359, %375 : vector<16x32xf32>
    %c1_290 = arith.constant 1 : index
    %c0_291 = arith.constant 0 : index
    %c0_292 = arith.constant 0 : index
    %377 = vector.load %arg14[%c1_290, %c0_291, %c0_292] : memref<4x1x32xf32, #tpu.memory_space<vmem>>, vector<1x1x32xf32>
    %378 = vector.shape_cast %377 : vector<1x1x32xf32> to vector<1x32xf32>
    %c1_293 = arith.constant 1 : index
    %c0_294 = arith.constant 0 : index
    %c0_295 = arith.constant 0 : index
    %379 = vector.load %arg15[%c1_293, %c0_294, %c0_295] : memref<4x1x32xf32, #tpu.memory_space<vmem>>, vector<1x1x32xf32>
    %380 = vector.shape_cast %379 : vector<1x1x32xf32> to vector<1x32xf32>
    %cst_296 = arith.constant dense<0.000000e+00> : vector<16xf32>
    %381 = vector.multi_reduction <add>, %376, %cst_296 [1] : vector<16x32xf32> to vector<16xf32>
    %382 = vector.shape_cast %381 : vector<16xf32> to vector<16x1xf32>
    %cst_297 = arith.constant 3.200000e+01 : f32
    %383 = vector.broadcast %cst_297 : f32 to vector<16x1xf32>
    %384 = arith.divf %382, %383 : vector<16x1xf32>
    %385 = vector.broadcast %384 : vector<16x1xf32> to vector<16x32xf32>
    %386 = arith.subf %376, %385 : vector<16x32xf32>
    %387 = arith.mulf %386, %386 : vector<16x32xf32>
    %cst_298 = arith.constant dense<0.000000e+00> : vector<16xf32>
    %388 = vector.multi_reduction <add>, %387, %cst_298 [1] : vector<16x32xf32> to vector<16xf32>
    %389 = vector.shape_cast %388 : vector<16xf32> to vector<16x1xf32>
    %cst_299 = arith.constant 3.200000e+01 : f32
    %390 = vector.broadcast %cst_299 : f32 to vector<16x1xf32>
    %391 = arith.divf %389, %390 : vector<16x1xf32>
    %392 = vector.broadcast %384 : vector<16x1xf32> to vector<16x32xf32>
    %393 = arith.subf %376, %392 : vector<16x32xf32>
    %cst_300 = arith.constant 9.99999974E-6 : f32
    %394 = vector.broadcast %cst_300 : f32 to vector<16x1xf32>
    %395 = arith.addf %391, %394 : vector<16x1xf32>
    %396 = math.rsqrt %395 : vector<16x1xf32>
    %397 = vector.broadcast %396 : vector<16x1xf32> to vector<16x32xf32>
    %398 = arith.mulf %393, %397 : vector<16x32xf32>
    %399 = vector.broadcast %378 : vector<1x32xf32> to vector<16x32xf32>
    %400 = arith.mulf %398, %399 : vector<16x32xf32>
    %401 = vector.broadcast %380 : vector<1x32xf32> to vector<16x32xf32>
    %402 = arith.addf %400, %401 : vector<16x32xf32>
    %c2_301 = arith.constant 2 : index
    %c0_302 = arith.constant 0 : index
    %c0_303 = arith.constant 0 : index
    %403 = vector.load %arg7[%c2_301, %c0_302, %c0_303] : memref<4x1x32xf32, #tpu.memory_space<vmem>>, vector<1x1x32xf32>
    %404 = vector.shape_cast %403 : vector<1x1x32xf32> to vector<1x32xf32>
    %405 = vector.broadcast %404 : vector<1x32xf32> to vector<16x32xf32>
    %406 = arith.addf %402, %405 : vector<16x32xf32>
    %c2_304 = arith.constant 2 : index
    %c0_305 = arith.constant 0 : index
    %c0_306 = arith.constant 0 : index
    %c0_307 = arith.constant 0 : index
    %407 = vector.load %arg2[%c2_304, %c0_305, %c0_306, %c0_307] : memref<4x4x32x8xf32, #tpu.memory_space<vmem>>, vector<1x1x32x8xf32>
    %408 = vector.shape_cast %407 : vector<1x1x32x8xf32> to vector<32x8xf32>
    %cst_308 = arith.constant dense<0.000000e+00> : vector<16x8xf32>
    %409 = tpu.matmul %402, %408, %cst_308 {dimension_numbers = #tpu.dot_dimension_numbers<[1], [0], [0], [1], [0, 0, 1, 1], [], []>} : vector<16x32xf32>, vector<32x8xf32>, vector<16x8xf32> -> vector<16x8xf32>
    %c2_309 = arith.constant 2 : index
    %c0_310 = arith.constant 0 : index
    %c0_311 = arith.constant 0 : index
    %c0_312 = arith.constant 0 : index
    %410 = vector.load %arg3[%c2_309, %c0_310, %c0_311, %c0_312] : memref<4x4x1x8xf32, #tpu.memory_space<vmem>>, vector<1x1x1x8xf32>
    %411 = vector.shape_cast %410 : vector<1x1x1x8xf32> to vector<1x8xf32>
    %412 = vector.broadcast %411 : vector<1x8xf32> to vector<16x8xf32>
    %413 = arith.addf %409, %412 : vector<16x8xf32>
    %c2_313 = arith.constant 2 : index
    %c0_314 = arith.constant 0 : index
    %c0_315 = arith.constant 0 : index
    %c0_316 = arith.constant 0 : index
    %414 = vector.load %arg4[%c2_313, %c0_314, %c0_315, %c0_316] : memref<4x4x32x8xf32, #tpu.memory_space<vmem>>, vector<1x1x32x8xf32>
    %415 = vector.shape_cast %414 : vector<1x1x32x8xf32> to vector<32x8xf32>
    %cst_317 = arith.constant dense<0.000000e+00> : vector<16x8xf32>
    %416 = tpu.matmul %402, %415, %cst_317 {dimension_numbers = #tpu.dot_dimension_numbers<[1], [0], [0], [1], [0, 0, 1, 1], [], []>} : vector<16x32xf32>, vector<32x8xf32>, vector<16x8xf32> -> vector<16x8xf32>
    %c2_318 = arith.constant 2 : index
    %c0_319 = arith.constant 0 : index
    %c0_320 = arith.constant 0 : index
    %c0_321 = arith.constant 0 : index
    %417 = vector.load %arg5[%c2_318, %c0_319, %c0_320, %c0_321] : memref<4x4x32x8xf32, #tpu.memory_space<vmem>>, vector<1x1x32x8xf32>
    %418 = vector.shape_cast %417 : vector<1x1x32x8xf32> to vector<32x8xf32>
    %cst_322 = arith.constant dense<0.000000e+00> : vector<16x8xf32>
    %419 = tpu.matmul %402, %418, %cst_322 {dimension_numbers = #tpu.dot_dimension_numbers<[1], [0], [0], [1], [0, 0, 1, 1], [], []>} : vector<16x32xf32>, vector<32x8xf32>, vector<16x8xf32> -> vector<16x8xf32>
    %420 = vector.shape_cast %413 : vector<16x8xf32> to vector<2x8x8xf32>
    %421 = vector.shape_cast %416 : vector<16x8xf32> to vector<2x8x8xf32>
    %422 = vector.shape_cast %419 : vector<16x8xf32> to vector<2x8x8xf32>
    "tpu.trace_start"() <{level = 10 : i32, message = "bqd,bkd->bqk"}> : () -> ()
    %cst_323 = arith.constant dense<0.000000e+00> : vector<2x8x8xf32>
    %423 = tpu.matmul %420, %421, %cst_323 {dimension_numbers = #tpu.dot_dimension_numbers<[2], [2], [1], [1], [0, 0, 0, 1, 1, 1], [0], [0]>} : vector<2x8x8xf32>, vector<2x8x8xf32>, vector<2x8x8xf32> -> vector<2x8x8xf32>
    "tpu.trace_stop"() : () -> ()
    %cst_324 = arith.constant dense<0xFF800000> : vector<2x8xf32>
    %424 = vector.multi_reduction <maximumf>, %423, %cst_324 [2] : vector<2x8x8xf32> to vector<2x8xf32>
    %425 = vector.shape_cast %424 : vector<2x8xf32> to vector<2x8x1xf32>
    %426 = vector.broadcast %425 : vector<2x8x1xf32> to vector<2x8x8xf32>
    %427 = arith.subf %423, %426 : vector<2x8x8xf32>
    %428 = math.exp %427 : vector<2x8x8xf32>
    %cst_325 = arith.constant dense<0.000000e+00> : vector<2x8xf32>
    %429 = vector.multi_reduction <add>, %428, %cst_325 [2] : vector<2x8x8xf32> to vector<2x8xf32>
    %430 = vector.shape_cast %429 : vector<2x8xf32> to vector<2x8x1xf32>
    %431 = vector.broadcast %430 : vector<2x8x1xf32> to vector<2x8x8xf32>
    %432 = arith.divf %428, %431 : vector<2x8x8xf32>
    "tpu.trace_start"() <{level = 10 : i32, message = "bqk,bkd->bqd"}> : () -> ()
    %cst_326 = arith.constant dense<0.000000e+00> : vector<2x8x8xf32>
    %433 = tpu.matmul %432, %422, %cst_326 {dimension_numbers = #tpu.dot_dimension_numbers<[2], [1], [1], [2], [0, 0, 0, 1, 1, 2], [0], [0]>} : vector<2x8x8xf32>, vector<2x8x8xf32>, vector<2x8x8xf32> -> vector<2x8x8xf32>
    "tpu.trace_stop"() : () -> ()
    %434 = vector.shape_cast %433 : vector<2x8x8xf32> to vector<16x8xf32>
    %c2_327 = arith.constant 2 : index
    %c0_328 = arith.constant 0 : index
    %c0_329 = arith.constant 0 : index
    %c0_330 = arith.constant 0 : index
    %435 = vector.load %arg6[%c2_327, %c0_328, %c0_329, %c0_330] : memref<4x4x8x32xf32, #tpu.memory_space<vmem>>, vector<1x1x8x32xf32>
    %436 = vector.shape_cast %435 : vector<1x1x8x32xf32> to vector<8x32xf32>
    %cst_331 = arith.constant dense<0.000000e+00> : vector<16x32xf32>
    %437 = tpu.matmul %434, %436, %cst_331 {dimension_numbers = #tpu.dot_dimension_numbers<[1], [0], [0], [1], [0, 0, 1, 1], [], []>} : vector<16x8xf32>, vector<8x32xf32>, vector<16x32xf32> -> vector<16x32xf32>
    %438 = arith.addf %406, %437 : vector<16x32xf32>
    %c2_332 = arith.constant 2 : index
    %c1_333 = arith.constant 1 : index
    %c0_334 = arith.constant 0 : index
    %c0_335 = arith.constant 0 : index
    %439 = vector.load %arg2[%c2_332, %c1_333, %c0_334, %c0_335] : memref<4x4x32x8xf32, #tpu.memory_space<vmem>>, vector<1x1x32x8xf32>
    %440 = vector.shape_cast %439 : vector<1x1x32x8xf32> to vector<32x8xf32>
    %cst_336 = arith.constant dense<0.000000e+00> : vector<16x8xf32>
    %441 = tpu.matmul %402, %440, %cst_336 {dimension_numbers = #tpu.dot_dimension_numbers<[1], [0], [0], [1], [0, 0, 1, 1], [], []>} : vector<16x32xf32>, vector<32x8xf32>, vector<16x8xf32> -> vector<16x8xf32>
    %c2_337 = arith.constant 2 : index
    %c1_338 = arith.constant 1 : index
    %c0_339 = arith.constant 0 : index
    %c0_340 = arith.constant 0 : index
    %442 = vector.load %arg3[%c2_337, %c1_338, %c0_339, %c0_340] : memref<4x4x1x8xf32, #tpu.memory_space<vmem>>, vector<1x1x1x8xf32>
    %443 = vector.shape_cast %442 : vector<1x1x1x8xf32> to vector<1x8xf32>
    %444 = vector.broadcast %443 : vector<1x8xf32> to vector<16x8xf32>
    %445 = arith.addf %441, %444 : vector<16x8xf32>
    %c2_341 = arith.constant 2 : index
    %c1_342 = arith.constant 1 : index
    %c0_343 = arith.constant 0 : index
    %c0_344 = arith.constant 0 : index
    %446 = vector.load %arg4[%c2_341, %c1_342, %c0_343, %c0_344] : memref<4x4x32x8xf32, #tpu.memory_space<vmem>>, vector<1x1x32x8xf32>
    %447 = vector.shape_cast %446 : vector<1x1x32x8xf32> to vector<32x8xf32>
    %cst_345 = arith.constant dense<0.000000e+00> : vector<16x8xf32>
    %448 = tpu.matmul %402, %447, %cst_345 {dimension_numbers = #tpu.dot_dimension_numbers<[1], [0], [0], [1], [0, 0, 1, 1], [], []>} : vector<16x32xf32>, vector<32x8xf32>, vector<16x8xf32> -> vector<16x8xf32>
    %c2_346 = arith.constant 2 : index
    %c1_347 = arith.constant 1 : index
    %c0_348 = arith.constant 0 : index
    %c0_349 = arith.constant 0 : index
    %449 = vector.load %arg5[%c2_346, %c1_347, %c0_348, %c0_349] : memref<4x4x32x8xf32, #tpu.memory_space<vmem>>, vector<1x1x32x8xf32>
    %450 = vector.shape_cast %449 : vector<1x1x32x8xf32> to vector<32x8xf32>
    %cst_350 = arith.constant dense<0.000000e+00> : vector<16x8xf32>
    %451 = tpu.matmul %402, %450, %cst_350 {dimension_numbers = #tpu.dot_dimension_numbers<[1], [0], [0], [1], [0, 0, 1, 1], [], []>} : vector<16x32xf32>, vector<32x8xf32>, vector<16x8xf32> -> vector<16x8xf32>
    %452 = vector.shape_cast %445 : vector<16x8xf32> to vector<2x8x8xf32>
    %453 = vector.shape_cast %448 : vector<16x8xf32> to vector<2x8x8xf32>
    %454 = vector.shape_cast %451 : vector<16x8xf32> to vector<2x8x8xf32>
    "tpu.trace_start"() <{level = 10 : i32, message = "bqd,bkd->bqk"}> : () -> ()
    %cst_351 = arith.constant dense<0.000000e+00> : vector<2x8x8xf32>
    %455 = tpu.matmul %452, %453, %cst_351 {dimension_numbers = #tpu.dot_dimension_numbers<[2], [2], [1], [1], [0, 0, 0, 1, 1, 1], [0], [0]>} : vector<2x8x8xf32>, vector<2x8x8xf32>, vector<2x8x8xf32> -> vector<2x8x8xf32>
    "tpu.trace_stop"() : () -> ()
    %cst_352 = arith.constant dense<0xFF800000> : vector<2x8xf32>
    %456 = vector.multi_reduction <maximumf>, %455, %cst_352 [2] : vector<2x8x8xf32> to vector<2x8xf32>
    %457 = vector.shape_cast %456 : vector<2x8xf32> to vector<2x8x1xf32>
    %458 = vector.broadcast %457 : vector<2x8x1xf32> to vector<2x8x8xf32>
    %459 = arith.subf %455, %458 : vector<2x8x8xf32>
    %460 = math.exp %459 : vector<2x8x8xf32>
    %cst_353 = arith.constant dense<0.000000e+00> : vector<2x8xf32>
    %461 = vector.multi_reduction <add>, %460, %cst_353 [2] : vector<2x8x8xf32> to vector<2x8xf32>
    %462 = vector.shape_cast %461 : vector<2x8xf32> to vector<2x8x1xf32>
    %463 = vector.broadcast %462 : vector<2x8x1xf32> to vector<2x8x8xf32>
    %464 = arith.divf %460, %463 : vector<2x8x8xf32>
    "tpu.trace_start"() <{level = 10 : i32, message = "bqk,bkd->bqd"}> : () -> ()
    %cst_354 = arith.constant dense<0.000000e+00> : vector<2x8x8xf32>
    %465 = tpu.matmul %464, %454, %cst_354 {dimension_numbers = #tpu.dot_dimension_numbers<[2], [1], [1], [2], [0, 0, 0, 1, 1, 2], [0], [0]>} : vector<2x8x8xf32>, vector<2x8x8xf32>, vector<2x8x8xf32> -> vector<2x8x8xf32>
    "tpu.trace_stop"() : () -> ()
    %466 = vector.shape_cast %465 : vector<2x8x8xf32> to vector<16x8xf32>
    %c2_355 = arith.constant 2 : index
    %c1_356 = arith.constant 1 : index
    %c0_357 = arith.constant 0 : index
    %c0_358 = arith.constant 0 : index
    %467 = vector.load %arg6[%c2_355, %c1_356, %c0_357, %c0_358] : memref<4x4x8x32xf32, #tpu.memory_space<vmem>>, vector<1x1x8x32xf32>
    %468 = vector.shape_cast %467 : vector<1x1x8x32xf32> to vector<8x32xf32>
    %cst_359 = arith.constant dense<0.000000e+00> : vector<16x32xf32>
    %469 = tpu.matmul %466, %468, %cst_359 {dimension_numbers = #tpu.dot_dimension_numbers<[1], [0], [0], [1], [0, 0, 1, 1], [], []>} : vector<16x8xf32>, vector<8x32xf32>, vector<16x32xf32> -> vector<16x32xf32>
    %470 = arith.addf %438, %469 : vector<16x32xf32>
    %c2_360 = arith.constant 2 : index
    %c2_361 = arith.constant 2 : index
    %c0_362 = arith.constant 0 : index
    %c0_363 = arith.constant 0 : index
    %471 = vector.load %arg2[%c2_360, %c2_361, %c0_362, %c0_363] : memref<4x4x32x8xf32, #tpu.memory_space<vmem>>, vector<1x1x32x8xf32>
    %472 = vector.shape_cast %471 : vector<1x1x32x8xf32> to vector<32x8xf32>
    %cst_364 = arith.constant dense<0.000000e+00> : vector<16x8xf32>
    %473 = tpu.matmul %402, %472, %cst_364 {dimension_numbers = #tpu.dot_dimension_numbers<[1], [0], [0], [1], [0, 0, 1, 1], [], []>} : vector<16x32xf32>, vector<32x8xf32>, vector<16x8xf32> -> vector<16x8xf32>
    %c2_365 = arith.constant 2 : index
    %c2_366 = arith.constant 2 : index
    %c0_367 = arith.constant 0 : index
    %c0_368 = arith.constant 0 : index
    %474 = vector.load %arg3[%c2_365, %c2_366, %c0_367, %c0_368] : memref<4x4x1x8xf32, #tpu.memory_space<vmem>>, vector<1x1x1x8xf32>
    %475 = vector.shape_cast %474 : vector<1x1x1x8xf32> to vector<1x8xf32>
    %476 = vector.broadcast %475 : vector<1x8xf32> to vector<16x8xf32>
    %477 = arith.addf %473, %476 : vector<16x8xf32>
    %c2_369 = arith.constant 2 : index
    %c2_370 = arith.constant 2 : index
    %c0_371 = arith.constant 0 : index
    %c0_372 = arith.constant 0 : index
    %478 = vector.load %arg4[%c2_369, %c2_370, %c0_371, %c0_372] : memref<4x4x32x8xf32, #tpu.memory_space<vmem>>, vector<1x1x32x8xf32>
    %479 = vector.shape_cast %478 : vector<1x1x32x8xf32> to vector<32x8xf32>
    %cst_373 = arith.constant dense<0.000000e+00> : vector<16x8xf32>
    %480 = tpu.matmul %402, %479, %cst_373 {dimension_numbers = #tpu.dot_dimension_numbers<[1], [0], [0], [1], [0, 0, 1, 1], [], []>} : vector<16x32xf32>, vector<32x8xf32>, vector<16x8xf32> -> vector<16x8xf32>
    %c2_374 = arith.constant 2 : index
    %c2_375 = arith.constant 2 : index
    %c0_376 = arith.constant 0 : index
    %c0_377 = arith.constant 0 : index
    %481 = vector.load %arg5[%c2_374, %c2_375, %c0_376, %c0_377] : memref<4x4x32x8xf32, #tpu.memory_space<vmem>>, vector<1x1x32x8xf32>
    %482 = vector.shape_cast %481 : vector<1x1x32x8xf32> to vector<32x8xf32>
    %cst_378 = arith.constant dense<0.000000e+00> : vector<16x8xf32>
    %483 = tpu.matmul %402, %482, %cst_378 {dimension_numbers = #tpu.dot_dimension_numbers<[1], [0], [0], [1], [0, 0, 1, 1], [], []>} : vector<16x32xf32>, vector<32x8xf32>, vector<16x8xf32> -> vector<16x8xf32>
    %484 = vector.shape_cast %477 : vector<16x8xf32> to vector<2x8x8xf32>
    %485 = vector.shape_cast %480 : vector<16x8xf32> to vector<2x8x8xf32>
    %486 = vector.shape_cast %483 : vector<16x8xf32> to vector<2x8x8xf32>
    "tpu.trace_start"() <{level = 10 : i32, message = "bqd,bkd->bqk"}> : () -> ()
    %cst_379 = arith.constant dense<0.000000e+00> : vector<2x8x8xf32>
    %487 = tpu.matmul %484, %485, %cst_379 {dimension_numbers = #tpu.dot_dimension_numbers<[2], [2], [1], [1], [0, 0, 0, 1, 1, 1], [0], [0]>} : vector<2x8x8xf32>, vector<2x8x8xf32>, vector<2x8x8xf32> -> vector<2x8x8xf32>
    "tpu.trace_stop"() : () -> ()
    %cst_380 = arith.constant dense<0xFF800000> : vector<2x8xf32>
    %488 = vector.multi_reduction <maximumf>, %487, %cst_380 [2] : vector<2x8x8xf32> to vector<2x8xf32>
    %489 = vector.shape_cast %488 : vector<2x8xf32> to vector<2x8x1xf32>
    %490 = vector.broadcast %489 : vector<2x8x1xf32> to vector<2x8x8xf32>
    %491 = arith.subf %487, %490 : vector<2x8x8xf32>
    %492 = math.exp %491 : vector<2x8x8xf32>
    %cst_381 = arith.constant dense<0.000000e+00> : vector<2x8xf32>
    %493 = vector.multi_reduction <add>, %492, %cst_381 [2] : vector<2x8x8xf32> to vector<2x8xf32>
    %494 = vector.shape_cast %493 : vector<2x8xf32> to vector<2x8x1xf32>
    %495 = vector.broadcast %494 : vector<2x8x1xf32> to vector<2x8x8xf32>
    %496 = arith.divf %492, %495 : vector<2x8x8xf32>
    "tpu.trace_start"() <{level = 10 : i32, message = "bqk,bkd->bqd"}> : () -> ()
    %cst_382 = arith.constant dense<0.000000e+00> : vector<2x8x8xf32>
    %497 = tpu.matmul %496, %486, %cst_382 {dimension_numbers = #tpu.dot_dimension_numbers<[2], [1], [1], [2], [0, 0, 0, 1, 1, 2], [0], [0]>} : vector<2x8x8xf32>, vector<2x8x8xf32>, vector<2x8x8xf32> -> vector<2x8x8xf32>
    "tpu.trace_stop"() : () -> ()
    %498 = vector.shape_cast %497 : vector<2x8x8xf32> to vector<16x8xf32>
    %c2_383 = arith.constant 2 : index
    %c2_384 = arith.constant 2 : index
    %c0_385 = arith.constant 0 : index
    %c0_386 = arith.constant 0 : index
    %499 = vector.load %arg6[%c2_383, %c2_384, %c0_385, %c0_386] : memref<4x4x8x32xf32, #tpu.memory_space<vmem>>, vector<1x1x8x32xf32>
    %500 = vector.shape_cast %499 : vector<1x1x8x32xf32> to vector<8x32xf32>
    %cst_387 = arith.constant dense<0.000000e+00> : vector<16x32xf32>
    %501 = tpu.matmul %498, %500, %cst_387 {dimension_numbers = #tpu.dot_dimension_numbers<[1], [0], [0], [1], [0, 0, 1, 1], [], []>} : vector<16x8xf32>, vector<8x32xf32>, vector<16x32xf32> -> vector<16x32xf32>
    %502 = arith.addf %470, %501 : vector<16x32xf32>
    %c2_388 = arith.constant 2 : index
    %c3_389 = arith.constant 3 : index
    %c0_390 = arith.constant 0 : index
    %c0_391 = arith.constant 0 : index
    %503 = vector.load %arg2[%c2_388, %c3_389, %c0_390, %c0_391] : memref<4x4x32x8xf32, #tpu.memory_space<vmem>>, vector<1x1x32x8xf32>
    %504 = vector.shape_cast %503 : vector<1x1x32x8xf32> to vector<32x8xf32>
    %cst_392 = arith.constant dense<0.000000e+00> : vector<16x8xf32>
    %505 = tpu.matmul %402, %504, %cst_392 {dimension_numbers = #tpu.dot_dimension_numbers<[1], [0], [0], [1], [0, 0, 1, 1], [], []>} : vector<16x32xf32>, vector<32x8xf32>, vector<16x8xf32> -> vector<16x8xf32>
    %c2_393 = arith.constant 2 : index
    %c3_394 = arith.constant 3 : index
    %c0_395 = arith.constant 0 : index
    %c0_396 = arith.constant 0 : index
    %506 = vector.load %arg3[%c2_393, %c3_394, %c0_395, %c0_396] : memref<4x4x1x8xf32, #tpu.memory_space<vmem>>, vector<1x1x1x8xf32>
    %507 = vector.shape_cast %506 : vector<1x1x1x8xf32> to vector<1x8xf32>
    %508 = vector.broadcast %507 : vector<1x8xf32> to vector<16x8xf32>
    %509 = arith.addf %505, %508 : vector<16x8xf32>
    %c2_397 = arith.constant 2 : index
    %c3_398 = arith.constant 3 : index
    %c0_399 = arith.constant 0 : index
    %c0_400 = arith.constant 0 : index
    %510 = vector.load %arg4[%c2_397, %c3_398, %c0_399, %c0_400] : memref<4x4x32x8xf32, #tpu.memory_space<vmem>>, vector<1x1x32x8xf32>
    %511 = vector.shape_cast %510 : vector<1x1x32x8xf32> to vector<32x8xf32>
    %cst_401 = arith.constant dense<0.000000e+00> : vector<16x8xf32>
    %512 = tpu.matmul %402, %511, %cst_401 {dimension_numbers = #tpu.dot_dimension_numbers<[1], [0], [0], [1], [0, 0, 1, 1], [], []>} : vector<16x32xf32>, vector<32x8xf32>, vector<16x8xf32> -> vector<16x8xf32>
    %c2_402 = arith.constant 2 : index
    %c3_403 = arith.constant 3 : index
    %c0_404 = arith.constant 0 : index
    %c0_405 = arith.constant 0 : index
    %513 = vector.load %arg5[%c2_402, %c3_403, %c0_404, %c0_405] : memref<4x4x32x8xf32, #tpu.memory_space<vmem>>, vector<1x1x32x8xf32>
    %514 = vector.shape_cast %513 : vector<1x1x32x8xf32> to vector<32x8xf32>
    %cst_406 = arith.constant dense<0.000000e+00> : vector<16x8xf32>
    %515 = tpu.matmul %402, %514, %cst_406 {dimension_numbers = #tpu.dot_dimension_numbers<[1], [0], [0], [1], [0, 0, 1, 1], [], []>} : vector<16x32xf32>, vector<32x8xf32>, vector<16x8xf32> -> vector<16x8xf32>
    %516 = vector.shape_cast %509 : vector<16x8xf32> to vector<2x8x8xf32>
    %517 = vector.shape_cast %512 : vector<16x8xf32> to vector<2x8x8xf32>
    %518 = vector.shape_cast %515 : vector<16x8xf32> to vector<2x8x8xf32>
    "tpu.trace_start"() <{level = 10 : i32, message = "bqd,bkd->bqk"}> : () -> ()
    %cst_407 = arith.constant dense<0.000000e+00> : vector<2x8x8xf32>
    %519 = tpu.matmul %516, %517, %cst_407 {dimension_numbers = #tpu.dot_dimension_numbers<[2], [2], [1], [1], [0, 0, 0, 1, 1, 1], [0], [0]>} : vector<2x8x8xf32>, vector<2x8x8xf32>, vector<2x8x8xf32> -> vector<2x8x8xf32>
    "tpu.trace_stop"() : () -> ()
    %cst_408 = arith.constant dense<0xFF800000> : vector<2x8xf32>
    %520 = vector.multi_reduction <maximumf>, %519, %cst_408 [2] : vector<2x8x8xf32> to vector<2x8xf32>
    %521 = vector.shape_cast %520 : vector<2x8xf32> to vector<2x8x1xf32>
    %522 = vector.broadcast %521 : vector<2x8x1xf32> to vector<2x8x8xf32>
    %523 = arith.subf %519, %522 : vector<2x8x8xf32>
    %524 = math.exp %523 : vector<2x8x8xf32>
    %cst_409 = arith.constant dense<0.000000e+00> : vector<2x8xf32>
    %525 = vector.multi_reduction <add>, %524, %cst_409 [2] : vector<2x8x8xf32> to vector<2x8xf32>
    %526 = vector.shape_cast %525 : vector<2x8xf32> to vector<2x8x1xf32>
    %527 = vector.broadcast %526 : vector<2x8x1xf32> to vector<2x8x8xf32>
    %528 = arith.divf %524, %527 : vector<2x8x8xf32>
    "tpu.trace_start"() <{level = 10 : i32, message = "bqk,bkd->bqd"}> : () -> ()
    %cst_410 = arith.constant dense<0.000000e+00> : vector<2x8x8xf32>
    %529 = tpu.matmul %528, %518, %cst_410 {dimension_numbers = #tpu.dot_dimension_numbers<[2], [1], [1], [2], [0, 0, 0, 1, 1, 2], [0], [0]>} : vector<2x8x8xf32>, vector<2x8x8xf32>, vector<2x8x8xf32> -> vector<2x8x8xf32>
    "tpu.trace_stop"() : () -> ()
    %530 = vector.shape_cast %529 : vector<2x8x8xf32> to vector<16x8xf32>
    %c2_411 = arith.constant 2 : index
    %c3_412 = arith.constant 3 : index
    %c0_413 = arith.constant 0 : index
    %c0_414 = arith.constant 0 : index
    %531 = vector.load %arg6[%c2_411, %c3_412, %c0_413, %c0_414] : memref<4x4x8x32xf32, #tpu.memory_space<vmem>>, vector<1x1x8x32xf32>
    %532 = vector.shape_cast %531 : vector<1x1x8x32xf32> to vector<8x32xf32>
    %cst_415 = arith.constant dense<0.000000e+00> : vector<16x32xf32>
    %533 = tpu.matmul %530, %532, %cst_415 {dimension_numbers = #tpu.dot_dimension_numbers<[1], [0], [0], [1], [0, 0, 1, 1], [], []>} : vector<16x8xf32>, vector<8x32xf32>, vector<16x32xf32> -> vector<16x32xf32>
    %534 = arith.addf %502, %533 : vector<16x32xf32>
    %c2_416 = arith.constant 2 : index
    %c0_417 = arith.constant 0 : index
    %c0_418 = arith.constant 0 : index
    %535 = vector.load %arg8[%c2_416, %c0_417, %c0_418] : memref<4x1x32xf32, #tpu.memory_space<vmem>>, vector<1x1x32xf32>
    %536 = vector.shape_cast %535 : vector<1x1x32xf32> to vector<1x32xf32>
    %c2_419 = arith.constant 2 : index
    %c0_420 = arith.constant 0 : index
    %c0_421 = arith.constant 0 : index
    %537 = vector.load %arg9[%c2_419, %c0_420, %c0_421] : memref<4x1x32xf32, #tpu.memory_space<vmem>>, vector<1x1x32xf32>
    %538 = vector.shape_cast %537 : vector<1x1x32xf32> to vector<1x32xf32>
    %cst_422 = arith.constant dense<0.000000e+00> : vector<16xf32>
    %539 = vector.multi_reduction <add>, %534, %cst_422 [1] : vector<16x32xf32> to vector<16xf32>
    %540 = vector.shape_cast %539 : vector<16xf32> to vector<16x1xf32>
    %cst_423 = arith.constant 3.200000e+01 : f32
    %541 = vector.broadcast %cst_423 : f32 to vector<16x1xf32>
    %542 = arith.divf %540, %541 : vector<16x1xf32>
    %543 = vector.broadcast %542 : vector<16x1xf32> to vector<16x32xf32>
    %544 = arith.subf %534, %543 : vector<16x32xf32>
    %545 = arith.mulf %544, %544 : vector<16x32xf32>
    %cst_424 = arith.constant dense<0.000000e+00> : vector<16xf32>
    %546 = vector.multi_reduction <add>, %545, %cst_424 [1] : vector<16x32xf32> to vector<16xf32>
    %547 = vector.shape_cast %546 : vector<16xf32> to vector<16x1xf32>
    %cst_425 = arith.constant 3.200000e+01 : f32
    %548 = vector.broadcast %cst_425 : f32 to vector<16x1xf32>
    %549 = arith.divf %547, %548 : vector<16x1xf32>
    %550 = vector.broadcast %542 : vector<16x1xf32> to vector<16x32xf32>
    %551 = arith.subf %534, %550 : vector<16x32xf32>
    %cst_426 = arith.constant 9.99999974E-6 : f32
    %552 = vector.broadcast %cst_426 : f32 to vector<16x1xf32>
    %553 = arith.addf %549, %552 : vector<16x1xf32>
    %554 = math.rsqrt %553 : vector<16x1xf32>
    %555 = vector.broadcast %554 : vector<16x1xf32> to vector<16x32xf32>
    %556 = arith.mulf %551, %555 : vector<16x32xf32>
    %557 = vector.broadcast %536 : vector<1x32xf32> to vector<16x32xf32>
    %558 = arith.mulf %556, %557 : vector<16x32xf32>
    %559 = vector.broadcast %538 : vector<1x32xf32> to vector<16x32xf32>
    %560 = arith.addf %558, %559 : vector<16x32xf32>
    %c2_427 = arith.constant 2 : index
    %c0_428 = arith.constant 0 : index
    %c0_429 = arith.constant 0 : index
    %561 = vector.load %arg10[%c2_427, %c0_428, %c0_429] : memref<4x32x64xf32, #tpu.memory_space<vmem>>, vector<1x32x64xf32>
    %562 = vector.shape_cast %561 : vector<1x32x64xf32> to vector<32x64xf32>
    %cst_430 = arith.constant dense<0.000000e+00> : vector<16x64xf32>
    %563 = tpu.matmul %560, %562, %cst_430 {dimension_numbers = #tpu.dot_dimension_numbers<[1], [0], [0], [1], [0, 0, 1, 1], [], []>} : vector<16x32xf32>, vector<32x64xf32>, vector<16x64xf32> -> vector<16x64xf32>
    %c2_431 = arith.constant 2 : index
    %c0_432 = arith.constant 0 : index
    %c0_433 = arith.constant 0 : index
    %564 = vector.load %arg11[%c2_431, %c0_432, %c0_433] : memref<4x1x64xf32, #tpu.memory_space<vmem>>, vector<1x1x64xf32>
    %565 = vector.shape_cast %564 : vector<1x1x64xf32> to vector<1x64xf32>
    %566 = vector.broadcast %565 : vector<1x64xf32> to vector<16x64xf32>
    %567 = arith.addf %563, %566 : vector<16x64xf32>
    %cst_434 = arith.constant 0.000000e+00 : f32
    %568 = vector.broadcast %cst_434 : f32 to vector<16x64xf32>
    %569 = arith.maximumf %567, %568 : vector<16x64xf32>
    %c2_435 = arith.constant 2 : index
    %c0_436 = arith.constant 0 : index
    %c0_437 = arith.constant 0 : index
    %570 = vector.load %arg12[%c2_435, %c0_436, %c0_437] : memref<4x64x32xf32, #tpu.memory_space<vmem>>, vector<1x64x32xf32>
    %571 = vector.shape_cast %570 : vector<1x64x32xf32> to vector<64x32xf32>
    %cst_438 = arith.constant dense<0.000000e+00> : vector<16x32xf32>
    %572 = tpu.matmul %569, %571, %cst_438 {dimension_numbers = #tpu.dot_dimension_numbers<[1], [0], [0], [1], [0, 0, 1, 1], [], []>} : vector<16x64xf32>, vector<64x32xf32>, vector<16x32xf32> -> vector<16x32xf32>
    %c2_439 = arith.constant 2 : index
    %c0_440 = arith.constant 0 : index
    %c0_441 = arith.constant 0 : index
    %573 = vector.load %arg13[%c2_439, %c0_440, %c0_441] : memref<4x1x32xf32, #tpu.memory_space<vmem>>, vector<1x1x32xf32>
    %574 = vector.shape_cast %573 : vector<1x1x32xf32> to vector<1x32xf32>
    %575 = vector.broadcast %574 : vector<1x32xf32> to vector<16x32xf32>
    %576 = arith.addf %572, %575 : vector<16x32xf32>
    %577 = arith.addf %560, %576 : vector<16x32xf32>
    %c2_442 = arith.constant 2 : index
    %c0_443 = arith.constant 0 : index
    %c0_444 = arith.constant 0 : index
    %578 = vector.load %arg14[%c2_442, %c0_443, %c0_444] : memref<4x1x32xf32, #tpu.memory_space<vmem>>, vector<1x1x32xf32>
    %579 = vector.shape_cast %578 : vector<1x1x32xf32> to vector<1x32xf32>
    %c2_445 = arith.constant 2 : index
    %c0_446 = arith.constant 0 : index
    %c0_447 = arith.constant 0 : index
    %580 = vector.load %arg15[%c2_445, %c0_446, %c0_447] : memref<4x1x32xf32, #tpu.memory_space<vmem>>, vector<1x1x32xf32>
    %581 = vector.shape_cast %580 : vector<1x1x32xf32> to vector<1x32xf32>
    %cst_448 = arith.constant dense<0.000000e+00> : vector<16xf32>
    %582 = vector.multi_reduction <add>, %577, %cst_448 [1] : vector<16x32xf32> to vector<16xf32>
    %583 = vector.shape_cast %582 : vector<16xf32> to vector<16x1xf32>
    %cst_449 = arith.constant 3.200000e+01 : f32
    %584 = vector.broadcast %cst_449 : f32 to vector<16x1xf32>
    %585 = arith.divf %583, %584 : vector<16x1xf32>
    %586 = vector.broadcast %585 : vector<16x1xf32> to vector<16x32xf32>
    %587 = arith.subf %577, %586 : vector<16x32xf32>
    %588 = arith.mulf %587, %587 : vector<16x32xf32>
    %cst_450 = arith.constant dense<0.000000e+00> : vector<16xf32>
    %589 = vector.multi_reduction <add>, %588, %cst_450 [1] : vector<16x32xf32> to vector<16xf32>
    %590 = vector.shape_cast %589 : vector<16xf32> to vector<16x1xf32>
    %cst_451 = arith.constant 3.200000e+01 : f32
    %591 = vector.broadcast %cst_451 : f32 to vector<16x1xf32>
    %592 = arith.divf %590, %591 : vector<16x1xf32>
    %593 = vector.broadcast %585 : vector<16x1xf32> to vector<16x32xf32>
    %594 = arith.subf %577, %593 : vector<16x32xf32>
    %cst_452 = arith.constant 9.99999974E-6 : f32
    %595 = vector.broadcast %cst_452 : f32 to vector<16x1xf32>
    %596 = arith.addf %592, %595 : vector<16x1xf32>
    %597 = math.rsqrt %596 : vector<16x1xf32>
    %598 = vector.broadcast %597 : vector<16x1xf32> to vector<16x32xf32>
    %599 = arith.mulf %594, %598 : vector<16x32xf32>
    %600 = vector.broadcast %579 : vector<1x32xf32> to vector<16x32xf32>
    %601 = arith.mulf %599, %600 : vector<16x32xf32>
    %602 = vector.broadcast %581 : vector<1x32xf32> to vector<16x32xf32>
    %603 = arith.addf %601, %602 : vector<16x32xf32>
    %c3_453 = arith.constant 3 : index
    %c0_454 = arith.constant 0 : index
    %c0_455 = arith.constant 0 : index
    %604 = vector.load %arg7[%c3_453, %c0_454, %c0_455] : memref<4x1x32xf32, #tpu.memory_space<vmem>>, vector<1x1x32xf32>
    %605 = vector.shape_cast %604 : vector<1x1x32xf32> to vector<1x32xf32>
    %606 = vector.broadcast %605 : vector<1x32xf32> to vector<16x32xf32>
    %607 = arith.addf %603, %606 : vector<16x32xf32>
    %c3_456 = arith.constant 3 : index
    %c0_457 = arith.constant 0 : index
    %c0_458 = arith.constant 0 : index
    %c0_459 = arith.constant 0 : index
    %608 = vector.load %arg2[%c3_456, %c0_457, %c0_458, %c0_459] : memref<4x4x32x8xf32, #tpu.memory_space<vmem>>, vector<1x1x32x8xf32>
    %609 = vector.shape_cast %608 : vector<1x1x32x8xf32> to vector<32x8xf32>
    %cst_460 = arith.constant dense<0.000000e+00> : vector<16x8xf32>
    %610 = tpu.matmul %603, %609, %cst_460 {dimension_numbers = #tpu.dot_dimension_numbers<[1], [0], [0], [1], [0, 0, 1, 1], [], []>} : vector<16x32xf32>, vector<32x8xf32>, vector<16x8xf32> -> vector<16x8xf32>
    %c3_461 = arith.constant 3 : index
    %c0_462 = arith.constant 0 : index
    %c0_463 = arith.constant 0 : index
    %c0_464 = arith.constant 0 : index
    %611 = vector.load %arg3[%c3_461, %c0_462, %c0_463, %c0_464] : memref<4x4x1x8xf32, #tpu.memory_space<vmem>>, vector<1x1x1x8xf32>
    %612 = vector.shape_cast %611 : vector<1x1x1x8xf32> to vector<1x8xf32>
    %613 = vector.broadcast %612 : vector<1x8xf32> to vector<16x8xf32>
    %614 = arith.addf %610, %613 : vector<16x8xf32>
    %c3_465 = arith.constant 3 : index
    %c0_466 = arith.constant 0 : index
    %c0_467 = arith.constant 0 : index
    %c0_468 = arith.constant 0 : index
    %615 = vector.load %arg4[%c3_465, %c0_466, %c0_467, %c0_468] : memref<4x4x32x8xf32, #tpu.memory_space<vmem>>, vector<1x1x32x8xf32>
    %616 = vector.shape_cast %615 : vector<1x1x32x8xf32> to vector<32x8xf32>
    %cst_469 = arith.constant dense<0.000000e+00> : vector<16x8xf32>
    %617 = tpu.matmul %603, %616, %cst_469 {dimension_numbers = #tpu.dot_dimension_numbers<[1], [0], [0], [1], [0, 0, 1, 1], [], []>} : vector<16x32xf32>, vector<32x8xf32>, vector<16x8xf32> -> vector<16x8xf32>
    %c3_470 = arith.constant 3 : index
    %c0_471 = arith.constant 0 : index
    %c0_472 = arith.constant 0 : index
    %c0_473 = arith.constant 0 : index
    %618 = vector.load %arg5[%c3_470, %c0_471, %c0_472, %c0_473] : memref<4x4x32x8xf32, #tpu.memory_space<vmem>>, vector<1x1x32x8xf32>
    %619 = vector.shape_cast %618 : vector<1x1x32x8xf32> to vector<32x8xf32>
    %cst_474 = arith.constant dense<0.000000e+00> : vector<16x8xf32>
    %620 = tpu.matmul %603, %619, %cst_474 {dimension_numbers = #tpu.dot_dimension_numbers<[1], [0], [0], [1], [0, 0, 1, 1], [], []>} : vector<16x32xf32>, vector<32x8xf32>, vector<16x8xf32> -> vector<16x8xf32>
    %621 = vector.shape_cast %614 : vector<16x8xf32> to vector<2x8x8xf32>
    %622 = vector.shape_cast %617 : vector<16x8xf32> to vector<2x8x8xf32>
    %623 = vector.shape_cast %620 : vector<16x8xf32> to vector<2x8x8xf32>
    "tpu.trace_start"() <{level = 10 : i32, message = "bqd,bkd->bqk"}> : () -> ()
    %cst_475 = arith.constant dense<0.000000e+00> : vector<2x8x8xf32>
    %624 = tpu.matmul %621, %622, %cst_475 {dimension_numbers = #tpu.dot_dimension_numbers<[2], [2], [1], [1], [0, 0, 0, 1, 1, 1], [0], [0]>} : vector<2x8x8xf32>, vector<2x8x8xf32>, vector<2x8x8xf32> -> vector<2x8x8xf32>
    "tpu.trace_stop"() : () -> ()
    %cst_476 = arith.constant dense<0xFF800000> : vector<2x8xf32>
    %625 = vector.multi_reduction <maximumf>, %624, %cst_476 [2] : vector<2x8x8xf32> to vector<2x8xf32>
    %626 = vector.shape_cast %625 : vector<2x8xf32> to vector<2x8x1xf32>
    %627 = vector.broadcast %626 : vector<2x8x1xf32> to vector<2x8x8xf32>
    %628 = arith.subf %624, %627 : vector<2x8x8xf32>
    %629 = math.exp %628 : vector<2x8x8xf32>
    %cst_477 = arith.constant dense<0.000000e+00> : vector<2x8xf32>
    %630 = vector.multi_reduction <add>, %629, %cst_477 [2] : vector<2x8x8xf32> to vector<2x8xf32>
    %631 = vector.shape_cast %630 : vector<2x8xf32> to vector<2x8x1xf32>
    %632 = vector.broadcast %631 : vector<2x8x1xf32> to vector<2x8x8xf32>
    %633 = arith.divf %629, %632 : vector<2x8x8xf32>
    "tpu.trace_start"() <{level = 10 : i32, message = "bqk,bkd->bqd"}> : () -> ()
    %cst_478 = arith.constant dense<0.000000e+00> : vector<2x8x8xf32>
    %634 = tpu.matmul %633, %623, %cst_478 {dimension_numbers = #tpu.dot_dimension_numbers<[2], [1], [1], [2], [0, 0, 0, 1, 1, 2], [0], [0]>} : vector<2x8x8xf32>, vector<2x8x8xf32>, vector<2x8x8xf32> -> vector<2x8x8xf32>
    "tpu.trace_stop"() : () -> ()
    %635 = vector.shape_cast %634 : vector<2x8x8xf32> to vector<16x8xf32>
    %c3_479 = arith.constant 3 : index
    %c0_480 = arith.constant 0 : index
    %c0_481 = arith.constant 0 : index
    %c0_482 = arith.constant 0 : index
    %636 = vector.load %arg6[%c3_479, %c0_480, %c0_481, %c0_482] : memref<4x4x8x32xf32, #tpu.memory_space<vmem>>, vector<1x1x8x32xf32>
    %637 = vector.shape_cast %636 : vector<1x1x8x32xf32> to vector<8x32xf32>
    %cst_483 = arith.constant dense<0.000000e+00> : vector<16x32xf32>
    %638 = tpu.matmul %635, %637, %cst_483 {dimension_numbers = #tpu.dot_dimension_numbers<[1], [0], [0], [1], [0, 0, 1, 1], [], []>} : vector<16x8xf32>, vector<8x32xf32>, vector<16x32xf32> -> vector<16x32xf32>
    %639 = arith.addf %607, %638 : vector<16x32xf32>
    %c3_484 = arith.constant 3 : index
    %c1_485 = arith.constant 1 : index
    %c0_486 = arith.constant 0 : index
    %c0_487 = arith.constant 0 : index
    %640 = vector.load %arg2[%c3_484, %c1_485, %c0_486, %c0_487] : memref<4x4x32x8xf32, #tpu.memory_space<vmem>>, vector<1x1x32x8xf32>
    %641 = vector.shape_cast %640 : vector<1x1x32x8xf32> to vector<32x8xf32>
    %cst_488 = arith.constant dense<0.000000e+00> : vector<16x8xf32>
    %642 = tpu.matmul %603, %641, %cst_488 {dimension_numbers = #tpu.dot_dimension_numbers<[1], [0], [0], [1], [0, 0, 1, 1], [], []>} : vector<16x32xf32>, vector<32x8xf32>, vector<16x8xf32> -> vector<16x8xf32>
    %c3_489 = arith.constant 3 : index
    %c1_490 = arith.constant 1 : index
    %c0_491 = arith.constant 0 : index
    %c0_492 = arith.constant 0 : index
    %643 = vector.load %arg3[%c3_489, %c1_490, %c0_491, %c0_492] : memref<4x4x1x8xf32, #tpu.memory_space<vmem>>, vector<1x1x1x8xf32>
    %644 = vector.shape_cast %643 : vector<1x1x1x8xf32> to vector<1x8xf32>
    %645 = vector.broadcast %644 : vector<1x8xf32> to vector<16x8xf32>
    %646 = arith.addf %642, %645 : vector<16x8xf32>
    %c3_493 = arith.constant 3 : index
    %c1_494 = arith.constant 1 : index
    %c0_495 = arith.constant 0 : index
    %c0_496 = arith.constant 0 : index
    %647 = vector.load %arg4[%c3_493, %c1_494, %c0_495, %c0_496] : memref<4x4x32x8xf32, #tpu.memory_space<vmem>>, vector<1x1x32x8xf32>
    %648 = vector.shape_cast %647 : vector<1x1x32x8xf32> to vector<32x8xf32>
    %cst_497 = arith.constant dense<0.000000e+00> : vector<16x8xf32>
    %649 = tpu.matmul %603, %648, %cst_497 {dimension_numbers = #tpu.dot_dimension_numbers<[1], [0], [0], [1], [0, 0, 1, 1], [], []>} : vector<16x32xf32>, vector<32x8xf32>, vector<16x8xf32> -> vector<16x8xf32>
    %c3_498 = arith.constant 3 : index
    %c1_499 = arith.constant 1 : index
    %c0_500 = arith.constant 0 : index
    %c0_501 = arith.constant 0 : index
    %650 = vector.load %arg5[%c3_498, %c1_499, %c0_500, %c0_501] : memref<4x4x32x8xf32, #tpu.memory_space<vmem>>, vector<1x1x32x8xf32>
    %651 = vector.shape_cast %650 : vector<1x1x32x8xf32> to vector<32x8xf32>
    %cst_502 = arith.constant dense<0.000000e+00> : vector<16x8xf32>
    %652 = tpu.matmul %603, %651, %cst_502 {dimension_numbers = #tpu.dot_dimension_numbers<[1], [0], [0], [1], [0, 0, 1, 1], [], []>} : vector<16x32xf32>, vector<32x8xf32>, vector<16x8xf32> -> vector<16x8xf32>
    %653 = vector.shape_cast %646 : vector<16x8xf32> to vector<2x8x8xf32>
    %654 = vector.shape_cast %649 : vector<16x8xf32> to vector<2x8x8xf32>
    %655 = vector.shape_cast %652 : vector<16x8xf32> to vector<2x8x8xf32>
    "tpu.trace_start"() <{level = 10 : i32, message = "bqd,bkd->bqk"}> : () -> ()
    %cst_503 = arith.constant dense<0.000000e+00> : vector<2x8x8xf32>
    %656 = tpu.matmul %653, %654, %cst_503 {dimension_numbers = #tpu.dot_dimension_numbers<[2], [2], [1], [1], [0, 0, 0, 1, 1, 1], [0], [0]>} : vector<2x8x8xf32>, vector<2x8x8xf32>, vector<2x8x8xf32> -> vector<2x8x8xf32>
    "tpu.trace_stop"() : () -> ()
    %cst_504 = arith.constant dense<0xFF800000> : vector<2x8xf32>
    %657 = vector.multi_reduction <maximumf>, %656, %cst_504 [2] : vector<2x8x8xf32> to vector<2x8xf32>
    %658 = vector.shape_cast %657 : vector<2x8xf32> to vector<2x8x1xf32>
    %659 = vector.broadcast %658 : vector<2x8x1xf32> to vector<2x8x8xf32>
    %660 = arith.subf %656, %659 : vector<2x8x8xf32>
    %661 = math.exp %660 : vector<2x8x8xf32>
    %cst_505 = arith.constant dense<0.000000e+00> : vector<2x8xf32>
    %662 = vector.multi_reduction <add>, %661, %cst_505 [2] : vector<2x8x8xf32> to vector<2x8xf32>
    %663 = vector.shape_cast %662 : vector<2x8xf32> to vector<2x8x1xf32>
    %664 = vector.broadcast %663 : vector<2x8x1xf32> to vector<2x8x8xf32>
    %665 = arith.divf %661, %664 : vector<2x8x8xf32>
    "tpu.trace_start"() <{level = 10 : i32, message = "bqk,bkd->bqd"}> : () -> ()
    %cst_506 = arith.constant dense<0.000000e+00> : vector<2x8x8xf32>
    %666 = tpu.matmul %665, %655, %cst_506 {dimension_numbers = #tpu.dot_dimension_numbers<[2], [1], [1], [2], [0, 0, 0, 1, 1, 2], [0], [0]>} : vector<2x8x8xf32>, vector<2x8x8xf32>, vector<2x8x8xf32> -> vector<2x8x8xf32>
    "tpu.trace_stop"() : () -> ()
    %667 = vector.shape_cast %666 : vector<2x8x8xf32> to vector<16x8xf32>
    %c3_507 = arith.constant 3 : index
    %c1_508 = arith.constant 1 : index
    %c0_509 = arith.constant 0 : index
    %c0_510 = arith.constant 0 : index
    %668 = vector.load %arg6[%c3_507, %c1_508, %c0_509, %c0_510] : memref<4x4x8x32xf32, #tpu.memory_space<vmem>>, vector<1x1x8x32xf32>
    %669 = vector.shape_cast %668 : vector<1x1x8x32xf32> to vector<8x32xf32>
    %cst_511 = arith.constant dense<0.000000e+00> : vector<16x32xf32>
    %670 = tpu.matmul %667, %669, %cst_511 {dimension_numbers = #tpu.dot_dimension_numbers<[1], [0], [0], [1], [0, 0, 1, 1], [], []>} : vector<16x8xf32>, vector<8x32xf32>, vector<16x32xf32> -> vector<16x32xf32>
    %671 = arith.addf %639, %670 : vector<16x32xf32>
    %c3_512 = arith.constant 3 : index
    %c2_513 = arith.constant 2 : index
    %c0_514 = arith.constant 0 : index
    %c0_515 = arith.constant 0 : index
    %672 = vector.load %arg2[%c3_512, %c2_513, %c0_514, %c0_515] : memref<4x4x32x8xf32, #tpu.memory_space<vmem>>, vector<1x1x32x8xf32>
    %673 = vector.shape_cast %672 : vector<1x1x32x8xf32> to vector<32x8xf32>
    %cst_516 = arith.constant dense<0.000000e+00> : vector<16x8xf32>
    %674 = tpu.matmul %603, %673, %cst_516 {dimension_numbers = #tpu.dot_dimension_numbers<[1], [0], [0], [1], [0, 0, 1, 1], [], []>} : vector<16x32xf32>, vector<32x8xf32>, vector<16x8xf32> -> vector<16x8xf32>
    %c3_517 = arith.constant 3 : index
    %c2_518 = arith.constant 2 : index
    %c0_519 = arith.constant 0 : index
    %c0_520 = arith.constant 0 : index
    %675 = vector.load %arg3[%c3_517, %c2_518, %c0_519, %c0_520] : memref<4x4x1x8xf32, #tpu.memory_space<vmem>>, vector<1x1x1x8xf32>
    %676 = vector.shape_cast %675 : vector<1x1x1x8xf32> to vector<1x8xf32>
    %677 = vector.broadcast %676 : vector<1x8xf32> to vector<16x8xf32>
    %678 = arith.addf %674, %677 : vector<16x8xf32>
    %c3_521 = arith.constant 3 : index
    %c2_522 = arith.constant 2 : index
    %c0_523 = arith.constant 0 : index
    %c0_524 = arith.constant 0 : index
    %679 = vector.load %arg4[%c3_521, %c2_522, %c0_523, %c0_524] : memref<4x4x32x8xf32, #tpu.memory_space<vmem>>, vector<1x1x32x8xf32>
    %680 = vector.shape_cast %679 : vector<1x1x32x8xf32> to vector<32x8xf32>
    %cst_525 = arith.constant dense<0.000000e+00> : vector<16x8xf32>
    %681 = tpu.matmul %603, %680, %cst_525 {dimension_numbers = #tpu.dot_dimension_numbers<[1], [0], [0], [1], [0, 0, 1, 1], [], []>} : vector<16x32xf32>, vector<32x8xf32>, vector<16x8xf32> -> vector<16x8xf32>
    %c3_526 = arith.constant 3 : index
    %c2_527 = arith.constant 2 : index
    %c0_528 = arith.constant 0 : index
    %c0_529 = arith.constant 0 : index
    %682 = vector.load %arg5[%c3_526, %c2_527, %c0_528, %c0_529] : memref<4x4x32x8xf32, #tpu.memory_space<vmem>>, vector<1x1x32x8xf32>
    %683 = vector.shape_cast %682 : vector<1x1x32x8xf32> to vector<32x8xf32>
    %cst_530 = arith.constant dense<0.000000e+00> : vector<16x8xf32>
    %684 = tpu.matmul %603, %683, %cst_530 {dimension_numbers = #tpu.dot_dimension_numbers<[1], [0], [0], [1], [0, 0, 1, 1], [], []>} : vector<16x32xf32>, vector<32x8xf32>, vector<16x8xf32> -> vector<16x8xf32>
    %685 = vector.shape_cast %678 : vector<16x8xf32> to vector<2x8x8xf32>
    %686 = vector.shape_cast %681 : vector<16x8xf32> to vector<2x8x8xf32>
    %687 = vector.shape_cast %684 : vector<16x8xf32> to vector<2x8x8xf32>
    "tpu.trace_start"() <{level = 10 : i32, message = "bqd,bkd->bqk"}> : () -> ()
    %cst_531 = arith.constant dense<0.000000e+00> : vector<2x8x8xf32>
    %688 = tpu.matmul %685, %686, %cst_531 {dimension_numbers = #tpu.dot_dimension_numbers<[2], [2], [1], [1], [0, 0, 0, 1, 1, 1], [0], [0]>} : vector<2x8x8xf32>, vector<2x8x8xf32>, vector<2x8x8xf32> -> vector<2x8x8xf32>
    "tpu.trace_stop"() : () -> ()
    %cst_532 = arith.constant dense<0xFF800000> : vector<2x8xf32>
    %689 = vector.multi_reduction <maximumf>, %688, %cst_532 [2] : vector<2x8x8xf32> to vector<2x8xf32>
    %690 = vector.shape_cast %689 : vector<2x8xf32> to vector<2x8x1xf32>
    %691 = vector.broadcast %690 : vector<2x8x1xf32> to vector<2x8x8xf32>
    %692 = arith.subf %688, %691 : vector<2x8x8xf32>
    %693 = math.exp %692 : vector<2x8x8xf32>
    %cst_533 = arith.constant dense<0.000000e+00> : vector<2x8xf32>
    %694 = vector.multi_reduction <add>, %693, %cst_533 [2] : vector<2x8x8xf32> to vector<2x8xf32>
    %695 = vector.shape_cast %694 : vector<2x8xf32> to vector<2x8x1xf32>
    %696 = vector.broadcast %695 : vector<2x8x1xf32> to vector<2x8x8xf32>
    %697 = arith.divf %693, %696 : vector<2x8x8xf32>
    "tpu.trace_start"() <{level = 10 : i32, message = "bqk,bkd->bqd"}> : () -> ()
    %cst_534 = arith.constant dense<0.000000e+00> : vector<2x8x8xf32>
    %698 = tpu.matmul %697, %687, %cst_534 {dimension_numbers = #tpu.dot_dimension_numbers<[2], [1], [1], [2], [0, 0, 0, 1, 1, 2], [0], [0]>} : vector<2x8x8xf32>, vector<2x8x8xf32>, vector<2x8x8xf32> -> vector<2x8x8xf32>
    "tpu.trace_stop"() : () -> ()
    %699 = vector.shape_cast %698 : vector<2x8x8xf32> to vector<16x8xf32>
    %c3_535 = arith.constant 3 : index
    %c2_536 = arith.constant 2 : index
    %c0_537 = arith.constant 0 : index
    %c0_538 = arith.constant 0 : index
    %700 = vector.load %arg6[%c3_535, %c2_536, %c0_537, %c0_538] : memref<4x4x8x32xf32, #tpu.memory_space<vmem>>, vector<1x1x8x32xf32>
    %701 = vector.shape_cast %700 : vector<1x1x8x32xf32> to vector<8x32xf32>
    %cst_539 = arith.constant dense<0.000000e+00> : vector<16x32xf32>
    %702 = tpu.matmul %699, %701, %cst_539 {dimension_numbers = #tpu.dot_dimension_numbers<[1], [0], [0], [1], [0, 0, 1, 1], [], []>} : vector<16x8xf32>, vector<8x32xf32>, vector<16x32xf32> -> vector<16x32xf32>
    %703 = arith.addf %671, %702 : vector<16x32xf32>
    %c3_540 = arith.constant 3 : index
    %c3_541 = arith.constant 3 : index
    %c0_542 = arith.constant 0 : index
    %c0_543 = arith.constant 0 : index
    %704 = vector.load %arg2[%c3_540, %c3_541, %c0_542, %c0_543] : memref<4x4x32x8xf32, #tpu.memory_space<vmem>>, vector<1x1x32x8xf32>
    %705 = vector.shape_cast %704 : vector<1x1x32x8xf32> to vector<32x8xf32>
    %cst_544 = arith.constant dense<0.000000e+00> : vector<16x8xf32>
    %706 = tpu.matmul %603, %705, %cst_544 {dimension_numbers = #tpu.dot_dimension_numbers<[1], [0], [0], [1], [0, 0, 1, 1], [], []>} : vector<16x32xf32>, vector<32x8xf32>, vector<16x8xf32> -> vector<16x8xf32>
    %c3_545 = arith.constant 3 : index
    %c3_546 = arith.constant 3 : index
    %c0_547 = arith.constant 0 : index
    %c0_548 = arith.constant 0 : index
    %707 = vector.load %arg3[%c3_545, %c3_546, %c0_547, %c0_548] : memref<4x4x1x8xf32, #tpu.memory_space<vmem>>, vector<1x1x1x8xf32>
    %708 = vector.shape_cast %707 : vector<1x1x1x8xf32> to vector<1x8xf32>
    %709 = vector.broadcast %708 : vector<1x8xf32> to vector<16x8xf32>
    %710 = arith.addf %706, %709 : vector<16x8xf32>
    %c3_549 = arith.constant 3 : index
    %c3_550 = arith.constant 3 : index
    %c0_551 = arith.constant 0 : index
    %c0_552 = arith.constant 0 : index
    %711 = vector.load %arg4[%c3_549, %c3_550, %c0_551, %c0_552] : memref<4x4x32x8xf32, #tpu.memory_space<vmem>>, vector<1x1x32x8xf32>
    %712 = vector.shape_cast %711 : vector<1x1x32x8xf32> to vector<32x8xf32>
    %cst_553 = arith.constant dense<0.000000e+00> : vector<16x8xf32>
    %713 = tpu.matmul %603, %712, %cst_553 {dimension_numbers = #tpu.dot_dimension_numbers<[1], [0], [0], [1], [0, 0, 1, 1], [], []>} : vector<16x32xf32>, vector<32x8xf32>, vector<16x8xf32> -> vector<16x8xf32>
    %c3_554 = arith.constant 3 : index
    %c3_555 = arith.constant 3 : index
    %c0_556 = arith.constant 0 : index
    %c0_557 = arith.constant 0 : index
    %714 = vector.load %arg5[%c3_554, %c3_555, %c0_556, %c0_557] : memref<4x4x32x8xf32, #tpu.memory_space<vmem>>, vector<1x1x32x8xf32>
    %715 = vector.shape_cast %714 : vector<1x1x32x8xf32> to vector<32x8xf32>
    %cst_558 = arith.constant dense<0.000000e+00> : vector<16x8xf32>
    %716 = tpu.matmul %603, %715, %cst_558 {dimension_numbers = #tpu.dot_dimension_numbers<[1], [0], [0], [1], [0, 0, 1, 1], [], []>} : vector<16x32xf32>, vector<32x8xf32>, vector<16x8xf32> -> vector<16x8xf32>
    %717 = vector.shape_cast %710 : vector<16x8xf32> to vector<2x8x8xf32>
    %718 = vector.shape_cast %713 : vector<16x8xf32> to vector<2x8x8xf32>
    %719 = vector.shape_cast %716 : vector<16x8xf32> to vector<2x8x8xf32>
    "tpu.trace_start"() <{level = 10 : i32, message = "bqd,bkd->bqk"}> : () -> ()
    %cst_559 = arith.constant dense<0.000000e+00> : vector<2x8x8xf32>
    %720 = tpu.matmul %717, %718, %cst_559 {dimension_numbers = #tpu.dot_dimension_numbers<[2], [2], [1], [1], [0, 0, 0, 1, 1, 1], [0], [0]>} : vector<2x8x8xf32>, vector<2x8x8xf32>, vector<2x8x8xf32> -> vector<2x8x8xf32>
    "tpu.trace_stop"() : () -> ()
    %cst_560 = arith.constant dense<0xFF800000> : vector<2x8xf32>
    %721 = vector.multi_reduction <maximumf>, %720, %cst_560 [2] : vector<2x8x8xf32> to vector<2x8xf32>
    %722 = vector.shape_cast %721 : vector<2x8xf32> to vector<2x8x1xf32>
    %723 = vector.broadcast %722 : vector<2x8x1xf32> to vector<2x8x8xf32>
    %724 = arith.subf %720, %723 : vector<2x8x8xf32>
    %725 = math.exp %724 : vector<2x8x8xf32>
    %cst_561 = arith.constant dense<0.000000e+00> : vector<2x8xf32>
    %726 = vector.multi_reduction <add>, %725, %cst_561 [2] : vector<2x8x8xf32> to vector<2x8xf32>
    %727 = vector.shape_cast %726 : vector<2x8xf32> to vector<2x8x1xf32>
    %728 = vector.broadcast %727 : vector<2x8x1xf32> to vector<2x8x8xf32>
    %729 = arith.divf %725, %728 : vector<2x8x8xf32>
    "tpu.trace_start"() <{level = 10 : i32, message = "bqk,bkd->bqd"}> : () -> ()
    %cst_562 = arith.constant dense<0.000000e+00> : vector<2x8x8xf32>
    %730 = tpu.matmul %729, %719, %cst_562 {dimension_numbers = #tpu.dot_dimension_numbers<[2], [1], [1], [2], [0, 0, 0, 1, 1, 2], [0], [0]>} : vector<2x8x8xf32>, vector<2x8x8xf32>, vector<2x8x8xf32> -> vector<2x8x8xf32>
    "tpu.trace_stop"() : () -> ()
    %731 = vector.shape_cast %730 : vector<2x8x8xf32> to vector<16x8xf32>
    %c3_563 = arith.constant 3 : index
    %c3_564 = arith.constant 3 : index
    %c0_565 = arith.constant 0 : index
    %c0_566 = arith.constant 0 : index
    %732 = vector.load %arg6[%c3_563, %c3_564, %c0_565, %c0_566] : memref<4x4x8x32xf32, #tpu.memory_space<vmem>>, vector<1x1x8x32xf32>
    %733 = vector.shape_cast %732 : vector<1x1x8x32xf32> to vector<8x32xf32>
    %cst_567 = arith.constant dense<0.000000e+00> : vector<16x32xf32>
    %734 = tpu.matmul %731, %733, %cst_567 {dimension_numbers = #tpu.dot_dimension_numbers<[1], [0], [0], [1], [0, 0, 1, 1], [], []>} : vector<16x8xf32>, vector<8x32xf32>, vector<16x32xf32> -> vector<16x32xf32>
    %735 = arith.addf %703, %734 : vector<16x32xf32>
    %c3_568 = arith.constant 3 : index
    %c0_569 = arith.constant 0 : index
    %c0_570 = arith.constant 0 : index
    %736 = vector.load %arg8[%c3_568, %c0_569, %c0_570] : memref<4x1x32xf32, #tpu.memory_space<vmem>>, vector<1x1x32xf32>
    %737 = vector.shape_cast %736 : vector<1x1x32xf32> to vector<1x32xf32>
    %c3_571 = arith.constant 3 : index
    %c0_572 = arith.constant 0 : index
    %c0_573 = arith.constant 0 : index
    %738 = vector.load %arg9[%c3_571, %c0_572, %c0_573] : memref<4x1x32xf32, #tpu.memory_space<vmem>>, vector<1x1x32xf32>
    %739 = vector.shape_cast %738 : vector<1x1x32xf32> to vector<1x32xf32>
    %cst_574 = arith.constant dense<0.000000e+00> : vector<16xf32>
    %740 = vector.multi_reduction <add>, %735, %cst_574 [1] : vector<16x32xf32> to vector<16xf32>
    %741 = vector.shape_cast %740 : vector<16xf32> to vector<16x1xf32>
    %cst_575 = arith.constant 3.200000e+01 : f32
    %742 = vector.broadcast %cst_575 : f32 to vector<16x1xf32>
    %743 = arith.divf %741, %742 : vector<16x1xf32>
    %744 = vector.broadcast %743 : vector<16x1xf32> to vector<16x32xf32>
    %745 = arith.subf %735, %744 : vector<16x32xf32>
    %746 = arith.mulf %745, %745 : vector<16x32xf32>
    %cst_576 = arith.constant dense<0.000000e+00> : vector<16xf32>
    %747 = vector.multi_reduction <add>, %746, %cst_576 [1] : vector<16x32xf32> to vector<16xf32>
    %748 = vector.shape_cast %747 : vector<16xf32> to vector<16x1xf32>
    %cst_577 = arith.constant 3.200000e+01 : f32
    %749 = vector.broadcast %cst_577 : f32 to vector<16x1xf32>
    %750 = arith.divf %748, %749 : vector<16x1xf32>
    %751 = vector.broadcast %743 : vector<16x1xf32> to vector<16x32xf32>
    %752 = arith.subf %735, %751 : vector<16x32xf32>
    %cst_578 = arith.constant 9.99999974E-6 : f32
    %753 = vector.broadcast %cst_578 : f32 to vector<16x1xf32>
    %754 = arith.addf %750, %753 : vector<16x1xf32>
    %755 = math.rsqrt %754 : vector<16x1xf32>
    %756 = vector.broadcast %755 : vector<16x1xf32> to vector<16x32xf32>
    %757 = arith.mulf %752, %756 : vector<16x32xf32>
    %758 = vector.broadcast %737 : vector<1x32xf32> to vector<16x32xf32>
    %759 = arith.mulf %757, %758 : vector<16x32xf32>
    %760 = vector.broadcast %739 : vector<1x32xf32> to vector<16x32xf32>
    %761 = arith.addf %759, %760 : vector<16x32xf32>
    %c3_579 = arith.constant 3 : index
    %c0_580 = arith.constant 0 : index
    %c0_581 = arith.constant 0 : index
    %762 = vector.load %arg10[%c3_579, %c0_580, %c0_581] : memref<4x32x64xf32, #tpu.memory_space<vmem>>, vector<1x32x64xf32>
    %763 = vector.shape_cast %762 : vector<1x32x64xf32> to vector<32x64xf32>
    %cst_582 = arith.constant dense<0.000000e+00> : vector<16x64xf32>
    %764 = tpu.matmul %761, %763, %cst_582 {dimension_numbers = #tpu.dot_dimension_numbers<[1], [0], [0], [1], [0, 0, 1, 1], [], []>} : vector<16x32xf32>, vector<32x64xf32>, vector<16x64xf32> -> vector<16x64xf32>
    %c3_583 = arith.constant 3 : index
    %c0_584 = arith.constant 0 : index
    %c0_585 = arith.constant 0 : index
    %765 = vector.load %arg11[%c3_583, %c0_584, %c0_585] : memref<4x1x64xf32, #tpu.memory_space<vmem>>, vector<1x1x64xf32>
    %766 = vector.shape_cast %765 : vector<1x1x64xf32> to vector<1x64xf32>
    %767 = vector.broadcast %766 : vector<1x64xf32> to vector<16x64xf32>
    %768 = arith.addf %764, %767 : vector<16x64xf32>
    %cst_586 = arith.constant 0.000000e+00 : f32
    %769 = vector.broadcast %cst_586 : f32 to vector<16x64xf32>
    %770 = arith.maximumf %768, %769 : vector<16x64xf32>
    %c3_587 = arith.constant 3 : index
    %c0_588 = arith.constant 0 : index
    %c0_589 = arith.constant 0 : index
    %771 = vector.load %arg12[%c3_587, %c0_588, %c0_589] : memref<4x64x32xf32, #tpu.memory_space<vmem>>, vector<1x64x32xf32>
    %772 = vector.shape_cast %771 : vector<1x64x32xf32> to vector<64x32xf32>
    %cst_590 = arith.constant dense<0.000000e+00> : vector<16x32xf32>
    %773 = tpu.matmul %770, %772, %cst_590 {dimension_numbers = #tpu.dot_dimension_numbers<[1], [0], [0], [1], [0, 0, 1, 1], [], []>} : vector<16x64xf32>, vector<64x32xf32>, vector<16x32xf32> -> vector<16x32xf32>
    %c3_591 = arith.constant 3 : index
    %c0_592 = arith.constant 0 : index
    %c0_593 = arith.constant 0 : index
    %774 = vector.load %arg13[%c3_591, %c0_592, %c0_593] : memref<4x1x32xf32, #tpu.memory_space<vmem>>, vector<1x1x32xf32>
    %775 = vector.shape_cast %774 : vector<1x1x32xf32> to vector<1x32xf32>
    %776 = vector.broadcast %775 : vector<1x32xf32> to vector<16x32xf32>
    %777 = arith.addf %773, %776 : vector<16x32xf32>
    %778 = arith.addf %761, %777 : vector<16x32xf32>
    %c3_594 = arith.constant 3 : index
    %c0_595 = arith.constant 0 : index
    %c0_596 = arith.constant 0 : index
    %779 = vector.load %arg14[%c3_594, %c0_595, %c0_596] : memref<4x1x32xf32, #tpu.memory_space<vmem>>, vector<1x1x32xf32>
    %780 = vector.shape_cast %779 : vector<1x1x32xf32> to vector<1x32xf32>
    %c3_597 = arith.constant 3 : index
    %c0_598 = arith.constant 0 : index
    %c0_599 = arith.constant 0 : index
    %781 = vector.load %arg15[%c3_597, %c0_598, %c0_599] : memref<4x1x32xf32, #tpu.memory_space<vmem>>, vector<1x1x32xf32>
    %782 = vector.shape_cast %781 : vector<1x1x32xf32> to vector<1x32xf32>
    %cst_600 = arith.constant dense<0.000000e+00> : vector<16xf32>
    %783 = vector.multi_reduction <add>, %778, %cst_600 [1] : vector<16x32xf32> to vector<16xf32>
    %784 = vector.shape_cast %783 : vector<16xf32> to vector<16x1xf32>
    %cst_601 = arith.constant 3.200000e+01 : f32
    %785 = vector.broadcast %cst_601 : f32 to vector<16x1xf32>
    %786 = arith.divf %784, %785 : vector<16x1xf32>
    %787 = vector.broadcast %786 : vector<16x1xf32> to vector<16x32xf32>
    %788 = arith.subf %778, %787 : vector<16x32xf32>
    %789 = arith.mulf %788, %788 : vector<16x32xf32>
    %cst_602 = arith.constant dense<0.000000e+00> : vector<16xf32>
    %790 = vector.multi_reduction <add>, %789, %cst_602 [1] : vector<16x32xf32> to vector<16xf32>
    %791 = vector.shape_cast %790 : vector<16xf32> to vector<16x1xf32>
    %cst_603 = arith.constant 3.200000e+01 : f32
    %792 = vector.broadcast %cst_603 : f32 to vector<16x1xf32>
    %793 = arith.divf %791, %792 : vector<16x1xf32>
    %794 = vector.broadcast %786 : vector<16x1xf32> to vector<16x32xf32>
    %795 = arith.subf %778, %794 : vector<16x32xf32>
    %cst_604 = arith.constant 9.99999974E-6 : f32
    %796 = vector.broadcast %cst_604 : f32 to vector<16x1xf32>
    %797 = arith.addf %793, %796 : vector<16x1xf32>
    %798 = math.rsqrt %797 : vector<16x1xf32>
    %799 = vector.broadcast %798 : vector<16x1xf32> to vector<16x32xf32>
    %800 = arith.mulf %795, %799 : vector<16x32xf32>
    %801 = vector.broadcast %780 : vector<1x32xf32> to vector<16x32xf32>
    %802 = arith.mulf %800, %801 : vector<16x32xf32>
    %803 = vector.broadcast %782 : vector<1x32xf32> to vector<16x32xf32>
    %804 = arith.addf %802, %803 : vector<16x32xf32>
    %c0_605 = arith.constant 0 : index
    %c0_606 = arith.constant 0 : index
    %805 = vector.load %arg16[%c0_605, %c0_606] : memref<16x32xf32, #tpu.memory_space<vmem>>, vector<16x32xf32>
    tpu.vector_store %arg16[%c0_605, %c0_606], %804 {strides = array<i32>} : memref<16x32xf32, #tpu.memory_space<vmem>>, vector<16x32xf32>,
    return
  }
  func.func @transform_0(%arg0: i32) -> (i32, i32) {
    %c0_i32 = arith.constant 0 : i32
    %c0_i32_0 = arith.constant 0 : i32
    return %arg0, %c0_i32 : i32, i32
  }
  func.func @transform_1(%arg0: i32) -> (i32, i32, i32, i32) {
    %c0_i32 = arith.constant 0 : i32
    %c0_i32_0 = arith.constant 0 : i32
    %c0_i32_1 = arith.constant 0 : i32
    %c0_i32_2 = arith.constant 0 : i32
    %c0_i32_3 = arith.constant 0 : i32
    return %c0_i32, %c0_i32_0, %c0_i32_1, %c0_i32_2 : i32, i32, i32, i32
  }
  func.func @transform_2(%arg0: i32) -> (i32, i32, i32, i32) {
    %c0_i32 = arith.constant 0 : i32
    %c0_i32_0 = arith.constant 0 : i32
    %c0_i32_1 = arith.constant 0 : i32
    %c0_i32_2 = arith.constant 0 : i32
    %c0_i32_3 = arith.constant 0 : i32
    return %c0_i32, %c0_i32_0, %c0_i32_1, %c0_i32_2 : i32, i32, i32, i32
  }
  func.func @transform_3(%arg0: i32) -> (i32, i32, i32, i32) {
    %c0_i32 = arith.constant 0 : i32
    %c0_i32_0 = arith.constant 0 : i32
    %c0_i32_1 = arith.constant 0 : i32
    %c0_i32_2 = arith.constant 0 : i32
    %c0_i32_3 = arith.constant 0 : i32
    return %c0_i32, %c0_i32_0, %c0_i32_1, %c0_i32_2 : i32, i32, i32, i32
  }
  func.func @transform_4(%arg0: i32) -> (i32, i32, i32, i32) {
    %c0_i32 = arith.constant 0 : i32
    %c0_i32_0 = arith.constant 0 : i32
    %c0_i32_1 = arith.constant 0 : i32
    %c0_i32_2 = arith.constant 0 : i32
    %c0_i32_3 = arith.constant 0 : i32
    return %c0_i32, %c0_i32_0, %c0_i32_1, %c0_i32_2 : i32, i32, i32, i32
  }
  func.func @transform_5(%arg0: i32) -> (i32, i32, i32, i32) {
    %c0_i32 = arith.constant 0 : i32
    %c0_i32_0 = arith.constant 0 : i32
    %c0_i32_1 = arith.constant 0 : i32
    %c0_i32_2 = arith.constant 0 : i32
    %c0_i32_3 = arith.constant 0 : i32
    return %c0_i32, %c0_i32_0, %c0_i32_1, %c0_i32_2 : i32, i32, i32, i32
  }
  func.func @transform_6(%arg0: i32) -> (i32, i32, i32) {
    %c0_i32 = arith.constant 0 : i32
    %c0_i32_0 = arith.constant 0 : i32
    %c0_i32_1 = arith.constant 0 : i32
    %c0_i32_2 = arith.constant 0 : i32
    return %c0_i32, %c0_i32_0, %c0_i32_1 : i32, i32, i32
  }
  func.func @transform_7(%arg0: i32) -> (i32, i32, i32) {
    %c0_i32 = arith.constant 0 : i32
    %c0_i32_0 = arith.constant 0 : i32
    %c0_i32_1 = arith.constant 0 : i32
    %c0_i32_2 = arith.constant 0 : i32
    return %c0_i32, %c0_i32_0, %c0_i32_1 : i32, i32, i32
  }
  func.func @transform_8(%arg0: i32) -> (i32, i32, i32) {
    %c0_i32 = arith.constant 0 : i32
    %c0_i32_0 = arith.constant 0 : i32
    %c0_i32_1 = arith.constant 0 : i32
    %c0_i32_2 = arith.constant 0 : i32
    return %c0_i32, %c0_i32_0, %c0_i32_1 : i32, i32, i32
  }
  func.func @transform_9(%arg0: i32) -> (i32, i32, i32) {
    %c0_i32 = arith.constant 0 : i32
    %c0_i32_0 = arith.constant 0 : i32
    %c0_i32_1 = arith.constant 0 : i32
    %c0_i32_2 = arith.constant 0 : i32
    return %c0_i32, %c0_i32_0, %c0_i32_1 : i32, i32, i32
  }
  func.func @transform_10(%arg0: i32) -> (i32, i32, i32) {
    %c0_i32 = arith.constant 0 : i32
    %c0_i32_0 = arith.constant 0 : i32
    %c0_i32_1 = arith.constant 0 : i32
    %c0_i32_2 = arith.constant 0 : i32
    return %c0_i32, %c0_i32_0, %c0_i32_1 : i32, i32, i32
  }
  func.func @transform_11(%arg0: i32) -> (i32, i32, i32) {
    %c0_i32 = arith.constant 0 : i32
    %c0_i32_0 = arith.constant 0 : i32
    %c0_i32_1 = arith.constant 0 : i32
    %c0_i32_2 = arith.constant 0 : i32
    return %c0_i32, %c0_i32_0, %c0_i32_1 : i32, i32, i32
  }
  func.func @transform_12(%arg0: i32) -> (i32, i32, i32) {
    %c0_i32 = arith.constant 0 : i32
    %c0_i32_0 = arith.constant 0 : i32
    %c0_i32_1 = arith.constant 0 : i32
    %c0_i32_2 = arith.constant 0 : i32
    return %c0_i32, %c0_i32_0, %c0_i32_1 : i32, i32, i32
  }
  func.func @transform_13(%arg0: i32) -> (i32, i32, i32) {
    %c0_i32 = arith.constant 0 : i32
    %c0_i32_0 = arith.constant 0 : i32
    %c0_i32_1 = arith.constant 0 : i32
    %c0_i32_2 = arith.constant 0 : i32
    return %c0_i32, %c0_i32_0, %c0_i32_1 : i32, i32, i32
  }
  func.func @transform_14(%arg0: i32) -> (i32, i32, i32) {
    %c0_i32 = arith.constant 0 : i32
    %c0_i32_0 = arith.constant 0 : i32
    %c0_i32_1 = arith.constant 0 : i32
    %c0_i32_2 = arith.constant 0 : i32
    return %c0_i32, %c0_i32_0, %c0_i32_1 : i32, i32, i32
  }
  func.func @transform_15(%arg0: i32) -> (i32, i32) {
    %c0_i32 = arith.constant 0 : i32
    %c0_i32_0 = arith.constant 0 : i32
    return %arg0, %c0_i32 : i32, i32
  }
}

</mosaic_0001>

<bundles_post_ra>
// kernel: decnet_forward.2
= control target key start
LH: loop header
LB: loop body
LE: loop exit
PB: predicated region body
PF: predicated region fallthrough
CT: control target
= control target key end

     0   :  { %8 = vsyncpa [#allocation3], 0  ;;  %s316_s0 = inlined_call_operand.hbm [shape: f32[2,32], index: 0, kind: input, shape index: {}]   ;;  %s317_s1 = inlined_call_operand.hbm [shape: f32[32,256], index: 1, kind: input, shape index: {}]   ;;  %s318_s2 = inlined_call_operand.hbm [shape: f32[1,256], index: 2, kind: input, shape index: {}]   ;;  %s319_s3 = inlined_call_operand.vmem [shape: f32[2,256], index: 3, kind: output, shape index: {}]  }
   0x1   :  { %9 = vsyncpa [#allocation5], 0  ;;  %s251_s12 = smov [#allocation4]   ;;  %s181_s16 = scalar_lea.hbm %s317_s1, 1024 }
   0x2   :  { %s25_s13 = sshll.u32 %s251_s12, 4  ;;  %p182_p0 = scmp.ne.s32.totalorder %s317_s1, %s181_s16  ;;  %s26_s13 = int_to_ptr.vmem [resolvable:$true] %s25_s13 }
   0x3   :  { %p185_p1 = scmp.lt.u32.totalorder %s181_s16, %s317_s1 }
   0x5   :  { %p187_p2 = pnand %p185_p1, %p182_p0 }
   0x7   :  { %190 = shalt.err (!%p187_p2)
}
   0x8   :  { %s191_s21 = scalar_lea.vmem %s26_s13, 1024  ;;  %p196_p4 = scmp.lt.s32.totalorder %s26_s13, %s26_s13 }
   0x9   :  { %p192_p3 = scmp.ne.s32.totalorder %s26_s13, %s191_s21  ;;  %p197_p5 = scmp.lt.s32.totalorder %s191_s21, %s191_s21 }
   0xb   :  { %p198_p6 = por %p197_p5, %p196_p4 }
   0xd   :  { %p199_p7 = pnand %p198_p6, %p192_p3 }
   0xf   :  { %202 = shalt.err (!%p199_p7)
}
  0x10   :  { %s252_s22 = smov 256   ;;  %s253_s23 = smov 16  }
  0x11   :  { %31 = dma.hbm_to_vmem [thread:$0]  %s317_s1, 1024, %s26_s13, [#allocation5], %s252_s22, %s252_s22, %s253_s23  }
  0x12   :  { %s254_s26 = smov [#allocation2]   ;;  %s255_s28 = smov [#allocation6]  }
  0x13   :  { %s16_s27 = sshll.u32 %s254_s26, 4  ;;  %s38_s29 = sshll.u32 %s255_s28, 4  ;;  %s17_s27 = int_to_ptr.vmem [resolvable:$true] %s16_s27  ;;  %s39_s29 = int_to_ptr.vmem [resolvable:$true] %s38_s29 }
  0x14   :  { %s203_s5 = scalar_lea.hbm %s316_s0, 32 }
  0x15   :  { %p204_p8 = scmp.ne.s32.totalorder %s316_s0, %s203_s5  ;;  %p207_p9 = scmp.lt.u32.totalorder %s203_s5, %s316_s0 }
  0x17   :  { %p209_p10 = pnand %p207_p9, %p204_p8 }
  0x19   :  { %212 = shalt.err (!%p209_p10)
}
  0x1a   :  { %s213_s1 = scalar_lea.vmem %s17_s27, 32  ;;  %p218_p12 = scmp.lt.s32.totalorder %s17_s27, %s17_s27 }
  0x1b   :  { %p214_p11 = scmp.ne.s32.totalorder %s17_s27, %s213_s1  ;;  %p219_p13 = scmp.lt.s32.totalorder %s213_s1, %s213_s1 }
  0x1d   :  { %p220_p0 = por %p219_p13, %p218_p12 }
  0x1f   :  { %p221_p1 = pnand %p220_p0, %p214_p11 }
  0x21   :  { %224 = shalt.err (!%p221_p1)
}
  0x22   :  { %19 = dma.hbm_to_vmem [thread:$0]  %s316_s0, 32, %s17_s27, [#allocation3]  }
  0x23   :  { %s225_s14 = scalar_lea.hbm %s318_s2, 32 }
  0x24   :  { %p226_p2 = scmp.ne.s32.totalorder %s318_s2, %s225_s14  ;;  %p229_p3 = scmp.lt.u32.totalorder %s225_s14, %s318_s2 }
  0x26   :  { %p231_p4 = pnand %p229_p3, %p226_p2 }
  0x28   :  { %234 = shalt.err (!%p231_p4)
}
  0x29   :  { %s235_s19 = scalar_lea.vmem %s39_s29, 32  ;;  %p240_p6 = scmp.lt.s32.totalorder %s39_s29, %s39_s29 }
  0x2a   :  { %p236_p5 = scmp.ne.s32.totalorder %s39_s29, %s235_s19  ;;  %p241_p7 = scmp.lt.s32.totalorder %s235_s19, %s235_s19 }
  0x2c   :  { %p242_p8 = por %p241_p7, %p240_p6 }
  0x2e   :  { %p243_p9 = pnand %p242_p8, %p236_p5 }
  0x30   :  { %246 = shalt.err (!%p243_p9)
}
  0x31   :  { %41 = dma.hbm_to_vmem [thread:$0]  %s318_s2, 32, %s39_s29, [#allocation5]  }
  0x32   :  { %247 = dma.done.wait [#allocation3], 32  }
  0x33   :  { %248 = vsyncadd [#allocation3], 4294967264 }
  0x34   :  { %249 = dma.done.wait [#allocation5], 1056  }
  0x35   :  { %250 = vsyncadd [#allocation5], 4294966240  ;;  %v256_v0 = vmov 0.0   ;;  %v53_v1 = vld [vmem:[#allocation4 + $0x8] sm:$0xff]  ;;  %v55_v2 = vld [vmem:[#allocation4 + $0x18] sm:$0xff]  ;;  %vm72_vm0 = vcmask 261120   ;;  %v62_v14 = vlaneseq }
  0x36   :  { %140 = vmatprep.mubr.f32.mxu0 %v256_v0  ;;  %v52_v3 = vld [vmem:[#allocation4] sm:$0xff]  ;;  %v167_v4 = vpack.c.bf16 %v55_v2, %v53_v1  ;;  %v54_v5 = vld [vmem:[#allocation4 + $0x10] sm:$0xff]  ;;  %v57_v6 = vld [vmem:[#allocation4 + $0x28] sm:$0xff] }
  0x37   :  { %v59_v7 = vld [vmem:[#allocation4 + $0x38] sm:$0xff]  ;;  %v169_v8 = vpack.c.bf16 %v54_v5, %v52_v3  ;;  %v56_v10 = vld [vmem:[#allocation4 + $0x20] sm:$0xff]  ;;  %v58_v11 = vld [vmem:[#allocation4 + $0x30] sm:$0xff]  ;;  %v63_v15 = vshrl.u32 %v62_v14, 7 }
  0x38   :  { %v171_v9 = vpack.c.bf16 %v59_v7, %v57_v6  ;;  %168 = vmatprep.subr.bf16.mxu0 %v167_v4  ;;  %v173_v12 = vpack.c.bf16 %v58_v11, %v56_v10  ;;  %v51_v13 = vld [vmem:[#allocation2] sm:$0x3]  ;;  %v60_v17 = vld [vmem:[#allocation6] sm:$0x3] }
  0x39   :  { %170 = vmatpush1.bf16.msra.mxu0 %v169_v8  ;;  %v64_v16 = vsub.s32 0, %v63_v15  ;;  %v68_v18 = vsub.s32 1, %v63_v15 }
  0x3a   :  { %172 = vmatprep.subr.bf16.mxu0 %v171_v9 }
  0x3b   :  { %v65_v19 = vrot.slane %v60_v17, %v64_v16  ;;  %v69_v20 = vrot.slane %v60_v17, %v68_v18 }
  0x3d   :  { %174 = vmatpush1.bf16.msra.mxu0 %v173_v12 }
  0x40   :  { %165 = vmatmul.mubr.msk.f32.vlgmr.msra.gmra.mrb[0].mxu0 %vm72_vm0, %v51_v13 }
 0x113   :  { %v142_v21 = vpop.f32.mrb[0].mxu0 }
 0x114   :  { %v143_v22 = vadd.f32 %v142_v21, %v65_v19  ;;  %v144_v23 = vpop.f32.mrb[1].mxu0 }
 0x115   :  { %v145_v24 = vadd.f32 %v144_v23, %v69_v20 }
 0x117   :  { %v149_v25 = vcombine.low %v143_v22, %v145_v24 }
 0x119   :  { %166 = vst.sshfl [vmem:[%s319_s3] sm:$0x33 pattern:$0x76325410] %v149_v25 }
 0x11a   :  { %163 = vsyncpa [#allocation3], 1 }
 0x11b   :  { %164 = vsyncpa [#allocation5], 1 }

// kernel: decnet_forward.3
= control target key start
LH: loop header
LB: loop body
LE: loop exit
PB: predicated region body
PF: predicated region fallthrough
CT: control target
= control target key end

     0   :  { %vm73_vm0 = vcmask 261120   ;;  %s16206_s0 = inlined_call_operand.vmem [shape: f32[16,32], index: 0, kind: input, shape index: {}]   ;;  %s16207_s1 = inlined_call_operand.vmem [shape: f32[4,4,32,8], index: 1, kind: input, shape index: {}]   ;;  %s16208_s2 = inlined_call_operand.vmem [shape: f32[4,4,1,8], index: 2, kind: input, shape index: {}]   ;;  %s16209_s3 = inlined_call_operand.vmem [shape: f32[4,4,32,8], index: 3, kind: input, shape index: {}]   ;;  %s16210_s4 = inlined_call_operand.vmem [shape: f32[4,4,32,8], index: 4, kind: input, shape index: {}]   ;;  %s16211_s5 = inlined_call_operand.vmem [shape: f32[4,4,8,32], index: 5, kind: input, shape index: {}]   ;;  %s16212_s6 = inlined_call_operand.vmem [shape: f32[4,1,32], index: 6, kind: input, shape index: {}]   ;;  %s16213_s7 = inlined_call_operand.vmem [shape: f32[4,1,32], index: 7, kind: input, shape index: {}]   ;;  %s16214_s8 = inlined_call_operand.vmem [shape: f32[4,1,32], index: 8, kind: input, shape index: {}]   ;;  %s16215_s9 = inlined_call_operand.vmem [shape: f32[4,32,64], index: 9, kind: input, shape index: {}]   ;;  %s16216_s10 = inlined_call_operand.vmem [shape: f32[4,1,64], index: 10, kind: input, shape index: {}]   ;;  %s16217_s11 = inlined_call_operand.vmem [shape: f32[4,64,32], index: 11, kind: input, shape index: {}]   ;;  %s16218_s12 = inlined_call_operand.vmem [shape: f32[4,1,32], index: 12, kind: input, shape index: {}]   ;;  %s16219_s13 = inlined_call_operand.vmem [shape: f32[4,1,32], index: 13, kind: input, shape index: {}]   ;;  %s16220_s14 = inlined_call_operand.vmem [shape: f32[4,1,32], index: 14, kind: input, shape index: {}]   ;;  %s16221_s15 = inlined_call_operand.hbm [shape: f32[16,32], index: 15, kind: output, shape index: {}]  }
   0x1   :  { %v62_v0 = vld [vmem:[%s16207_s1] sm:$0xff]  ;;  %v63_v1 = vld [vmem:[%s16207_s1 + $0x8] sm:$0xff]  ;;  %v64_v2 = vld [vmem:[%s16207_s1 + $0x10] sm:$0xff] }
   0x2   :  { %v13852_v3 = vpack.c.bf16 %v63_v1, %v62_v0  ;;  %v65_v4 = vld [vmem:[%s16207_s1 + $0x18] sm:$0xff]  ;;  %v14653_v5 = vld [vmem:[%s16206_s0] sm:$0xff]  ;;  %v156_v8 = vld [vmem:[%s16209_s3 + $0x8] sm:$0xff] }
   0x3   :  { %v13856_v6 = vpack.c.bf16 %v65_v4, %v64_v2  ;;  %12812 = vmatprep.mubr.msk.f32.mxu1 %vm73_vm0, %v14653_v5  ;;  %v155_v7 = vld [vmem:[%s16209_s3] sm:$0xff]  ;;  %12834 = vmatprep.mubr.msk.f32.mxu0 %vm73_vm0, %v14653_v5 }
   0x4   :  { %13853 = vmatprep.subr.bf16.mxu1 %v13852_v3 }
   0x5   :  { %20 = vsyncpa [#allocation3], 0  ;;  %13855 = vmatpush3.bf16.msra.mxu1 %v13852_v3  ;;  %v13860_v9 = vpack.c.bf16 %v156_v8, %v155_v7  ;;  %v157_v10 = vld [vmem:[%s16209_s3 + $0x10] sm:$0xff]  ;;  %v158_v11 = vld [vmem:[%s16209_s3 + $0x18] sm:$0xff]  ;;  %v14553_v14 = vmov 0.0   ;;  %vm14554_vm1 = vmmov 0  }
   0x6   :  { %13857 = vmatprep.subr.bf16.mxu1 %v13856_v6  ;;  %v14674_v12 = vld [vmem:[%s16206_s0 + $0x8] sm:$0xff]  ;;  %v13864_v13 = vpack.c.bf16 %v158_v11, %v157_v10  ;;  %vm313_vm2 = vcmask 64512   ;;  %v11726_v17 = vld [vmem:[%s16208_s2] ss:$0 sm:$0xff]  ;;  %v236_v24 = vld [vmem:[%s16210_s4 + $0x10] sm:$0xff]  ;;  %vm2831_vm3 = vcmask 523264  }
   0x7   :  { %v234_v22 = vld [vmem:[%s16210_s4] sm:$0xff]  ;;  %v235_v23 = vld [vmem:[%s16210_s4 + $0x8] sm:$0xff]  ;;  %v237_v26 = vld [vmem:[%s16210_s4 + $0x18] sm:$0xff] }
   0x8   :  { %v13868_v25 = vpack.c.bf16 %v235_v23, %v234_v22  ;;  %v13872_v27 = vpack.c.bf16 %v237_v26, %v236_v24  ;;  %v634_v52 = vld [vmem:[%s16211_s5] sm:$0xff]  ;;  %v11742_v54 = vld [vmem:[%s16207_s1 + $0x28] sm:$0xff]  ;;  %v11743_v59 = vld [vmem:[%s16207_s1 + $0x30] sm:$0xff] }
   0x9   :  { %13859 = vmatpush3.bf16.msra.mxu1 %v13856_v6  ;;  %v11741_v53 = vld [vmem:[%s16207_s1 + $0x20] sm:$0xff]  ;;  %v11750_v57 = vld [vmem:[%s16209_s3 + $0x28] sm:$0xff]  ;;  %v11744_v60 = vld [vmem:[%s16207_s1 + $0x38] sm:$0xff] }
   0xa   :  { %13861 = vmatprep.subr.bf16.mxu1 %v13860_v9  ;;  %13869 = vmatprep.subr.bf16.mxu0 %v13868_v25  ;;  %v13876_v55 = vpack.c.bf16 %v11742_v54, %v11741_v53  ;;  %v11749_v56 = vld [vmem:[%s16209_s3 + $0x20] sm:$0xff]  ;;  %v13880_v61 = vpack.c.bf16 %v11744_v60, %v11743_v59  ;;  %v11751_v63 = vld [vmem:[%s16209_s3 + $0x30] sm:$0xff]  ;;  %v11752_v0 = vld [vmem:[%s16209_s3 + $0x38] sm:$0xff] }
   0xb   :  { %13871 = vmatpush3.bf16.msra.mxu0 %v13868_v25  ;;  %v13884_v58 = vpack.c.bf16 %v11750_v57, %v11749_v56  ;;  %v13888_v2 = vpack.c.bf16 %v11752_v0, %v11751_v63  ;;  %v11746_v8 = vld [vmem:[%s16208_s2 + $0x1] ss:$0 sm:$0xff]  ;;  %v11773_v53 = vld [vmem:[%s16207_s1 + $0x58] sm:$0xff]  ;;  %v11785_v56 = vld [vmem:[%s16210_s4 + $0x48] sm:$0xff] }
   0xc   :  { %12813 = vmatmul.mubr.msk.f32.vlgmr.msra.gmra.mrb[0].mxu1 %vm73_vm0, %v14674_v12  ;;  %13873 = vmatprep.subr.bf16.mxu0 %v13872_v27  ;;  %v11786_v57 = vld [vmem:[%s16210_s4 + $0x50] sm:$0xff]  ;;  %v11787_v59 = vld [vmem:[%s16210_s4 + $0x58] sm:$0xff] }
   0xd   :  { %13863 = vmatpush3.bf16.msra.mxu1 %v13860_v9  ;;  %12823 = vmatprep.mubr.msk.f32.mxu1 %vm73_vm0, %v14653_v5  ;;  %v13920_v60 = vpack.c.bf16 %v11787_v59, %v11786_v57  ;;  %v11781_v63 = vld [vmem:[%s16209_s3 + $0x58] sm:$0xff]  ;;  %v11804_v57 = vld [vmem:[%s16208_s2 + $0x3] ss:$0 sm:$0xff] }
   0xe   :  { %13865 = vmatprep.subr.bf16.mxu1 %v13864_v13 }
   0xf   :  { %13875 = vmatpush3.bf16.msra.mxu0 %v13872_v27 }
  0x10   :  { %12847 = vmatprep.subr.mxu0 %v14553_v14 }
  0x11   :  { %13867 = vmatpush3.bf16.msra.mxu1 %v13864_v13 }
  0x12   :  { %12837 = vmatprep.subr.mxu1 %v14553_v14  ;;  %12835 = vmatmul.mubr.msk.f32.vlgmr.msra.gmra.mrb[0].mxu0 %vm73_vm0, %v14674_v12 }
  0x13   :  { %12849 = vmatprep.mubr.msk.f32.mxu0 %vm14554_vm1, %v14553_v14 }
  0x14   :  { %12824 = vmatmul.mubr.msk.f32.vlgmr.msra.gmra.mrb[2].mxu1 %vm73_vm0, %v14674_v12 }
  0x15   :  { %12839 = vmatprep.mubr.msk.f32.mxu1 %vm14554_vm1, %v14553_v14 }
  0xdf   :  { %v12814_v15 = vpop.f32.mrb[0].mxu1 }
  0xe0   :  { %v146_v16 = vpop.f32.mrb[1].mxu1  ;;  %v152_v21 = vadd.f32 %v12814_v15, %v11726_v17  ;;  %v11755_v15 = vld [vmem:[%s16210_s4 + $0x20] sm:$0xff] }
  0xe1   :  { %v147_v20 = vadd.f32 %v11726_v17, %v146_v16  ;;  %v11756_v16 = vld [vmem:[%s16210_s4 + $0x28] sm:$0xff]  ;;  %v11757_v17 = vld [vmem:[%s16210_s4 + $0x30] sm:$0xff] }
  0xe5   :  { %v12836_v44 = vpop.f32.mrb[0].mxu0 }
  0xe6   :  { %v304_v45 = vpop.f32.mrb[1].mxu0 }
  0xe7   :  { %v12825_v18 = vpop.f32.mrb[2].mxu1  ;;  %12848 = vmatpush3.msra.mxu0 %v304_v45  ;;  %v11767_v45 = vld [vmem:[%s16211_s5 + $0x8] sm:$0xff] }
  0xe8   :  { %v225_v19 = vpop.f32.mrb[3].mxu1  ;;  %12857 = vmatprep.subr.mxu0 %v634_v52 }
  0xe9   :  { %12838 = vmatpush3.xpose.msk.msra.mxu1 %vm313_vm2, %v225_v19  ;;  %v11758_v19 = vld [vmem:[%s16210_s4 + $0x38] sm:$0xff] }
  0xea   :  { %12842 = vmatprep.subr.mxu1 %v14553_v14 }
  0xec   :  { %12840 = vmatmul.mubr.msk.f32.vlgmr.msra.gmra.mrb[4].mxu1 %vm313_vm2, %v147_v20  ;;  %v13896_v20 = vpack.c.bf16 %v11758_v19, %v11757_v17 }
  0xed   :  { %12843 = vmatpush3.xpose.msk.msra.mxu1 %vm313_vm2, %v12825_v18  ;;  %12844 = vmatprep.mubr.msk.f32.mxu1 %vm14554_vm1, %v14553_v14  ;;  %v13892_v18 = vpack.c.bf16 %v11756_v16, %v11755_v15 }
  0xee   :  { %12852 = vmatprep.subr.mxu1 %v14553_v14 }
  0xf0   :  { %12845 = vmatmul.mubr.msk.f32.vlgmr.msra.gmra.mrb[6].mxu1 %vm313_vm2, %v152_v21 }
  0xf1   :  { %12854 = vmatprep.mubr.msk.f32.mxu1 %vm14554_vm1, %v14553_v14  ;;  %12853 = vmatpush3.msra.mxu1 %v12836_v44 }
  0xf2   :  { %13877 = vmatprep.subr.bf16.mxu1 %v13876_v55 }
 0x1bf   :  { %v386_v28 = vpop.f32.mrb[4].mxu1 }
 0x1c0   :  { %v12841_v29 = vpop.f32.mrb[5].mxu1  ;;  %v466_v30 = vsel %vm313_vm2, %v386_v28, -inf }
 0x1c1   :  { %467 = vmax.xlane.f32.xlu0 %v466_v30 }
 0x1c3   :  { %v462_v31 = vpop.f32.mrb[6].mxu1 }
 0x1c4   :  { %v12846_v32 = vpop.f32.mrb[7].mxu1  ;;  %v469_v33 = vsel %vm313_vm2, %v462_v31, -inf }
 0x1c5   :  { %470 = vmax.xlane.f32.xlu0 %v469_v33 }
 0x24e   :  { %v468_v34 = vpop.xlane.xlu0 %467 }
 0x24f   :  { %v472_v35 = vsub.f32 %v386_v28, %v468_v34 }
 0x251   :  { %v474_v36 = vmul.f32 1.442695, %v472_v35 }
 0x252   :  { %v471_v37 = vpop.xlane.xlu0 %470 }
 0x253   :  { %14369 = vpow2.f32 %v474_v36  ;;  %v473_v38 = vsub.f32 %v462_v31, %v471_v37 }
 0x255   :  { %v476_v39 = vmul.f32 1.442695, %v473_v38 }
 0x257   :  { %14371 = vpow2.f32 %v476_v39 }
 0x25d   :  { %v14370_v40 = vpop.eup %14369 }
 0x25e   :  { %v478_v41 = vsel %vm313_vm2, %v14370_v40, 0.0 }
 0x25f   :  { %479 = vadd.xlane.f32.xlu1 %v478_v41 }
 0x261   :  { %v14372_v42 = vpop.eup %14371 }
 0x262   :  { %v481_v43 = vsel %vm313_vm2, %v14372_v42, 0.0 }
 0x263   :  { %482 = vadd.xlane.f32.xlu1 %v481_v43 }
 0x2ec   :  { %v480_v46 = vpop.xlane.xlu1 %479 }
 0x2ed   :  { %14373 = vrcp.f32 %v480_v46  ;;  %v11770_v46 = vld [vmem:[%s16207_s1 + $0x40] sm:$0xff] }
 0x2f0   :  { %v483_v47 = vpop.xlane.xlu1 %482 }
 0x2f1   :  { %14375 = vrcp.f32 %v483_v47  ;;  %v11771_v47 = vld [vmem:[%s16207_s1 + $0x48] sm:$0xff] }
 0x2f7   :  { %v14374_v48 = vpop.eup %14373 }
 0x2f8   :  { %v485_v49 = vmul.f32 %v14374_v48, %v14370_v40  ;;  %v13900_v48 = vpack.c.bf16 %v11771_v47, %v11770_v46  ;;  %v11802_v46 = vld [vmem:[%s16207_s1 + $0x78] sm:$0xff] }
 0x2fa   :  { %12850 = vmatmul.mubr.msk.f32.vlgmr.msra.gmra.mrb[2].mxu0 %vm313_vm2, %v485_v49  ;;  %v11778_v49 = vld [vmem:[%s16209_s3 + $0x40] sm:$0xff] }
 0x2fb   :  { %v14376_v50 = vpop.eup %14375  ;;  %12858 = vmatpush3.msra.mxu0 %v634_v52  ;;  %v11772_v52 = vld [vmem:[%s16207_s1 + $0x50] sm:$0xff] }
 0x2fc   :  { %v487_v51 = vmul.f32 %v14376_v50, %v14372_v42  ;;  %13885 = vmatprep.subr.bf16.mxu0 %v13884_v58  ;;  %v11779_v50 = vld [vmem:[%s16209_s3 + $0x48] sm:$0xff]  ;;  %v13904_v54 = vpack.c.bf16 %v11773_v53, %v11772_v52 }
 0x2fe   :  { %12855 = vmatmul.mubr.msk.f32.vlgmr.msra.gmra.mrb[8].mxu1 %vm313_vm2, %v487_v51  ;;  %v13908_v51 = vpack.c.bf16 %v11779_v50, %v11778_v49  ;;  %v11810_v49 = vld [vmem:[%s16209_s3 + $0x78] sm:$0xff] }
 0x2ff   :  { %12870 = vmatprep.mubr.msk.f32.mxu1 %vm73_vm0, %v14653_v5  ;;  %13879 = vmatpush3.bf16.msra.mxu1 %v13876_v55  ;;  %v11784_v55 = vld [vmem:[%s16210_s4 + $0x40] sm:$0xff] }
 0x300   :  { %13881 = vmatprep.subr.bf16.mxu1 %v13880_v61 }
 0x303   :  { %13883 = vmatpush3.bf16.msra.mxu1 %v13880_v61 }
 0x304   :  { %13893 = vmatprep.subr.bf16.mxu1 %v13892_v18 }
 0x306   :  { %12871 = vmatmul.mubr.msk.f32.vlgmr.msra.gmra.mrb[10].mxu1 %vm73_vm0, %v14674_v12 }
 0x307   :  { %12892 = vmatprep.mubr.msk.f32.mxu1 %vm73_vm0, %v14653_v5  ;;  %13895 = vmatpush3.bf16.msra.mxu1 %v13892_v18 }
 0x308   :  { %13897 = vmatprep.subr.bf16.mxu1 %v13896_v20 }
 0x30b   :  { %13899 = vmatpush3.bf16.msra.mxu1 %v13896_v20 }
 0x30c   :  { %12905 = vmatprep.subr.mxu1 %v14553_v14 }
 0x30e   :  { %12893 = vmatmul.mubr.msk.f32.vlgmr.msra.gmra.mrb[12].mxu1 %vm73_vm0, %v14674_v12 }
 0x30f   :  { %12907 = vmatprep.mubr.msk.f32.mxu1 %vm14554_vm1, %v14553_v14 }
 0x3cd   :  { %v557_v62 = vpop.f32.mrb[2].mxu0 }
 0x3ce   :  { %v12851_v1 = vpop.f32.mrb[3].mxu0  ;;  %12859 = vmatprep.mubr.msk.f32.mxu0 %vm313_vm2, %v557_v62  ;;  %v11780_v62 = vld [vmem:[%s16209_s3 + $0x50] sm:$0xff] }
 0x3cf   :  { %v13912_v1 = vpack.c.bf16 %v11781_v63, %v11780_v62  ;;  %v11813_v62 = vld [vmem:[%s16210_s4 + $0x60] sm:$0xff]  ;;  %v11814_v63 = vld [vmem:[%s16210_s4 + $0x68] sm:$0xff] }
 0x3d1   :  { %v630_v3 = vpop.f32.mrb[8].mxu1 }
 0x3d2   :  { %v12856_v4 = vpop.f32.mrb[9].mxu1  ;;  %12860 = vmatmul.mubr.msk.f32.vlgmr.msra.gmra.mrb[4].mxu0 %vm313_vm2, %v630_v3 }
 0x3d3   :  { %13887 = vmatpush3.bf16.msra.mxu0 %v13884_v58  ;;  %12881 = vmatprep.mubr.msk.f32.mxu0 %vm73_vm0, %v14653_v5  ;;  %v13916_v58 = vpack.c.bf16 %v11785_v56, %v11784_v55 }
 0x3d4   :  { %13889 = vmatprep.subr.bf16.mxu0 %v13888_v2 }
 0x3d7   :  { %13891 = vmatpush3.bf16.msra.mxu0 %v13888_v2 }
 0x3d8   :  { %12895 = vmatprep.subr.mxu0 %v14553_v14 }
 0x3d9   :  { %v12872_v6 = vpop.f32.mrb[10].mxu1 }
 0x3da   :  { %12882 = vmatmul.mubr.msk.f32.vlgmr.msra.gmra.mrb[6].mxu0 %vm73_vm0, %v14674_v12  ;;  %v797_v7 = vpop.f32.mrb[11].mxu1  ;;  %v803_v13 = vadd.f32 %v12872_v6, %v11746_v8 }
 0x3db   :  { %12897 = vmatprep.mubr.msk.f32.mxu0 %vm14554_vm1, %v14553_v14  ;;  %v798_v10 = vadd.f32 %v11746_v8, %v797_v7 }
 0x3e1   :  { %v12894_v37 = vpop.f32.mrb[12].mxu1 }
 0x3e2   :  { %v957_v38 = vpop.f32.mrb[13].mxu1 }
 0x3e3   :  { %12906 = vmatpush3.msra.mxu1 %v957_v38 }
 0x3e4   :  { %13901 = vmatprep.subr.bf16.mxu1 %v13900_v48 }
 0x4ad   :  { %v12883_v9 = vpop.f32.mrb[6].mxu0 }
 0x4ae   :  { %v877_v11 = vpop.f32.mrb[7].mxu0 }
 0x4af   :  { %12896 = vmatpush3.xpose.msk.msra.mxu0 %vm313_vm2, %v877_v11 }
 0x4b0   :  { %12900 = vmatprep.subr.mxu0 %v14553_v14 }
 0x4b2   :  { %12898 = vmatmul.mubr.msk.f32.vlgmr.msra.gmra.mrb[8].mxu0 %vm313_vm2, %v798_v10 }
 0x4b3   :  { %12901 = vmatpush3.xpose.msk.msra.mxu0 %vm313_vm2, %v12883_v9  ;;  %12902 = vmatprep.mubr.msk.f32.mxu0 %vm14554_vm1, %v14553_v14  ;;  %v11775_v9 = vld [vmem:[%s16208_s2 + $0x2] ss:$0 sm:$0xff] }
 0x4b4   :  { %12910 = vmatprep.subr.mxu0 %v14553_v14 }
 0x4b6   :  { %12903 = vmatmul.mubr.msk.f32.vlgmr.msra.gmra.mrb[10].mxu0 %vm313_vm2, %v803_v13 }
 0x4b7   :  { %12912 = vmatprep.mubr.msk.f32.mxu0 %vm14554_vm1, %v14553_v14  ;;  %12911 = vmatpush3.msra.mxu0 %v12894_v37 }
 0x4b8   :  { %12915 = vmatprep.subr.mxu0 %v11767_v45 }
 0x585   :  { %v1038_v21 = vpop.f32.mrb[8].mxu0 }
 0x586   :  { %v12899_v22 = vpop.f32.mrb[9].mxu0  ;;  %v1118_v23 = vsel %vm313_vm2, %v1038_v21, -inf }
 0x587   :  { %1119 = vmax.xlane.f32.xlu0 %v1118_v23 }
 0x589   :  { %v1114_v24 = vpop.f32.mrb[10].mxu0 }
 0x58a   :  { %v12904_v25 = vpop.f32.mrb[11].mxu0  ;;  %v1121_v26 = vsel %vm313_vm2, %v1114_v24, -inf }
 0x58b   :  { %1122 = vmax.xlane.f32.xlu1 %v1121_v26 }
 0x614   :  { %v1120_v27 = vpop.xlane.xlu0 %1119 }
 0x615   :  { %v1124_v28 = vsub.f32 %v1038_v21, %v1120_v27 }
 0x617   :  { %v1126_v29 = vmul.f32 1.442695, %v1124_v28 }
 0x618   :  { %v1123_v30 = vpop.xlane.xlu1 %1122 }
 0x619   :  { %14377 = vpow2.f32 %v1126_v29  ;;  %v1125_v31 = vsub.f32 %v1114_v24, %v1123_v30 }
 0x61b   :  { %v1128_v32 = vmul.f32 1.442695, %v1125_v31 }
 0x61d   :  { %14379 = vpow2.f32 %v1128_v32  ;;  %v11796_v32 = vld [vmem:[%s16211_s5 + $0x10] sm:$0xff] }
 0x623   :  { %v14378_v33 = vpop.eup %14377 }
 0x624   :  { %v1130_v34 = vsel %vm313_vm2, %v14378_v33, 0.0 }
 0x625   :  { %1131 = vadd.xlane.f32.xlu0 %v1130_v34 }
 0x627   :  { %v14380_v35 = vpop.eup %14379 }
 0x628   :  { %v1133_v36 = vsel %vm313_vm2, %v14380_v35, 0.0 }
 0x629   :  { %1134 = vadd.xlane.f32.xlu1 %v1133_v36 }
 0x6b2   :  { %v1132_v39 = vpop.xlane.xlu0 %1131 }
 0x6b3   :  { %14381 = vrcp.f32 %v1132_v39  ;;  %v11799_v39 = vld [vmem:[%s16207_s1 + $0x60] sm:$0xff] }
 0x6b6   :  { %v1135_v40 = vpop.xlane.xlu1 %1134 }
 0x6b7   :  { %14383 = vrcp.f32 %v1135_v40  ;;  %v11800_v40 = vld [vmem:[%s16207_s1 + $0x68] sm:$0xff] }
 0x6bd   :  { %v14382_v41 = vpop.eup %14381 }
 0x6be   :  { %v1137_v42 = vmul.f32 %v14382_v41, %v14378_v33  ;;  %v11807_v41 = vld [vmem:[%s16209_s3 + $0x60] sm:$0xff] }
 0x6c0   :  { %12908 = vmatmul.mubr.msk.f32.vlgmr.msra.gmra.mrb[14].mxu1 %vm313_vm2, %v1137_v42  ;;  %v13924_v42 = vpack.c.bf16 %v11800_v40, %v11799_v39 }
 0x6c1   :  { %v14384_v43 = vpop.eup %14383  ;;  %12928 = vmatprep.mubr.msk.f32.mxu1 %vm73_vm0, %v14653_v5  ;;  %13903 = vmatpush3.bf16.msra.mxu1 %v13900_v48  ;;  %v11809_v48 = vld [vmem:[%s16209_s3 + $0x70] sm:$0xff] }
 0x6c2   :  { %v1139_v44 = vmul.f32 %v14384_v43, %v14380_v35  ;;  %13905 = vmatprep.subr.bf16.mxu1 %v13904_v54  ;;  %v11808_v43 = vld [vmem:[%s16209_s3 + $0x68] sm:$0xff]  ;;  %v13936_v53 = vpack.c.bf16 %v11810_v49, %v11809_v48 }
 0x6c4   :  { %12913 = vmatmul.mubr.msk.f32.vlgmr.msra.gmra.mrb[12].mxu0 %vm313_vm2, %v1139_v44  ;;  %v13932_v44 = vpack.c.bf16 %v11808_v43, %v11807_v41 }
 0x6c5   :  { %12916 = vmatpush3.msra.mxu0 %v11767_v45  ;;  %13907 = vmatpush3.bf16.msra.mxu1 %v13904_v54  ;;  %v11801_v45 = vld [vmem:[%s16207_s1 + $0x70] sm:$0xff] }
 0x6c6   :  { %13909 = vmatprep.subr.bf16.mxu0 %v13908_v51  ;;  %13917 = vmatprep.subr.bf16.mxu1 %v13916_v58  ;;  %v13928_v47 = vpack.c.bf16 %v11802_v46, %v11801_v45 }
 0x6c8   :  { %12929 = vmatmul.mubr.msk.f32.vlgmr.msra.gmra.mrb[16].mxu1 %vm73_vm0, %v14674_v12 }
 0x6c9   :  { %12950 = vmatprep.mubr.msk.f32.mxu1 %vm73_vm0, %v14653_v5  ;;  %13919 = vmatpush3.bf16.msra.mxu1 %v13916_v58 }
 0x6ca   :  { %13921 = vmatprep.subr.bf16.mxu1 %v13920_v60 }
 0x6cd   :  { %13923 = vmatpush3.bf16.msra.mxu1 %v13920_v60 }
 0x6ce   :  { %12958 = vmatprep.subr.mxu1 %v14553_v14 }
 0x6d0   :  { %12951 = vmatmul.mubr.msk.f32.vlgmr.msra.gmra.mrb[18].mxu1 %vm73_vm0, %v14674_v12 }
 0x6d1   :  { %12960 = vmatprep.mubr.msk.f32.mxu1 %vm14554_vm1, %v14553_v14 }
 0x793   :  { %v1209_v61 = vpop.f32.mrb[14].mxu1 }
 0x794   :  { %v12909_v0 = vpop.f32.mrb[15].mxu1  ;;  %12917 = vmatprep.mubr.msk.f32.mxu0 %vm313_vm2, %v1209_v61 }
 0x795   :  { %v11815_v0 = vld [vmem:[%s16210_s4 + $0x70] sm:$0xff] }
 0x797   :  { %v1282_v2 = vpop.f32.mrb[12].mxu0 }
 0x798   :  { %v12914_v3 = vpop.f32.mrb[13].mxu0  ;;  %12918 = vmatmul.mubr.msk.f32.vlgmr.msra.gmra.mrb[4].mxu0 %vm313_vm2, %v1282_v2  ;;  %v11816_v2 = vld [vmem:[%s16210_s4 + $0x78] sm:$0xff] }
 0x799   :  { %13911 = vmatpush3.bf16.msra.mxu0 %v13908_v51  ;;  %12939 = vmatprep.mubr.msk.f32.mxu0 %vm73_vm0, %v14653_v5  ;;  %v13944_v3 = vpack.c.bf16 %v11816_v2, %v11815_v0  ;;  %v2821_v2 = vld [vmem:[%s16217_s11 + $0x28] sm:$0xff] }
 0x79a   :  { %13913 = vmatprep.subr.bf16.mxu0 %v13912_v1 }
 0x79b   :  { %v12930_v4 = vpop.f32.mrb[16].mxu1 }
 0x79c   :  { %v1450_v6 = vpop.f32.mrb[17].mxu1  ;;  %v1456_v10 = vadd.f32 %v12930_v4, %v11775_v9 }
 0x79d   :  { %13915 = vmatpush3.bf16.msra.mxu0 %v13912_v1  ;;  %v1451_v13 = vadd.f32 %v11775_v9, %v1450_v6  ;;  %v13940_v1 = vpack.c.bf16 %v11814_v63, %v11813_v62  ;;  %v2819_v63 = vld [vmem:[%s16217_s11 + $0x18] sm:$0xff] }
 0x79e   :  { %12953 = vmatprep.subr.mxu0 %v14553_v14 }
 0x7a0   :  { %12940 = vmatmul.mubr.msk.f32.vlgmr.msra.gmra.mrb[14].mxu0 %vm73_vm0, %v14674_v12 }
 0x7a1   :  { %12955 = vmatprep.mubr.msk.f32.mxu0 %vm14554_vm1, %v14553_v14 }
 0x7a3   :  { %v12952_v7 = vpop.f32.mrb[18].mxu1 }
 0x7a4   :  { %v1610_v8 = vpop.f32.mrb[19].mxu1 }
 0x873   :  { %v12941_v11 = vpop.f32.mrb[14].mxu0 }
 0x874   :  { %v1530_v15 = vpop.f32.mrb[15].mxu0  ;;  %12959 = vmatpush3.xpose.msk.msra.mxu1 %vm313_vm2, %v12941_v11 }
 0x875   :  { %12954 = vmatpush3.xpose.msk.msra.mxu0 %vm313_vm2, %v1530_v15  ;;  %12968 = vmatprep.subr.mxu1 %v14553_v14 }
 0x876   :  { %12963 = vmatprep.subr.mxu0 %v14553_v14 }
 0x877   :  { %12961 = vmatmul.mubr.msk.f32.vlgmr.msra.gmra.mrb[20].mxu1 %vm313_vm2, %v1456_v10 }
 0x878   :  { %12956 = vmatmul.mubr.msk.f32.vlgmr.msra.gmra.mrb[16].mxu0 %vm313_vm2, %v1451_v13  ;;  %12969 = vmatpush3.msra.mxu1 %v12952_v7 }
 0x879   :  { %12964 = vmatpush3.msra.mxu0 %v1610_v8  ;;  %12970 = vmatprep.mubr.msk.f32.mxu1 %vm14554_vm1, %v14553_v14 }
 0x87a   :  { %12965 = vmatprep.mubr.msk.f32.mxu0 %vm14554_vm1, %v14553_v14  ;;  %12973 = vmatprep.subr.mxu0 %v11796_v32 }
 0x87b   :  { %13925 = vmatprep.subr.bf16.mxu1 %v13924_v42 }
 0x94a   :  { %v1767_v16 = vpop.f32.mrb[20].mxu1 }
 0x94b   :  { %v1691_v17 = vpop.f32.mrb[16].mxu0  ;;  %v12962_v18 = vpop.f32.mrb[21].mxu1  ;;  %v1774_v19 = vsel %vm313_vm2, %v1767_v16, -inf }
 0x94c   :  { %1775 = vmax.xlane.f32.xlu1 %v1774_v19  ;;  %v12957_v20 = vpop.f32.mrb[17].mxu0  ;;  %v1771_v21 = vsel %vm313_vm2, %v1691_v17, -inf }
 0x94d   :  { %1772 = vmax.xlane.f32.xlu0 %v1771_v21 }
 0x9d9   :  { %v1776_v22 = vpop.xlane.xlu1 %1775 }
 0x9da   :  { %v1778_v23 = vsub.f32 %v1767_v16, %v1776_v22  ;;  %v1773_v24 = vpop.xlane.xlu0 %1772 }
 0x9db   :  { %v1777_v25 = vsub.f32 %v1691_v17, %v1773_v24 }
 0x9dc   :  { %v1781_v26 = vmul.f32 1.442695, %v1778_v23 }
 0x9dd   :  { %v1779_v27 = vmul.f32 1.442695, %v1777_v25 }
 0x9de   :  { %14385 = vpow2.f32 %v1781_v26 }
 0x9df   :  { %14387 = vpow2.f32 %v1779_v27 }
 0x9e8   :  { %v14386_v28 = vpop.eup %14385 }
 0x9e9   :  { %v14388_v29 = vpop.eup %14387  ;;  %v1786_v30 = vsel %vm313_vm2, %v14386_v28, 0.0 }
 0x9ea   :  { %1787 = vadd.xlane.f32.xlu1 %v1786_v30  ;;  %v1783_v31 = vsel %vm313_vm2, %v14388_v29, 0.0 }
 0x9eb   :  { %1784 = vadd.xlane.f32.xlu0 %v1783_v31  ;;  %v11825_v31 = vld [vmem:[%s16211_s5 + $0x18] sm:$0xff] }
 0xa77   :  { %v1788_v33 = vpop.xlane.xlu1 %1787 }
 0xa78   :  { %14389 = vrcp.f32 %v1788_v33  ;;  %v1785_v34 = vpop.xlane.xlu0 %1784 }
 0xa79   :  { %14391 = vrcp.f32 %v1785_v34 }
 0xa82   :  { %v14390_v35 = vpop.eup %14389 }
 0xa83   :  { %v14392_v36 = vpop.eup %14391  ;;  %v1792_v37 = vmul.f32 %v14390_v35, %v14386_v28 }
 0xa84   :  { %v1790_v38 = vmul.f32 %v14392_v36, %v14388_v29  ;;  %v11725_v36 = vld [vmem:[%s16212_s6] ss:$0 sm:$0xff] }
 0xa85   :  { %12971 = vmatmul.mubr.msk.f32.vlgmr.msra.gmra.mrb[22].mxu1 %vm313_vm2, %v1792_v37  ;;  %v61_v37 = vadd.f32 %v11725_v36, %v14674_v12 }
 0xa86   :  { %12966 = vmatmul.mubr.msk.f32.vlgmr.msra.gmra.mrb[18].mxu0 %vm313_vm2, %v1790_v38  ;;  %12986 = vmatprep.mubr.msk.f32.mxu1 %vm73_vm0, %v14653_v5  ;;  %v60_v38 = vadd.f32 %v11725_v36, %v14653_v5 }
 0xa87   :  { %12974 = vmatpush3.msra.mxu0 %v11796_v32  ;;  %13927 = vmatpush3.bf16.msra.mxu1 %v13924_v42 }
 0xa88   :  { %13933 = vmatprep.subr.bf16.mxu0 %v13932_v44  ;;  %13929 = vmatprep.subr.bf16.mxu1 %v13928_v47 }
 0xa8b   :  { %13931 = vmatpush3.bf16.msra.mxu1 %v13928_v47 }
 0xa8c   :  { %13941 = vmatprep.subr.bf16.mxu1 %v13940_v1 }
 0xa8e   :  { %12987 = vmatmul.mubr.msk.f32.vlgmr.msra.gmra.mrb[24].mxu1 %vm73_vm0, %v14674_v12 }
 0xa8f   :  { %13008 = vmatprep.mubr.msk.f32.mxu1 %vm73_vm0, %v14653_v5  ;;  %13943 = vmatpush3.bf16.msra.mxu1 %v13940_v1  ;;  %v2820_v1 = vld [vmem:[%s16217_s11 + $0x20] sm:$0xff] }
 0xa90   :  { %13945 = vmatprep.subr.bf16.mxu1 %v13944_v3 }
 0xa93   :  { %13947 = vmatpush3.bf16.msra.mxu1 %v13944_v3  ;;  %v13964_v3 = vpack.c.bf16 %v2821_v2, %v2820_v1 }
 0xa94   :  { %13021 = vmatprep.subr.mxu1 %v14553_v14 }
 0xa96   :  { %13009 = vmatmul.mubr.msk.f32.vlgmr.msra.gmra.mrb[26].mxu1 %vm73_vm0, %v14674_v12 }
 0xa97   :  { %13023 = vmatprep.mubr.msk.f32.mxu1 %vm14554_vm1, %v14553_v14 }
 0xb58   :  { %v1935_v50 = vpop.f32.mrb[22].mxu1 }
 0xb59   :  { %v1862_v51 = vpop.f32.mrb[18].mxu0  ;;  %v12972_v52 = vpop.f32.mrb[23].mxu1 }
 0xb5a   :  { %v12967_v54 = vpop.f32.mrb[19].mxu0  ;;  %12975 = vmatprep.mubr.msk.f32.mxu0 %vm313_vm2, %v1862_v51 }
 0xb5b   :  { %12976 = vmatmul.mubr.msk.f32.vlgmr.msra.gmra.mrb[4].mxu0 %vm313_vm2, %v1935_v50  ;;  %v2723_v54 = vld [vmem:[%s16215_s9 + $0x8] sm:$0xff] }
 0xb5c   :  { %13935 = vmatpush3.bf16.msra.mxu0 %v13932_v44  ;;  %12997 = vmatprep.mubr.msk.f32.mxu0 %vm73_vm0, %v14653_v5 }
 0xb5d   :  { %13937 = vmatprep.subr.bf16.mxu0 %v13936_v53 }
 0xb60   :  { %13939 = vmatpush3.bf16.msra.mxu0 %v13936_v53  ;;  %v2722_v53 = vld [vmem:[%s16215_s9] sm:$0xff] }
 0xb61   :  { %13011 = vmatprep.subr.mxu0 %v14553_v14  ;;  %v12988_v55 = vpop.f32.mrb[24].mxu1 }
 0xb62   :  { %v2103_v56 = vpop.f32.mrb[25].mxu1  ;;  %v2109_v61 = vadd.f32 %v12988_v55, %v11804_v57  ;;  %v13948_v55 = vpack.c.bf16 %v2723_v54, %v2722_v53  ;;  %v11854_v53 = vld [vmem:[%s16210_s4 + $0x80] sm:$0xff]  ;;  %v11855_v54 = vld [vmem:[%s16210_s4 + $0x88] sm:$0xff] }
 0xb63   :  { %12998 = vmatmul.mubr.msk.f32.vlgmr.msra.gmra.mrb[20].mxu0 %vm73_vm0, %v14674_v12  ;;  %v2104_v59 = vadd.f32 %v11804_v57, %v2103_v56  ;;  %v2724_v56 = vld [vmem:[%s16215_s9 + $0x10] sm:$0xff]  ;;  %v2725_v57 = vld [vmem:[%s16215_s9 + $0x18] sm:$0xff] }
 0xb64   :  { %13013 = vmatprep.mubr.msk.f32.mxu0 %vm14554_vm1, %v14553_v14 }
 0xb69   :  { %v13010_v23 = vpop.f32.mrb[26].mxu1 }
 0xb6a   :  { %v2263_v24 = vpop.f32.mrb[27].mxu1 }
 0xb6b   :  { %13022 = vmatpush3.msra.mxu1 %v2263_v24  ;;  %v2823_v24 = vld [vmem:[%s16217_s11 + $0x38] sm:$0xff] }
 0xb6c   :  { %13949 = vmatprep.subr.bf16.mxu1 %v13948_v55 }
 0xc36   :  { %v12999_v58 = vpop.f32.mrb[20].mxu0 }
 0xc37   :  { %v2183_v60 = vpop.f32.mrb[21].mxu0 }
 0xc38   :  { %13012 = vmatpush3.xpose.msk.msra.mxu0 %vm313_vm2, %v2183_v60  ;;  %v2817_v60 = vld [vmem:[%s16217_s11 + $0x8] sm:$0xff] }
 0xc39   :  { %13016 = vmatprep.subr.mxu0 %v14553_v14 }
 0xc3b   :  { %13014 = vmatmul.mubr.msk.f32.vlgmr.msra.gmra.mrb[22].mxu0 %vm313_vm2, %v2104_v59  ;;  %v2816_v59 = vld [vmem:[%s16217_s11] sm:$0xff] }
 0xc3c   :  { %13017 = vmatpush3.xpose.msk.msra.mxu0 %vm313_vm2, %v12999_v58  ;;  %13018 = vmatprep.mubr.msk.f32.mxu0 %vm14554_vm1, %v14553_v14  ;;  %v13952_v58 = vpack.c.bf16 %v2725_v57, %v2724_v56  ;;  %v13956_v62 = vpack.c.bf16 %v2817_v60, %v2816_v59  ;;  %v11842_v56 = vld [vmem:[%s16207_s1 + $0x90] sm:$0xff]  ;;  %v11843_v57 = vld [vmem:[%s16207_s1 + $0x98] sm:$0xff] }
 0xc3d   :  { %13026 = vmatprep.subr.mxu0 %v14553_v14  ;;  %v11856_v59 = vld [vmem:[%s16210_s4 + $0x90] sm:$0xff]  ;;  %v11857_v60 = vld [vmem:[%s16210_s4 + $0x98] sm:$0xff] }
 0xc3f   :  { %13019 = vmatmul.mubr.msk.f32.vlgmr.msra.gmra.mrb[24].mxu0 %vm313_vm2, %v2109_v61  ;;  %v2818_v61 = vld [vmem:[%s16217_s11 + $0x10] sm:$0xff] }
 0xc40   :  { %13028 = vmatprep.mubr.msk.f32.mxu0 %vm14554_vm1, %v14553_v14  ;;  %13027 = vmatpush3.msra.mxu0 %v13010_v23  ;;  %v13960_v0 = vpack.c.bf16 %v2819_v63, %v2818_v61  ;;  %v2822_v23 = vld [vmem:[%s16217_s11 + $0x30] sm:$0xff]  ;;  %v13992_v61 = vpack.c.bf16 %v11857_v60, %v11856_v59  ;;  %v11849_v63 = vld [vmem:[%s16209_s3 + $0x88] sm:$0xff] }
 0xc41   :  { %13031 = vmatprep.subr.mxu0 %v11825_v31  ;;  %v11884_v59 = vld [vmem:[%s16210_s4 + $0xa8] sm:$0xff] }
 0xd0e   :  { %v2344_v4 = vpop.f32.mrb[22].mxu0 }
 0xd0f   :  { %v13015_v6 = vpop.f32.mrb[23].mxu0  ;;  %v2424_v7 = vsel %vm313_vm2, %v2344_v4, -inf }
 0xd10   :  { %2425 = vmax.xlane.f32.xlu0 %v2424_v7 }
 0xd12   :  { %v2420_v8 = vpop.f32.mrb[24].mxu0 }
 0xd13   :  { %v13020_v9 = vpop.f32.mrb[25].mxu0  ;;  %v2427_v10 = vsel %vm313_vm2, %v2420_v8, -inf }
 0xd14   :  { %2428 = vmax.xlane.f32.xlu1 %v2427_v10 }
 0xd9d   :  { %v2426_v11 = vpop.xlane.xlu0 %2425 }
 0xd9e   :  { %v2430_v13 = vsub.f32 %v2344_v4, %v2426_v11 }
 0xda0   :  { %v2432_v15 = vmul.f32 1.442695, %v2430_v13  ;;  %v11828_v13 = vld [vmem:[%s16213_s7] ss:$0 sm:$0xff] }
 0xda1   :  { %v2429_v16 = vpop.xlane.xlu1 %2428 }
 0xda2   :  { %14393 = vpow2.f32 %v2432_v15  ;;  %v2431_v17 = vsub.f32 %v2420_v8, %v2429_v16 }
 0xda4   :  { %v2434_v18 = vmul.f32 1.442695, %v2431_v17 }
 0xda6   :  { %14395 = vpow2.f32 %v2434_v18  ;;  %v11829_v18 = vld [vmem:[%s16214_s8] ss:$0 sm:$0xff] }
 0xdac   :  { %v14394_v19 = vpop.eup %14393 }
 0xdad   :  { %v2436_v20 = vsel %vm313_vm2, %v14394_v19, 0.0 }
 0xdae   :  { %2437 = vadd.xlane.f32.xlu0 %v2436_v20 }
 0xdb0   :  { %v14396_v21 = vpop.eup %14395 }
 0xdb1   :  { %v2439_v22 = vsel %vm313_vm2, %v14396_v21, 0.0 }
 0xdb2   :  { %2440 = vadd.xlane.f32.xlu1 %v2439_v22 }
 0xe3b   :  { %v2438_v25 = vpop.xlane.xlu0 %2437 }
 0xe3c   :  { %14397 = vrcp.f32 %v2438_v25  ;;  %v13968_v25 = vpack.c.bf16 %v2823_v24, %v2822_v23 }
 0xe3f   :  { %v2441_v26 = vpop.xlane.xlu1 %2440 }
 0xe40   :  { %14399 = vrcp.f32 %v2441_v26  ;;  %v11830_v26 = vld [vmem:[%s16216_s10] ss:$0 sm:$0xff] }
 0xe46   :  { %v14398_v27 = vpop.eup %14397 }
 0xe47   :  { %v2443_v28 = vmul.f32 %v14398_v27, %v14394_v19 }
 0xe49   :  { %13024 = vmatmul.mubr.msk.f32.vlgmr.msra.gmra.mrb[28].mxu1 %vm313_vm2, %v2443_v28 }
 0xe4a   :  { %v14400_v29 = vpop.eup %14399  ;;  %13951 = vmatpush3.bf16.msra.mxu1 %v13948_v55  ;;  %v13988_v55 = vpack.c.bf16 %v11855_v54, %v11854_v53  ;;  %v11871_v53 = vld [vmem:[%s16207_s1 + $0xb0] sm:$0xff]  ;;  %v11872_v54 = vld [vmem:[%s16207_s1 + $0xb8] sm:$0xff] }
 0xe4b   :  { %v2445_v30 = vmul.f32 %v14400_v29, %v14396_v21  ;;  %13953 = vmatprep.subr.bf16.mxu1 %v13952_v58 }
 0xe4d   :  { %13029 = vmatmul.mubr.msk.f32.vlgmr.msra.gmra.mrb[26].mxu0 %vm313_vm2, %v2445_v30 }
 0xe4e   :  { %13032 = vmatpush3.msra.mxu0 %v11825_v31  ;;  %13955 = vmatpush3.bf16.msra.mxu1 %v13952_v58  ;;  %v13976_v58 = vpack.c.bf16 %v11843_v57, %v11842_v56  ;;  %v14000_v57 = vpack.c.bf16 %v11872_v54, %v11871_v53  ;;  %v11914_v54 = vld [vmem:[%s16210_s4 + $0xd0] sm:$0xff] }
 0xe4f   :  { %13957 = vmatprep.subr.bf16.mxu0 %v13956_v62 }
 0xf1c   :  { %v2515_v32 = vpop.f32.mrb[28].mxu1 }
 0xf1d   :  { %v13025_v33 = vpop.f32.mrb[29].mxu1  ;;  %13033 = vmatprep.mubr.msk.f32.mxu0 %vm313_vm2, %v2515_v32 }
 0xf1e   :  { %v11833_v33 = vld [vmem:[%s16218_s12] ss:$0 sm:$0xff] }
 0xf20   :  { %v2588_v34 = vpop.f32.mrb[26].mxu0 }
 0xf21   :  { %v13030_v35 = vpop.f32.mrb[27].mxu0  ;;  %13034 = vmatmul.mubr.msk.f32.vlgmr.msra.gmra.mrb[4].mxu0 %vm313_vm2, %v2588_v34 }
 0xf22   :  { %13959 = vmatpush3.bf16.msra.mxu0 %v13956_v62  ;;  %v11848_v62 = vld [vmem:[%s16209_s3 + $0x80] sm:$0xff] }
 0xf23   :  { %13961 = vmatprep.subr.bf16.mxu0 %v13960_v0 }
 0xf26   :  { %13963 = vmatpush3.bf16.msra.mxu0 %v13960_v0  ;;  %v13980_v0 = vpack.c.bf16 %v11849_v63, %v11848_v62  ;;  %v11886_v62 = vld [vmem:[%s16210_s4 + $0xb8] sm:$0xff] }
 0xf27   :  { %13965 = vmatprep.subr.bf16.mxu0 %v13964_v3 }
 0xf2a   :  { %13967 = vmatpush3.bf16.msra.mxu0 %v13964_v3 }
 0xf2b   :  { %13969 = vmatprep.subr.bf16.mxu0 %v13968_v25 }
 0xf2e   :  { %13971 = vmatpush3.bf16.msra.mxu0 %v13968_v25 }
 0xf2f   :  { %13989 = vmatprep.subr.bf16.mxu0 %v13988_v55 }
 0xff4   :  { %v13035_v39 = vpop.f32.mrb[4].mxu0 }
 0xff5   :  { %v14332_v40 = vadd.f32 %v13035_v39, %v61_v37  ;;  %v2666_v41 = vpop.f32.mrb[5].mxu0 }
 0xff6   :  { %v14333_v42 = vadd.f32 %v2666_v41, %v60_v38 }
 0xff7   :  { %v2682_v43 = vsel %vm73_vm0, %v14332_v40, 0.0 }
 0xff8   :  { %2683 = vadd.xlane.f32.xlu1 %v2682_v43  ;;  %v2679_v44 = vsel %vm73_vm0, %v14333_v42, 0.0 }
 0xff9   :  { %2680 = vadd.xlane.f32.xlu0 %v2679_v44 }
0x1085   :  { %v2684_v45 = vpop.xlane.xlu1 %2683 }
0x1086   :  { %v2687_v46 = vmul.f32 0.03125, %v2684_v45  ;;  %v2681_v47 = vpop.xlane.xlu0 %2680 }
0x1087   :  { %v2686_v48 = vmul.f32 0.03125, %v2681_v47 }
0x1088   :  { %v2689_v49 = vsub.f32 %v14332_v40, %v2687_v46 }
0x1089   :  { %v2688_v50 = vsub.f32 %v14333_v42, %v2686_v48 }
0x108a   :  { %v2691_v51 = vmul.f32 %v2689_v49, %v2689_v49 }
0x108b   :  { %v2690_v12 = vmul.f32 %v2688_v50, %v2688_v50 }
0x108c   :  { %v2695_v5 = vsel %vm73_vm0, %v2691_v51, 0.0 }
0x108d   :  { %2696 = vadd.xlane.f32.xlu1 %v2695_v5  ;;  %v2692_v52 = vsel %vm73_vm0, %v2690_v12, 0.0  ;;  %v11840_v12 = vld [vmem:[%s16207_s1 + $0x80] sm:$0xff]  ;;  %v11841_v5 = vld [vmem:[%s16207_s1 + $0x88] sm:$0xff] }
0x108e   :  { %2693 = vadd.xlane.f32.xlu0 %v2692_v52  ;;  %v13972_v52 = vpack.c.bf16 %v11841_v5, %v11840_v12 }
0x1090   :  { %13973 = vmatprep.subr.bf16.mxu1 %v13972_v52 }
0x111a   :  { %v2697_v4 = vpop.xlane.xlu1 %2696 }
0x111b   :  { %v2699_v6 = vmul.f32 0.03125, %v2697_v4  ;;  %v2694_v7 = vpop.xlane.xlu0 %2693 }
0x111c   :  { %v2698_v8 = vmul.f32 0.03125, %v2694_v7 }
0x111d   :  { %v2701_v9 = vadd.f32 1e-05, %v2699_v6 }
0x111e   :  { %v2700_v10 = vadd.f32 1e-05, %v2698_v8 }
0x111f   :  { %14401 = vrsqrt.f32 %v2701_v9  ;;  %v11836_v9 = vld [vmem:[%s16219_s13] ss:$0 sm:$0xff] }
0x1120   :  { %14403 = vrsqrt.f32 %v2700_v10 }
0x1129   :  { %v14402_v11 = vpop.eup %14401 }
0x112a   :  { %v14404_v15 = vpop.eup %14403  ;;  %v2705_v16 = vmul.f32 %v14402_v11, %v2689_v49 }
0x112b   :  { %v2704_v17 = vmul.f32 %v14404_v15, %v2688_v50  ;;  %v11837_v15 = vld [vmem:[%s16220_s14] ss:$0 sm:$0xff] }
0x112c   :  { %v2713_v19 = vmul.f32 %v11828_v13, %v2705_v16 }
0x112d   :  { %v2712_v20 = vmul.f32 %v11828_v13, %v2704_v17 }
0x112e   :  { %v2721_v22 = vadd.f32 %v11829_v18, %v2713_v19  ;;  %v11851_v19 = vld [vmem:[%s16209_s3 + $0x98] sm:$0xff] }
0x112f   :  { %v2720_v21 = vadd.f32 %v11829_v18, %v2712_v20  ;;  %v11850_v18 = vld [vmem:[%s16209_s3 + $0x90] sm:$0xff] }
0x1131   :  { %13044 = vmatprep.mubr.msk.f32.mxu1 %vm73_vm0, %v2720_v21 }
0x1132   :  { %13045 = vmatmul.mubr.msk.f32.vlgmr.msra.gmra.mrb[30].mxu1 %vm73_vm0, %v2721_v22 }
0x1133   :  { %13975 = vmatpush3.bf16.msra.mxu1 %v13972_v52 }
0x1134   :  { %13977 = vmatprep.subr.bf16.mxu1 %v13976_v58 }
0x1137   :  { %13979 = vmatpush3.bf16.msra.mxu1 %v13976_v58  ;;  %v11883_v58 = vld [vmem:[%s16210_s4 + $0xa0] sm:$0xff] }
0x1138   :  { %13981 = vmatprep.subr.bf16.mxu1 %v13980_v0  ;;  %v14012_v60 = vpack.c.bf16 %v11884_v59, %v11883_v58  ;;  %v11906_v58 = vld [vmem:[%s16209_s3 + $0xc0] sm:$0xff]  ;;  %v11907_v59 = vld [vmem:[%s16209_s3 + $0xc8] sm:$0xff] }
0x1205   :  { %v13046_v27 = vpop.f32.mrb[30].mxu1 }
0x1206   :  { %v2811_v28 = vadd.f32 %v13046_v27, %v11830_v26  ;;  %v2805_v29 = vpop.f32.mrb[31].mxu1  ;;  %v11845_v27 = vld [vmem:[%s16208_s2 + $0x4] ss:$0 sm:$0xff] }
0x1207   :  { %v2806_v30 = vadd.f32 %v11830_v26, %v2805_v29 }
0x1208   :  { %v2815_v32 = vmax.f32 %v2811_v28, 0.0 }
0x1209   :  { %v2814_v31 = vmax.f32 %v2806_v30, 0.0 }
0x120b   :  { %13063 = vmatprep.mubr.msk.f32.mxu0 %vm2831_vm3, %v2814_v31 }
0x120c   :  { %13064 = vmatmul.mubr.msk.f32.vlgmr.msra.gmra.mrb[28].mxu0 %vm2831_vm3, %v2815_v32 }
0x120d   :  { %13991 = vmatpush3.bf16.msra.mxu0 %v13988_v55 }
0x120e   :  { %13993 = vmatprep.subr.bf16.mxu0 %v13992_v61 }
0x1211   :  { %13995 = vmatpush3.bf16.msra.mxu0 %v13992_v61  ;;  %v11885_v61 = vld [vmem:[%s16210_s4 + $0xb0] sm:$0xff] }
0x1212   :  { %13109 = vmatprep.subr.mxu0 %v14553_v14  ;;  %v14016_v63 = vpack.c.bf16 %v11886_v62, %v11885_v61  ;;  %v11908_v62 = vld [vmem:[%s16209_s3 + $0xd0] sm:$0xff] }
0x12df   :  { %v13065_v34 = vpop.f32.mrb[28].mxu0 }
0x12e0   :  { %v2910_v35 = vadd.f32 %v13065_v34, %v11833_v33  ;;  %v2904_v36 = vpop.f32.mrb[29].mxu0 }
0x12e1   :  { %v2905_v37 = vadd.f32 %v11833_v33, %v2904_v36 }
0x12e2   :  { %v2914_v38 = vadd.f32 %v2910_v35, %v2721_v22  ;;  %v13984_v22 = vpack.c.bf16 %v11851_v19, %v11850_v18  ;;  %v11874_v18 = vld [vmem:[%s16208_s2 + $0x5] ss:$0 sm:$0xff] }
0x12e3   :  { %v2913_v39 = vadd.f32 %v2905_v37, %v2720_v21 }
0x12e4   :  { %v2920_v40 = vsel %vm73_vm0, %v2914_v38, 0.0 }
0x12e5   :  { %2921 = vadd.xlane.f32.xlu1 %v2920_v40  ;;  %v2917_v41 = vsel %vm73_vm0, %v2913_v39, 0.0 }
0x12e6   :  { %2918 = vadd.xlane.f32.xlu0 %v2917_v41 }
0x1372   :  { %v2922_v42 = vpop.xlane.xlu1 %2921 }
0x1373   :  { %v2924_v43 = vmul.f32 0.03125, %v2922_v42  ;;  %v2919_v44 = vpop.xlane.xlu0 %2918 }
0x1374   :  { %v2923_v45 = vmul.f32 0.03125, %v2919_v44 }
0x1375   :  { %v2926_v46 = vsub.f32 %v2914_v38, %v2924_v43 }
0x1376   :  { %v2925_v47 = vsub.f32 %v2913_v39, %v2923_v45 }
0x1377   :  { %v2928_v48 = vmul.f32 %v2926_v46, %v2926_v46 }
0x1378   :  { %v2927_v49 = vmul.f32 %v2925_v47, %v2925_v47 }
0x1379   :  { %v2932_v50 = vsel %vm73_vm0, %v2928_v48, 0.0  ;;  %v11869_v48 = vld [vmem:[%s16207_s1 + $0xa0] sm:$0xff] }
0x137a   :  { %2933 = vadd.xlane.f32.xlu1 %v2932_v50  ;;  %v2929_v51 = vsel %vm73_vm0, %v2927_v49, 0.0  ;;  %v11870_v49 = vld [vmem:[%s16207_s1 + $0xa8] sm:$0xff] }
0x137b   :  { %2930 = vadd.xlane.f32.xlu0 %v2929_v51  ;;  %v13996_v50 = vpack.c.bf16 %v11870_v49, %v11869_v48 }
0x1407   :  { %v2934_v1 = vpop.xlane.xlu1 %2933 }
0x1408   :  { %v2936_v2 = vmul.f32 0.03125, %v2934_v1  ;;  %v2931_v3 = vpop.xlane.xlu0 %2930  ;;  %v11877_v1 = vld [vmem:[%s16209_s3 + $0xa0] sm:$0xff] }
0x1409   :  { %v2935_v4 = vmul.f32 0.03125, %v2931_v3 }
0x140a   :  { %v2938_v6 = vadd.f32 1e-05, %v2936_v2  ;;  %v11878_v2 = vld [vmem:[%s16209_s3 + $0xa8] sm:$0xff] }
0x140b   :  { %v2937_v7 = vadd.f32 1e-05, %v2935_v4  ;;  %v14004_v3 = vpack.c.bf16 %v11878_v2, %v11877_v1 }
0x140c   :  { %14405 = vrsqrt.f32 %v2938_v6  ;;  %v11879_v6 = vld [vmem:[%s16209_s3 + $0xb0] sm:$0xff] }
0x140d   :  { %14407 = vrsqrt.f32 %v2937_v7  ;;  %v11880_v7 = vld [vmem:[%s16209_s3 + $0xb8] sm:$0xff] }
0x1416   :  { %v14406_v8 = vpop.eup %14405 }
0x1417   :  { %v14408_v10 = vpop.eup %14407  ;;  %v2942_v11 = vmul.f32 %v14406_v8, %v2926_v46 }
0x1418   :  { %v2941_v13 = vmul.f32 %v14408_v10, %v2925_v47 }
0x1419   :  { %v2950_v16 = vmul.f32 %v11836_v9, %v2942_v11 }
0x141a   :  { %v2949_v17 = vmul.f32 %v11836_v9, %v2941_v13  ;;  %v14008_v9 = vpack.c.bf16 %v11880_v7, %v11879_v6 }
0x141b   :  { %v15070_v21 = vadd.f32 %v11837_v15, %v2950_v16 }
0x141c   :  { %v15068_v20 = vadd.f32 %v11837_v15, %v2949_v17 }
0x141e   :  { %13074 = vmatprep.mubr.msk.f32.mxu1 %vm73_vm0, %v15068_v20  ;;  %13096 = vmatprep.mubr.msk.f32.mxu0 %vm73_vm0, %v15068_v20 }
0x141f   :  { %13075 = vmatmul.mubr.msk.f32.vlgmr.msra.gmra.mrb[32].mxu1 %vm73_vm0, %v15070_v21  ;;  %13097 = vmatmul.mubr.msk.f32.vlgmr.msra.gmra.mrb[30].mxu0 %vm73_vm0, %v15070_v21 }
0x1420   :  { %13983 = vmatpush3.bf16.msra.mxu1 %v13980_v0  ;;  %13085 = vmatprep.mubr.msk.f32.mxu1 %vm73_vm0, %v15068_v20  ;;  %v11866_v0 = vld [vmem:[%s16211_s5 + $0x20] sm:$0xff] }
0x1421   :  { %13985 = vmatprep.subr.bf16.mxu1 %v13984_v22  ;;  %13111 = vmatprep.mubr.msk.f32.mxu0 %vm14554_vm1, %v14553_v14 }
0x1424   :  { %13987 = vmatpush3.bf16.msra.mxu1 %v13984_v22 }
0x1425   :  { %13099 = vmatprep.subr.mxu1 %v14553_v14 }
0x1427   :  { %13086 = vmatmul.mubr.msk.f32.vlgmr.msra.gmra.mrb[34].mxu1 %vm73_vm0, %v15070_v21 }
0x1428   :  { %13101 = vmatprep.mubr.msk.f32.mxu1 %vm14554_vm1, %v14553_v14 }
0x14f2   :  { %v13076_v23 = vpop.f32.mrb[32].mxu1  ;;  %v13098_v24 = vpop.f32.mrb[30].mxu0 }
0x14f3   :  { %v3054_v25 = vpop.f32.mrb[33].mxu1  ;;  %v3214_v26 = vpop.f32.mrb[31].mxu0  ;;  %v3060_v31 = vadd.f32 %v13076_v23, %v11845_v27 }
0x14f4   :  { %13110 = vmatpush3.msra.mxu0 %v3214_v26  ;;  %v3055_v30 = vadd.f32 %v11845_v27, %v3054_v25 }
0x14f5   :  { %13119 = vmatprep.subr.mxu0 %v11866_v0 }
0x14fa   :  { %v13087_v28 = vpop.f32.mrb[34].mxu1 }
0x14fb   :  { %v3134_v29 = vpop.f32.mrb[35].mxu1 }
0x14fc   :  { %13100 = vmatpush3.xpose.msk.msra.mxu1 %vm313_vm2, %v3134_v29 }
0x14fd   :  { %13104 = vmatprep.subr.mxu1 %v14553_v14 }
0x14ff   :  { %13102 = vmatmul.mubr.msk.f32.vlgmr.msra.gmra.mrb[36].mxu1 %vm313_vm2, %v3055_v30 }
0x1500   :  { %13105 = vmatpush3.xpose.msk.msra.mxu1 %vm313_vm2, %v13087_v28  ;;  %13106 = vmatprep.mubr.msk.f32.mxu1 %vm14554_vm1, %v14553_v14 }
0x1501   :  { %13114 = vmatprep.subr.mxu1 %v14553_v14 }
0x1503   :  { %13107 = vmatmul.mubr.msk.f32.vlgmr.msra.gmra.mrb[38].mxu1 %vm313_vm2, %v3060_v31 }
0x1504   :  { %13115 = vmatpush3.msra.mxu1 %v13098_v24  ;;  %13116 = vmatprep.mubr.msk.f32.mxu1 %vm14554_vm1, %v14553_v14 }
0x1505   :  { %13997 = vmatprep.subr.bf16.mxu1 %v13996_v50 }
0x15d2   :  { %v3295_v32 = vpop.f32.mrb[36].mxu1 }
0x15d3   :  { %v13103_v33 = vpop.f32.mrb[37].mxu1  ;;  %v3375_v34 = vsel %vm313_vm2, %v3295_v32, -inf }
0x15d4   :  { %3376 = vmax.xlane.f32.xlu0 %v3375_v34 }
0x15d6   :  { %v3371_v35 = vpop.f32.mrb[38].mxu1 }
0x15d7   :  { %v13108_v36 = vpop.f32.mrb[39].mxu1  ;;  %v3378_v37 = vsel %vm313_vm2, %v3371_v35, -inf }
0x15d8   :  { %3379 = vmax.xlane.f32.xlu1 %v3378_v37 }
0x1661   :  { %v3377_v38 = vpop.xlane.xlu0 %3376 }
0x1662   :  { %v3381_v39 = vsub.f32 %v3295_v32, %v3377_v38 }
0x1664   :  { %v3383_v40 = vmul.f32 1.442695, %v3381_v39 }
0x1665   :  { %v3380_v41 = vpop.xlane.xlu1 %3379 }
0x1666   :  { %14409 = vpow2.f32 %v3383_v40  ;;  %v3382_v42 = vsub.f32 %v3371_v35, %v3380_v41  ;;  %v11898_v41 = vld [vmem:[%s16207_s1 + $0xc0] sm:$0xff] }
0x1668   :  { %v3385_v43 = vmul.f32 1.442695, %v3382_v42  ;;  %v11899_v42 = vld [vmem:[%s16207_s1 + $0xc8] sm:$0xff] }
0x166a   :  { %14411 = vpow2.f32 %v3385_v43  ;;  %v14020_v43 = vpack.c.bf16 %v11899_v42, %v11898_v41  ;;  %v11930_v41 = vld [vmem:[%s16207_s1 + $0xf8] sm:$0xff] }
0x1670   :  { %v14410_v44 = vpop.eup %14409 }
0x1671   :  { %v3387_v45 = vsel %vm313_vm2, %v14410_v44, 0.0 }
0x1672   :  { %3388 = vadd.xlane.f32.xlu0 %v3387_v45 }
0x1674   :  { %v14412_v46 = vpop.eup %14411 }
0x1675   :  { %v3390_v47 = vsel %vm313_vm2, %v14412_v46, 0.0 }
0x1676   :  { %3391 = vadd.xlane.f32.xlu1 %v3390_v47  ;;  %v11901_v47 = vld [vmem:[%s16207_s1 + $0xd8] sm:$0xff] }
0x16ff   :  { %v3389_v51 = vpop.xlane.xlu0 %3388 }
0x1700   :  { %14413 = vrcp.f32 %v3389_v51  ;;  %v11912_v51 = vld [vmem:[%s16210_s4 + $0xc0] sm:$0xff] }
0x1703   :  { %v3392_v12 = vpop.xlane.xlu1 %3391 }
0x1704   :  { %14415 = vrcp.f32 %v3392_v12  ;;  %v11913_v12 = vld [vmem:[%s16210_s4 + $0xc8] sm:$0xff] }
0x1705   :  { %v14036_v53 = vpack.c.bf16 %v11913_v12, %v11912_v51  ;;  %v11944_v51 = vld [vmem:[%s16210_s4 + $0xf8] sm:$0xff] }
0x170a   :  { %v14414_v5 = vpop.eup %14413 }
0x170b   :  { %v3394_v52 = vmul.f32 %v14414_v5, %v14410_v44 }
0x170d   :  { %13112 = vmatmul.mubr.msk.f32.vlgmr.msra.gmra.mrb[32].mxu0 %vm313_vm2, %v3394_v52 }
0x170e   :  { %v14416_v55 = vpop.eup %14415  ;;  %13120 = vmatpush3.msra.mxu0 %v11866_v0 }
0x170f   :  { %v3396_v56 = vmul.f32 %v14416_v55, %v14412_v46  ;;  %14005 = vmatprep.subr.bf16.mxu0 %v14004_v3  ;;  %v11900_v46 = vld [vmem:[%s16207_s1 + $0xd0] sm:$0xff]  ;;  %v11915_v55 = vld [vmem:[%s16210_s4 + $0xd8] sm:$0xff] }
0x1711   :  { %13117 = vmatmul.mubr.msk.f32.vlgmr.msra.gmra.mrb[40].mxu1 %vm313_vm2, %v3396_v56  ;;  %v14040_v56 = vpack.c.bf16 %v11915_v55, %v11914_v54  ;;  %v11937_v54 = vld [vmem:[%s16209_s3 + $0xf0] sm:$0xff]  ;;  %v11938_v55 = vld [vmem:[%s16209_s3 + $0xf8] sm:$0xff] }
0x1712   :  { %13999 = vmatpush3.bf16.msra.mxu1 %v13996_v50  ;;  %13132 = vmatprep.mubr.msk.f32.mxu1 %vm73_vm0, %v15068_v20  ;;  %v14024_v50 = vpack.c.bf16 %v11901_v47, %v11900_v46  ;;  %v11941_v47 = vld [vmem:[%s16210_s4 + $0xe0] sm:$0xff] }
0x1713   :  { %14001 = vmatprep.subr.bf16.mxu1 %v14000_v57 }
0x1716   :  { %14003 = vmatpush3.bf16.msra.mxu1 %v14000_v57  ;;  %v11895_v57 = vld [vmem:[%s16211_s5 + $0x28] sm:$0xff] }
0x1717   :  { %14013 = vmatprep.subr.bf16.mxu1 %v14012_v60 }
0x1719   :  { %13133 = vmatmul.mubr.msk.f32.vlgmr.msra.gmra.mrb[42].mxu1 %vm73_vm0, %v15070_v21 }
0x171a   :  { %14015 = vmatpush3.bf16.msra.mxu1 %v14012_v60  ;;  %13154 = vmatprep.mubr.msk.f32.mxu1 %vm73_vm0, %v15068_v20  ;;  %v14028_v60 = vpack.c.bf16 %v11907_v59, %v11906_v58  ;;  %v14056_v59 = vpack.c.bf16 %v11938_v55, %v11937_v54  ;;  %v11961_v54 = vld [vmem:[%s16215_s9 + $0x28] sm:$0xff] }
0x171b   :  { %14017 = vmatprep.subr.bf16.mxu1 %v14016_v63 }
0x171e   :  { %14019 = vmatpush3.bf16.msra.mxu1 %v14016_v63  ;;  %v11909_v63 = vld [vmem:[%s16209_s3 + $0xd8] sm:$0xff] }
0x171f   :  { %13167 = vmatprep.subr.mxu1 %v14553_v14  ;;  %v14032_v1 = vpack.c.bf16 %v11909_v63, %v11908_v62 }
0x1721   :  { %13155 = vmatmul.mubr.msk.f32.vlgmr.msra.gmra.mrb[44].mxu1 %vm73_vm0, %v15070_v21 }
0x1722   :  { %13169 = vmatprep.mubr.msk.f32.mxu1 %vm14554_vm1, %v14553_v14 }
0x17e0   :  { %v3466_v4 = vpop.f32.mrb[32].mxu0 }
0x17e1   :  { %v13113_v8 = vpop.f32.mrb[33].mxu0  ;;  %13121 = vmatprep.mubr.msk.f32.mxu0 %vm313_vm2, %v3466_v4 }
0x17e4   :  { %v3539_v10 = vpop.f32.mrb[40].mxu1 }
0x17e5   :  { %v13118_v11 = vpop.f32.mrb[41].mxu1  ;;  %13122 = vmatmul.mubr.msk.f32.vlgmr.msra.gmra.mrb[34].mxu0 %vm313_vm2, %v3539_v10 }
0x17e6   :  { %14007 = vmatpush3.bf16.msra.mxu0 %v14004_v3  ;;  %13143 = vmatprep.mubr.msk.f32.mxu0 %vm73_vm0, %v15068_v20 }
0x17e7   :  { %14009 = vmatprep.subr.bf16.mxu0 %v14008_v9 }
0x17ea   :  { %14011 = vmatpush3.bf16.msra.mxu0 %v14008_v9  ;;  %v11903_v9 = vld [vmem:[%s16208_s2 + $0x6] ss:$0 sm:$0xff] }
0x17eb   :  { %13157 = vmatprep.subr.mxu0 %v14553_v14 }
0x17ec   :  { %v13134_v13 = vpop.f32.mrb[42].mxu1 }
0x17ed   :  { %v3707_v15 = vpop.f32.mrb[43].mxu1  ;;  %13144 = vmatmul.mubr.msk.f32.vlgmr.msra.gmra.mrb[36].mxu0 %vm73_vm0, %v15070_v21  ;;  %v3713_v24 = vadd.f32 %v13134_v13, %v11874_v18 }
0x17ee   :  { %13159 = vmatprep.mubr.msk.f32.mxu0 %vm14554_vm1, %v14553_v14  ;;  %v3708_v23 = vadd.f32 %v11874_v18, %v3707_v15 }
0x17f4   :  { %v13156_v16 = vpop.f32.mrb[44].mxu1 }
0x17f5   :  { %v3867_v17 = vpop.f32.mrb[45].mxu1 }
0x17f6   :  { %13168 = vmatpush3.msra.mxu1 %v3867_v17 }
0x17f7   :  { %14021 = vmatprep.subr.bf16.mxu1 %v14020_v43 }
0x18c0   :  { %v13145_v19 = vpop.f32.mrb[36].mxu0 }
0x18c1   :  { %v3787_v22 = vpop.f32.mrb[37].mxu0 }
0x18c2   :  { %13158 = vmatpush3.xpose.msk.msra.mxu0 %vm313_vm2, %v3787_v22 }
0x18c3   :  { %13162 = vmatprep.subr.mxu0 %v14553_v14 }
0x18c5   :  { %13160 = vmatmul.mubr.msk.f32.vlgmr.msra.gmra.mrb[38].mxu0 %vm313_vm2, %v3708_v23 }
0x18c6   :  { %13163 = vmatpush3.xpose.msk.msra.mxu0 %vm313_vm2, %v13145_v19  ;;  %13164 = vmatprep.mubr.msk.f32.mxu0 %vm14554_vm1, %v14553_v14 }
0x18c7   :  { %13172 = vmatprep.subr.mxu0 %v14553_v14 }
0x18c9   :  { %13165 = vmatmul.mubr.msk.f32.vlgmr.msra.gmra.mrb[40].mxu0 %vm313_vm2, %v3713_v24 }
0x18ca   :  { %13173 = vmatpush3.msra.mxu0 %v13156_v16  ;;  %13174 = vmatprep.mubr.msk.f32.mxu0 %vm14554_vm1, %v14553_v14 }
0x18cb   :  { %13177 = vmatprep.subr.mxu0 %v11895_v57 }
0x1998   :  { %v3948_v25 = vpop.f32.mrb[38].mxu0 }
0x1999   :  { %v13161_v26 = vpop.f32.mrb[39].mxu0  ;;  %v4028_v27 = vsel %vm313_vm2, %v3948_v25, -inf }
0x199a   :  { %4029 = vmax.xlane.f32.xlu0 %v4028_v27 }
0x199c   :  { %v4024_v28 = vpop.f32.mrb[40].mxu0 }
0x199d   :  { %v13166_v29 = vpop.f32.mrb[41].mxu0  ;;  %v4031_v30 = vsel %vm313_vm2, %v4024_v28, -inf }
0x199e   :  { %4032 = vmax.xlane.f32.xlu1 %v4031_v30 }
0x1a27   :  { %v4030_v31 = vpop.xlane.xlu0 %4029 }
0x1a28   :  { %v4034_v32 = vsub.f32 %v3948_v25, %v4030_v31 }
0x1a2a   :  { %v4036_v33 = vmul.f32 1.442695, %v4034_v32 }
0x1a2b   :  { %v4033_v34 = vpop.xlane.xlu1 %4032 }
0x1a2c   :  { %14417 = vpow2.f32 %v4036_v33  ;;  %v4035_v35 = vsub.f32 %v4024_v28, %v4033_v34  ;;  %v11927_v34 = vld [vmem:[%s16207_s1 + $0xe0] sm:$0xff] }
0x1a2e   :  { %v4038_v36 = vmul.f32 1.442695, %v4035_v35  ;;  %v11928_v35 = vld [vmem:[%s16207_s1 + $0xe8] sm:$0xff] }
0x1a30   :  { %14419 = vpow2.f32 %v4038_v36  ;;  %v14044_v36 = vpack.c.bf16 %v11928_v35, %v11927_v34 }
0x1a36   :  { %v14418_v37 = vpop.eup %14417 }
0x1a37   :  { %v4040_v38 = vsel %vm313_vm2, %v14418_v37, 0.0 }
0x1a38   :  { %4041 = vadd.xlane.f32.xlu0 %v4040_v38 }
0x1a3a   :  { %v14420_v39 = vpop.eup %14419 }
0x1a3b   :  { %v4043_v40 = vsel %vm313_vm2, %v14420_v39, 0.0 }
0x1a3c   :  { %4044 = vadd.xlane.f32.xlu1 %v4043_v40  ;;  %v11929_v40 = vld [vmem:[%s16207_s1 + $0xf0] sm:$0xff] }
0x1ac5   :  { %v4042_v44 = vpop.xlane.xlu0 %4041 }
0x1ac6   :  { %14421 = vrcp.f32 %v4042_v44 }
0x1ac9   :  { %v4045_v45 = vpop.xlane.xlu1 %4044 }
0x1aca   :  { %14423 = vrcp.f32 %v4045_v45  ;;  %v14048_v45 = vpack.c.bf16 %v11930_v41, %v11929_v40 }
0x1ad0   :  { %v14422_v48 = vpop.eup %14421 }
0x1ad1   :  { %v4047_v49 = vmul.f32 %v14422_v48, %v14418_v37  ;;  %v11924_v37 = vld [vmem:[%s16211_s5 + $0x30] sm:$0xff]  ;;  %v11942_v48 = vld [vmem:[%s16210_s4 + $0xe8] sm:$0xff] }
0x1ad3   :  { %13170 = vmatmul.mubr.msk.f32.vlgmr.msra.gmra.mrb[46].mxu1 %vm313_vm2, %v4047_v49  ;;  %v14060_v49 = vpack.c.bf16 %v11942_v48, %v11941_v47 }
0x1ad4   :  { %v14424_v5 = vpop.eup %14423  ;;  %14023 = vmatpush3.bf16.msra.mxu1 %v14020_v43  ;;  %13190 = vmatprep.mubr.msk.f32.mxu1 %vm73_vm0, %v15068_v20 }
0x1ad5   :  { %v4049_v52 = vmul.f32 %v14424_v5, %v14420_v39  ;;  %14025 = vmatprep.subr.bf16.mxu1 %v14024_v50  ;;  %v11935_v5 = vld [vmem:[%s16209_s3 + $0xe0] sm:$0xff] }
0x1ad7   :  { %13175 = vmatmul.mubr.msk.f32.vlgmr.msra.gmra.mrb[42].mxu0 %vm313_vm2, %v4049_v52  ;;  %v11936_v52 = vld [vmem:[%s16209_s3 + $0xe8] sm:$0xff] }
0x1ad8   :  { %14027 = vmatpush3.bf16.msra.mxu1 %v14024_v50  ;;  %13178 = vmatpush3.msra.mxu0 %v11895_v57  ;;  %v11943_v50 = vld [vmem:[%s16210_s4 + $0xf0] sm:$0xff] }
0x1ad9   :  { %14037 = vmatprep.subr.bf16.mxu1 %v14036_v53  ;;  %14029 = vmatprep.subr.bf16.mxu0 %v14028_v60  ;;  %v14064_v12 = vpack.c.bf16 %v11944_v51, %v11943_v50 }
0x1adb   :  { %13191 = vmatmul.mubr.msk.f32.vlgmr.msra.gmra.mrb[48].mxu1 %vm73_vm0, %v15070_v21 }
0x1adc   :  { %14039 = vmatpush3.bf16.msra.mxu1 %v14036_v53  ;;  %13212 = vmatprep.mubr.msk.f32.mxu1 %vm73_vm0, %v15068_v20  ;;  %v14052_v53 = vpack.c.bf16 %v11936_v52, %v11935_v5 }
0x1add   :  { %14041 = vmatprep.subr.bf16.mxu1 %v14040_v56 }
0x1ae0   :  { %14043 = vmatpush3.bf16.msra.mxu1 %v14040_v56 }
0x1ae1   :  { %13220 = vmatprep.subr.mxu1 %v14553_v14 }
0x1ae3   :  { %13213 = vmatmul.mubr.msk.f32.vlgmr.msra.gmra.mrb[50].mxu1 %vm73_vm0, %v15070_v21 }
0x1ae4   :  { %13222 = vmatprep.mubr.msk.f32.mxu1 %vm14554_vm1, %v14553_v14 }
0x1ba6   :  { %v4119_v61 = vpop.f32.mrb[46].mxu1 }
0x1ba7   :  { %v13171_v0 = vpop.f32.mrb[47].mxu1  ;;  %13179 = vmatprep.mubr.msk.f32.mxu0 %vm313_vm2, %v4119_v61 }
0x1baa   :  { %v4192_v2 = vpop.f32.mrb[42].mxu0 }
0x1bab   :  { %v13176_v3 = vpop.f32.mrb[43].mxu0  ;;  %13180 = vmatmul.mubr.msk.f32.vlgmr.msra.gmra.mrb[34].mxu0 %vm313_vm2, %v4192_v2 }
0x1bac   :  { %14031 = vmatpush3.bf16.msra.mxu0 %v14028_v60  ;;  %13201 = vmatprep.mubr.msk.f32.mxu0 %vm73_vm0, %v15068_v20 }
0x1bad   :  { %14033 = vmatprep.subr.bf16.mxu0 %v14032_v1 }
0x1bae   :  { %v13192_v4 = vpop.f32.mrb[48].mxu1 }
0x1baf   :  { %v4360_v6 = vpop.f32.mrb[49].mxu1  ;;  %v4366_v13 = vadd.f32 %v13192_v4, %v11903_v9 }
0x1bb0   :  { %14035 = vmatpush3.bf16.msra.mxu0 %v14032_v1  ;;  %v4361_v15 = vadd.f32 %v11903_v9, %v4360_v6  ;;  %v11932_v1 = vld [vmem:[%s16208_s2 + $0x7] ss:$0 sm:$0xff] }
0x1bb1   :  { %13215 = vmatprep.subr.mxu0 %v14553_v14 }
0x1bb3   :  { %13202 = vmatmul.mubr.msk.f32.vlgmr.msra.gmra.mrb[44].mxu0 %vm73_vm0, %v15070_v21 }
0x1bb4   :  { %13217 = vmatprep.mubr.msk.f32.mxu0 %vm14554_vm1, %v14553_v14 }
0x1bb6   :  { %v13214_v7 = vpop.f32.mrb[50].mxu1 }
0x1bb7   :  { %v4520_v8 = vpop.f32.mrb[51].mxu1 }
0x1c86   :  { %v13203_v10 = vpop.f32.mrb[44].mxu0 }
0x1c87   :  { %v4440_v11 = vpop.f32.mrb[45].mxu0  ;;  %13221 = vmatpush3.xpose.msk.msra.mxu1 %vm313_vm2, %v13203_v10 }
0x1c88   :  { %13216 = vmatpush3.xpose.msk.msra.mxu0 %vm313_vm2, %v4440_v11  ;;  %13230 = vmatprep.subr.mxu1 %v14553_v14 }
0x1c89   :  { %13225 = vmatprep.subr.mxu0 %v14553_v14 }
0x1c8a   :  { %13223 = vmatmul.mubr.msk.f32.vlgmr.msra.gmra.mrb[52].mxu1 %vm313_vm2, %v4366_v13 }
0x1c8b   :  { %13218 = vmatmul.mubr.msk.f32.vlgmr.msra.gmra.mrb[46].mxu0 %vm313_vm2, %v4361_v15  ;;  %13231 = vmatpush3.msra.mxu1 %v13214_v7 }
0x1c8c   :  { %13226 = vmatpush3.msra.mxu0 %v4520_v8  ;;  %13232 = vmatprep.mubr.msk.f32.mxu1 %vm14554_vm1, %v14553_v14 }
0x1c8d   :  { %13227 = vmatprep.mubr.msk.f32.mxu0 %vm14554_vm1, %v14553_v14  ;;  %14045 = vmatprep.subr.bf16.mxu1 %v14044_v36 }
0x1c8e   :  { %13235 = vmatprep.subr.mxu0 %v11924_v37 }
0x1d5d   :  { %v4677_v16 = vpop.f32.mrb[52].mxu1 }
0x1d5e   :  { %v4601_v17 = vpop.f32.mrb[46].mxu0  ;;  %v13224_v18 = vpop.f32.mrb[53].mxu1  ;;  %v4684_v19 = vsel %vm313_vm2, %v4677_v16, -inf }
0x1d5f   :  { %4685 = vmax.xlane.f32.xlu1 %v4684_v19  ;;  %v13219_v22 = vpop.f32.mrb[47].mxu0  ;;  %v4681_v23 = vsel %vm313_vm2, %v4601_v17, -inf }
0x1d60   :  { %4682 = vmax.xlane.f32.xlu0 %v4681_v23 }
0x1dec   :  { %v4686_v24 = vpop.xlane.xlu1 %4685 }
0x1ded   :  { %v4688_v25 = vsub.f32 %v4677_v16, %v4686_v24  ;;  %v4683_v26 = vpop.xlane.xlu0 %4682 }
0x1dee   :  { %v4687_v27 = vsub.f32 %v4601_v17, %v4683_v26 }
0x1def   :  { %v4691_v28 = vmul.f32 1.442695, %v4688_v25 }
0x1df0   :  { %v4689_v29 = vmul.f32 1.442695, %v4687_v27 }
0x1df1   :  { %14425 = vpow2.f32 %v4691_v28 }
0x1df2   :  { %14427 = vpow2.f32 %v4689_v29 }
0x1dfb   :  { %v14426_v30 = vpop.eup %14425 }
0x1dfc   :  { %v14428_v31 = vpop.eup %14427  ;;  %v4696_v32 = vsel %vm313_vm2, %v14426_v30, 0.0 }
0x1dfd   :  { %4697 = vadd.xlane.f32.xlu1 %v4696_v32  ;;  %v4693_v33 = vsel %vm313_vm2, %v14428_v31, 0.0 }
0x1dfe   :  { %4694 = vadd.xlane.f32.xlu0 %v4693_v33  ;;  %v11953_v33 = vld [vmem:[%s16211_s5 + $0x38] sm:$0xff] }
0x1e8a   :  { %v4698_v38 = vpop.xlane.xlu1 %4697 }
0x1e8b   :  { %14429 = vrcp.f32 %v4698_v38  ;;  %v4695_v39 = vpop.xlane.xlu0 %4694  ;;  %v11839_v38 = vld [vmem:[%s16212_s6 + $0x1] ss:$0 sm:$0xff] }
0x1e8c   :  { %14431 = vrcp.f32 %v4695_v39  ;;  %v2968_v39 = vadd.f32 %v11839_v38, %v15070_v21  ;;  %v2967_v41 = vadd.f32 %v11839_v38, %v15068_v20 }
0x1e95   :  { %v14430_v42 = vpop.eup %14429 }
0x1e96   :  { %v14432_v43 = vpop.eup %14431  ;;  %v4702_v44 = vmul.f32 %v14430_v42, %v14426_v30 }
0x1e97   :  { %v4700_v46 = vmul.f32 %v14432_v43, %v14428_v31 }
0x1e98   :  { %13233 = vmatmul.mubr.msk.f32.vlgmr.msra.gmra.mrb[54].mxu1 %vm313_vm2, %v4702_v44 }
0x1e99   :  { %14047 = vmatpush3.bf16.msra.mxu1 %v14044_v36  ;;  %13228 = vmatmul.mubr.msk.f32.vlgmr.msra.gmra.mrb[48].mxu0 %vm313_vm2, %v4700_v46 }
0x1e9a   :  { %13248 = vmatprep.mubr.msk.f32.mxu1 %vm73_vm0, %v15068_v20  ;;  %14049 = vmatprep.subr.bf16.mxu1 %v14048_v45 }
0x1e9b   :  { %13236 = vmatpush3.msra.mxu0 %v11924_v37 }
0x1e9c   :  { %14053 = vmatprep.subr.bf16.mxu0 %v14052_v53 }
0x1e9d   :  { %14051 = vmatpush3.bf16.msra.mxu1 %v14048_v45 }
0x1e9e   :  { %14061 = vmatprep.subr.bf16.mxu1 %v14060_v49 }
0x1ea0   :  { %13249 = vmatmul.mubr.msk.f32.vlgmr.msra.gmra.mrb[56].mxu1 %vm73_vm0, %v15070_v21 }
0x1ea1   :  { %14063 = vmatpush3.bf16.msra.mxu1 %v14060_v49  ;;  %13270 = vmatprep.mubr.msk.f32.mxu1 %vm73_vm0, %v15068_v20 }
0x1ea2   :  { %14065 = vmatprep.subr.bf16.mxu1 %v14064_v12 }
0x1ea5   :  { %14067 = vmatpush3.bf16.msra.mxu1 %v14064_v12 }
0x1ea6   :  { %13283 = vmatprep.subr.mxu1 %v14553_v14 }
0x1ea8   :  { %13271 = vmatmul.mubr.msk.f32.vlgmr.msra.gmra.mrb[58].mxu1 %vm73_vm0, %v15070_v21 }
0x1ea9   :  { %13285 = vmatprep.mubr.msk.f32.mxu1 %vm14554_vm1, %v14553_v14 }
0x1f6b   :  { %v4845_v56 = vpop.f32.mrb[54].mxu1 }
0x1f6c   :  { %v4772_v57 = vpop.f32.mrb[48].mxu0  ;;  %v13234_v58 = vpop.f32.mrb[55].mxu1 }
0x1f6d   :  { %v13229_v60 = vpop.f32.mrb[49].mxu0  ;;  %13237 = vmatprep.mubr.msk.f32.mxu0 %vm313_vm2, %v4772_v57  ;;  %v11963_v57 = vld [vmem:[%s16215_s9 + $0x38] sm:$0xff] }
0x1f6e   :  { %13238 = vmatmul.mubr.msk.f32.vlgmr.msra.gmra.mrb[34].mxu0 %vm313_vm2, %v4845_v56  ;;  %v11962_v56 = vld [vmem:[%s16215_s9 + $0x30] sm:$0xff]  ;;  %v11969_v60 = vld [vmem:[%s16217_s11 + $0x48] sm:$0xff] }
0x1f6f   :  { %14055 = vmatpush3.bf16.msra.mxu0 %v14052_v53  ;;  %13259 = vmatprep.mubr.msk.f32.mxu0 %vm73_vm0, %v15068_v20  ;;  %v11960_v53 = vld [vmem:[%s16215_s9 + $0x20] sm:$0xff]  ;;  %v14072_v58 = vpack.c.bf16 %v11963_v57, %v11962_v56  ;;  %v11988_v56 = vld [vmem:[%s16207_s1 + $0x110] sm:$0xff]  ;;  %v11989_v57 = vld [vmem:[%s16207_s1 + $0x118] sm:$0xff] }
0x1f70   :  { %14057 = vmatprep.subr.bf16.mxu0 %v14056_v59  ;;  %v14068_v55 = vpack.c.bf16 %v11961_v54, %v11960_v53  ;;  %v12000_v53 = vld [vmem:[%s16210_s4 + $0x100] sm:$0xff]  ;;  %v12001_v54 = vld [vmem:[%s16210_s4 + $0x108] sm:$0xff] }
0x1f73   :  { %v13250_v61 = vpop.f32.mrb[56].mxu1  ;;  %14059 = vmatpush3.bf16.msra.mxu0 %v14056_v59  ;;  %v11968_v59 = vld [vmem:[%s16217_s11 + $0x40] sm:$0xff] }
0x1f74   :  { %v5013_v62 = vpop.f32.mrb[57].mxu1  ;;  %13273 = vmatprep.subr.mxu0 %v14553_v14  ;;  %v5019_v6 = vadd.f32 %v13250_v61, %v11932_v1  ;;  %v11970_v61 = vld [vmem:[%s16217_s11 + $0x50] sm:$0xff] }
0x1f75   :  { %v5014_v4 = vadd.f32 %v11932_v1, %v5013_v62  ;;  %v14076_v62 = vpack.c.bf16 %v11969_v60, %v11968_v59  ;;  %v11972_v1 = vld [vmem:[%s16217_s11 + $0x60] sm:$0xff]  ;;  %v12002_v59 = vld [vmem:[%s16210_s4 + $0x110] sm:$0xff]  ;;  %v12003_v60 = vld [vmem:[%s16210_s4 + $0x118] sm:$0xff] }
0x1f76   :  { %13260 = vmatmul.mubr.msk.f32.vlgmr.msra.gmra.mrb[50].mxu0 %vm73_vm0, %v15070_v21 }
0x1f77   :  { %13275 = vmatprep.mubr.msk.f32.mxu0 %vm14554_vm1, %v14553_v14 }
0x1f7b   :  { %v13272_v63 = vpop.f32.mrb[58].mxu1 }
0x1f7c   :  { %v5173_v0 = vpop.f32.mrb[59].mxu1 }
0x1f7d   :  { %13284 = vmatpush3.msra.mxu1 %v5173_v0 }
0x1f7e   :  { %14069 = vmatprep.subr.bf16.mxu1 %v14068_v55 }
0x2049   :  { %v13261_v2 = vpop.f32.mrb[50].mxu0 }
0x204a   :  { %v5093_v3 = vpop.f32.mrb[51].mxu0 }
0x204b   :  { %13274 = vmatpush3.xpose.msk.msra.mxu0 %vm313_vm2, %v5093_v3 }
0x204c   :  { %13278 = vmatprep.subr.mxu0 %v14553_v14 }
0x204e   :  { %13276 = vmatmul.mubr.msk.f32.vlgmr.msra.gmra.mrb[52].mxu0 %vm313_vm2, %v5014_v4 }
0x204f   :  { %13279 = vmatpush3.xpose.msk.msra.mxu0 %vm313_vm2, %v13261_v2  ;;  %13280 = vmatprep.mubr.msk.f32.mxu0 %vm14554_vm1, %v14553_v14  ;;  %v11973_v2 = vld [vmem:[%s16217_s11 + $0x68] sm:$0xff] }
0x2050   :  { %13288 = vmatprep.subr.mxu0 %v14553_v14  ;;  %v14084_v3 = vpack.c.bf16 %v11973_v2, %v11972_v1 }
0x2052   :  { %13281 = vmatmul.mubr.msk.f32.vlgmr.msra.gmra.mrb[54].mxu0 %vm313_vm2, %v5019_v6 }
0x2053   :  { %13289 = vmatpush3.msra.mxu0 %v13272_v63  ;;  %13290 = vmatprep.mubr.msk.f32.mxu0 %vm14554_vm1, %v14553_v14  ;;  %v11971_v63 = vld [vmem:[%s16217_s11 + $0x58] sm:$0xff] }
0x2054   :  { %13293 = vmatprep.subr.mxu0 %v11953_v33  ;;  %v14080_v0 = vpack.c.bf16 %v11971_v63, %v11970_v61  ;;  %v14112_v61 = vpack.c.bf16 %v12003_v60, %v12002_v59  ;;  %v11995_v63 = vld [vmem:[%s16209_s3 + $0x108] sm:$0xff] }
0x2055   :  { %v12030_v59 = vld [vmem:[%s16210_s4 + $0x128] sm:$0xff] }
0x2121   :  { %v5254_v7 = vpop.f32.mrb[52].mxu0 }
0x2122   :  { %v13277_v8 = vpop.f32.mrb[53].mxu0  ;;  %v5334_v9 = vsel %vm313_vm2, %v5254_v7, -inf }
0x2123   :  { %5335 = vmax.xlane.f32.xlu0 %v5334_v9 }
0x2125   :  { %v5330_v10 = vpop.f32.mrb[54].mxu0 }
0x2126   :  { %v13282_v11 = vpop.f32.mrb[55].mxu0  ;;  %v5337_v13 = vsel %vm313_vm2, %v5330_v10, -inf }
0x2127   :  { %5338 = vmax.xlane.f32.xlu1 %v5337_v13  ;;  %v11958_v13 = vld [vmem:[%s16213_s7 + $0x1] ss:$0 sm:$0xff] }
0x21b0   :  { %v5336_v15 = vpop.xlane.xlu0 %5335 }
0x21b1   :  { %v5340_v16 = vsub.f32 %v5254_v7, %v5336_v15 }
0x21b3   :  { %v5342_v17 = vmul.f32 1.442695, %v5340_v16 }
0x21b4   :  { %v5339_v18 = vpop.xlane.xlu1 %5338 }
0x21b5   :  { %14433 = vpow2.f32 %v5342_v17  ;;  %v5341_v19 = vsub.f32 %v5330_v10, %v5339_v18  ;;  %v11959_v18 = vld [vmem:[%s16214_s8 + $0x1] ss:$0 sm:$0xff] }
0x21b7   :  { %v5344_v22 = vmul.f32 1.442695, %v5341_v19 }
0x21b9   :  { %14435 = vpow2.f32 %v5344_v22 }
0x21bf   :  { %v14434_v23 = vpop.eup %14433 }
0x21c0   :  { %v5346_v24 = vsel %vm313_vm2, %v14434_v23, 0.0 }
0x21c1   :  { %5347 = vadd.xlane.f32.xlu0 %v5346_v24 }
0x21c3   :  { %v14436_v25 = vpop.eup %14435 }
0x21c4   :  { %v5349_v26 = vsel %vm313_vm2, %v14436_v25, 0.0 }
0x21c5   :  { %5350 = vadd.xlane.f32.xlu1 %v5349_v26  ;;  %v11975_v26 = vld [vmem:[%s16217_s11 + $0x78] sm:$0xff] }
0x224e   :  { %v5348_v27 = vpop.xlane.xlu0 %5347 }
0x224f   :  { %14437 = vrcp.f32 %v5348_v27 }
0x2252   :  { %v5351_v28 = vpop.xlane.xlu1 %5350 }
0x2253   :  { %14439 = vrcp.f32 %v5351_v28  ;;  %v11965_v28 = vld [vmem:[%s16216_s10 + $0x1] ss:$0 sm:$0xff] }
0x2259   :  { %v14438_v29 = vpop.eup %14437 }
0x225a   :  { %v5353_v30 = vmul.f32 %v14438_v29, %v14434_v23 }
0x225c   :  { %13286 = vmatmul.mubr.msk.f32.vlgmr.msra.gmra.mrb[60].mxu1 %vm313_vm2, %v5353_v30 }
0x225d   :  { %v14440_v31 = vpop.eup %14439  ;;  %14071 = vmatpush3.bf16.msra.mxu1 %v14068_v55  ;;  %v14108_v55 = vpack.c.bf16 %v12001_v54, %v12000_v53  ;;  %v12017_v53 = vld [vmem:[%s16207_s1 + $0x130] sm:$0xff]  ;;  %v12018_v54 = vld [vmem:[%s16207_s1 + $0x138] sm:$0xff] }
0x225e   :  { %v5355_v32 = vmul.f32 %v14440_v31, %v14436_v25  ;;  %14073 = vmatprep.subr.bf16.mxu1 %v14072_v58  ;;  %v11974_v25 = vld [vmem:[%s16217_s11 + $0x70] sm:$0xff] }
0x225f   :  { %v14088_v27 = vpack.c.bf16 %v11975_v26, %v11974_v25 }
0x2260   :  { %13291 = vmatmul.mubr.msk.f32.vlgmr.msra.gmra.mrb[56].mxu0 %vm313_vm2, %v5355_v32 }
0x2261   :  { %13294 = vmatpush3.msra.mxu0 %v11953_v33  ;;  %14075 = vmatpush3.bf16.msra.mxu1 %v14072_v58  ;;  %v14096_v58 = vpack.c.bf16 %v11989_v57, %v11988_v56  ;;  %v14120_v57 = vpack.c.bf16 %v12018_v54, %v12017_v53  ;;  %v12060_v54 = vld [vmem:[%s16210_s4 + $0x150] sm:$0xff] }
0x2262   :  { %14077 = vmatprep.subr.bf16.mxu0 %v14076_v62 }
0x232f   :  { %v5425_v34 = vpop.f32.mrb[60].mxu1 }
0x2330   :  { %v13287_v35 = vpop.f32.mrb[61].mxu1  ;;  %13295 = vmatprep.mubr.msk.f32.mxu0 %vm313_vm2, %v5425_v34 }
0x2331   :  { %v11977_v35 = vld [vmem:[%s16218_s12 + $0x1] ss:$0 sm:$0xff] }
0x2333   :  { %v5498_v36 = vpop.f32.mrb[56].mxu0 }
0x2334   :  { %v13292_v37 = vpop.f32.mrb[57].mxu0  ;;  %13296 = vmatmul.mubr.msk.f32.vlgmr.msra.gmra.mrb[34].mxu0 %vm313_vm2, %v5498_v36 }
0x2335   :  { %14079 = vmatpush3.bf16.msra.mxu0 %v14076_v62  ;;  %v11994_v62 = vld [vmem:[%s16209_s3 + $0x100] sm:$0xff] }
0x2336   :  { %14081 = vmatprep.subr.bf16.mxu0 %v14080_v0 }
0x2339   :  { %14083 = vmatpush3.bf16.msra.mxu0 %v14080_v0  ;;  %v14100_v0 = vpack.c.bf16 %v11995_v63, %v11994_v62  ;;  %v12032_v62 = vld [vmem:[%s16210_s4 + $0x138] sm:$0xff] }
0x233a   :  { %14085 = vmatprep.subr.bf16.mxu0 %v14084_v3 }
0x233d   :  { %14087 = vmatpush3.bf16.msra.mxu0 %v14084_v3 }
0x233e   :  { %14089 = vmatprep.subr.bf16.mxu0 %v14088_v27 }
0x2341   :  { %14091 = vmatpush3.bf16.msra.mxu0 %v14088_v27 }
0x2342   :  { %14109 = vmatprep.subr.bf16.mxu0 %v14108_v55 }
0x2407   :  { %v13297_v40 = vpop.f32.mrb[34].mxu0 }
0x2408   :  { %v14334_v42 = vadd.f32 %v13297_v40, %v2968_v39  ;;  %v5576_v43 = vpop.f32.mrb[35].mxu0 }
0x2409   :  { %v14335_v44 = vadd.f32 %v5576_v43, %v2967_v41 }
0x240a   :  { %v5594_v45 = vsel %vm73_vm0, %v14334_v42, 0.0 }
0x240b   :  { %5595 = vadd.xlane.f32.xlu1 %v5594_v45  ;;  %v5591_v46 = vsel %vm73_vm0, %v14335_v44, 0.0 }
0x240c   :  { %5592 = vadd.xlane.f32.xlu0 %v5591_v46 }
0x2498   :  { %v5596_v47 = vpop.xlane.xlu1 %5595 }
0x2499   :  { %v5598_v48 = vmul.f32 0.03125, %v5596_v47  ;;  %v5593_v49 = vpop.xlane.xlu0 %5592 }
0x249a   :  { %v5597_v50 = vmul.f32 0.03125, %v5593_v49 }
0x249b   :  { %v5600_v51 = vsub.f32 %v14334_v42, %v5598_v48 }
0x249c   :  { %v5599_v12 = vsub.f32 %v14335_v44, %v5597_v50 }
0x249d   :  { %v5602_v5 = vmul.f32 %v5600_v51, %v5600_v51 }
0x249e   :  { %v5601_v21 = vmul.f32 %v5599_v12, %v5599_v12 }
0x249f   :  { %v5606_v52 = vsel %vm73_vm0, %v5602_v5, 0.0 }
0x24a0   :  { %5607 = vadd.xlane.f32.xlu1 %v5606_v52  ;;  %v5603_v20 = vsel %vm73_vm0, %v5601_v21, 0.0  ;;  %v11986_v21 = vld [vmem:[%s16207_s1 + $0x100] sm:$0xff]  ;;  %v11987_v52 = vld [vmem:[%s16207_s1 + $0x108] sm:$0xff] }
0x24a1   :  { %5604 = vadd.xlane.f32.xlu0 %v5603_v20  ;;  %v14092_v20 = vpack.c.bf16 %v11987_v52, %v11986_v21 }
0x24a3   :  { %14093 = vmatprep.subr.bf16.mxu1 %v14092_v20 }
0x252d   :  { %v5608_v4 = vpop.xlane.xlu1 %5607 }
0x252e   :  { %v5610_v6 = vmul.f32 0.03125, %v5608_v4  ;;  %v5605_v7 = vpop.xlane.xlu0 %5604 }
0x252f   :  { %v5609_v8 = vmul.f32 0.03125, %v5605_v7 }
0x2530   :  { %v5612_v9 = vadd.f32 1e-05, %v5610_v6 }
0x2531   :  { %v5611_v10 = vadd.f32 1e-05, %v5609_v8 }
0x2532   :  { %14441 = vrsqrt.f32 %v5612_v9  ;;  %v11982_v9 = vld [vmem:[%s16219_s13 + $0x1] ss:$0 sm:$0xff] }
0x2533   :  { %14443 = vrsqrt.f32 %v5611_v10 }
0x253c   :  { %v14442_v11 = vpop.eup %14441 }
0x253d   :  { %v14444_v15 = vpop.eup %14443  ;;  %v5616_v16 = vmul.f32 %v14442_v11, %v5600_v51 }
0x253e   :  { %v5615_v17 = vmul.f32 %v14444_v15, %v5599_v12  ;;  %v11983_v15 = vld [vmem:[%s16220_s14 + $0x1] ss:$0 sm:$0xff] }
0x253f   :  { %v5624_v19 = vmul.f32 %v11958_v13, %v5616_v16 }
0x2540   :  { %v5623_v22 = vmul.f32 %v11958_v13, %v5615_v17 }
0x2541   :  { %v5632_v24 = vadd.f32 %v11959_v18, %v5624_v19  ;;  %v11997_v19 = vld [vmem:[%s16209_s3 + $0x118] sm:$0xff] }
0x2542   :  { %v5631_v23 = vadd.f32 %v11959_v18, %v5623_v22  ;;  %v11996_v18 = vld [vmem:[%s16209_s3 + $0x110] sm:$0xff] }
0x2544   :  { %13306 = vmatprep.mubr.msk.f32.mxu1 %vm73_vm0, %v5631_v23 }
0x2545   :  { %13307 = vmatmul.mubr.msk.f32.vlgmr.msra.gmra.mrb[62].mxu1 %vm73_vm0, %v5632_v24 }
0x2546   :  { %14095 = vmatpush3.bf16.msra.mxu1 %v14092_v20 }
0x2547   :  { %14097 = vmatprep.subr.bf16.mxu1 %v14096_v58 }
0x254a   :  { %14099 = vmatpush3.bf16.msra.mxu1 %v14096_v58  ;;  %v12029_v58 = vld [vmem:[%s16210_s4 + $0x120] sm:$0xff] }
0x254b   :  { %14101 = vmatprep.subr.bf16.mxu1 %v14100_v0  ;;  %v14132_v60 = vpack.c.bf16 %v12030_v59, %v12029_v58  ;;  %v12052_v58 = vld [vmem:[%s16209_s3 + $0x140] sm:$0xff]  ;;  %v12053_v59 = vld [vmem:[%s16209_s3 + $0x148] sm:$0xff] }
0x2618   :  { %v13308_v29 = vpop.f32.mrb[62].mxu1 }
0x2619   :  { %v5724_v30 = vadd.f32 %v13308_v29, %v11965_v28  ;;  %v5718_v31 = vpop.f32.mrb[63].mxu1  ;;  %v11991_v29 = vld [vmem:[%s16208_s2 + $0x8] ss:$0 sm:$0xff] }
0x261a   :  { %v5719_v32 = vadd.f32 %v11965_v28, %v5718_v31 }
0x261b   :  { %v5728_v34 = vmax.f32 %v5724_v30, 0.0 }
0x261c   :  { %v5727_v33 = vmax.f32 %v5719_v32, 0.0 }
0x261e   :  { %13325 = vmatprep.mubr.msk.f32.mxu0 %vm2831_vm3, %v5727_v33 }
0x261f   :  { %13326 = vmatmul.mubr.msk.f32.vlgmr.msra.gmra.mrb[58].mxu0 %vm2831_vm3, %v5728_v34 }
0x2620   :  { %14111 = vmatpush3.bf16.msra.mxu0 %v14108_v55 }
0x2621   :  { %14113 = vmatprep.subr.bf16.mxu0 %v14112_v61 }
0x2624   :  { %14115 = vmatpush3.bf16.msra.mxu0 %v14112_v61  ;;  %v12031_v61 = vld [vmem:[%s16210_s4 + $0x130] sm:$0xff] }
0x2625   :  { %13371 = vmatprep.subr.mxu0 %v14553_v14  ;;  %v14136_v63 = vpack.c.bf16 %v12032_v62, %v12031_v61  ;;  %v12054_v62 = vld [vmem:[%s16209_s3 + $0x150] sm:$0xff] }
0x26f2   :  { %v13327_v36 = vpop.f32.mrb[58].mxu0 }
0x26f3   :  { %v5824_v37 = vadd.f32 %v13327_v36, %v11977_v35  ;;  %v5818_v38 = vpop.f32.mrb[59].mxu0 }
0x26f4   :  { %v5819_v39 = vadd.f32 %v11977_v35, %v5818_v38 }
0x26f5   :  { %v5828_v40 = vadd.f32 %v5824_v37, %v5632_v24  ;;  %v14104_v24 = vpack.c.bf16 %v11997_v19, %v11996_v18  ;;  %v12020_v18 = vld [vmem:[%s16208_s2 + $0x9] ss:$0 sm:$0xff] }
0x26f6   :  { %v5827_v41 = vadd.f32 %v5819_v39, %v5631_v23 }
0x26f7   :  { %v5836_v42 = vsel %vm73_vm0, %v5828_v40, 0.0 }
0x26f8   :  { %5837 = vadd.xlane.f32.xlu1 %v5836_v42  ;;  %v5833_v43 = vsel %vm73_vm0, %v5827_v41, 0.0 }
0x26f9   :  { %5834 = vadd.xlane.f32.xlu0 %v5833_v43 }
0x2785   :  { %v5838_v44 = vpop.xlane.xlu1 %5837 }
0x2786   :  { %v5840_v45 = vmul.f32 0.03125, %v5838_v44  ;;  %v5835_v46 = vpop.xlane.xlu0 %5834 }
0x2787   :  { %v5839_v47 = vmul.f32 0.03125, %v5835_v46 }
0x2788   :  { %v5842_v48 = vsub.f32 %v5828_v40, %v5840_v45 }
0x2789   :  { %v5841_v49 = vsub.f32 %v5827_v41, %v5839_v47 }
0x278a   :  { %v5844_v50 = vmul.f32 %v5842_v48, %v5842_v48 }
0x278b   :  { %v5843_v51 = vmul.f32 %v5841_v49, %v5841_v49 }
0x278c   :  { %v5848_v12 = vsel %vm73_vm0, %v5844_v50, 0.0  ;;  %v12015_v50 = vld [vmem:[%s16207_s1 + $0x120] sm:$0xff] }
0x278d   :  { %5849 = vadd.xlane.f32.xlu1 %v5848_v12  ;;  %v5845_v5 = vsel %vm73_vm0, %v5843_v51, 0.0  ;;  %v12016_v51 = vld [vmem:[%s16207_s1 + $0x128] sm:$0xff] }
0x278e   :  { %5846 = vadd.xlane.f32.xlu0 %v5845_v5  ;;  %v14116_v12 = vpack.c.bf16 %v12016_v51, %v12015_v50 }
0x281a   :  { %v5850_v1 = vpop.xlane.xlu1 %5849 }
0x281b   :  { %v5852_v2 = vmul.f32 0.03125, %v5850_v1  ;;  %v5847_v3 = vpop.xlane.xlu0 %5846  ;;  %v12023_v1 = vld [vmem:[%s16209_s3 + $0x120] sm:$0xff] }
0x281c   :  { %v5851_v4 = vmul.f32 0.03125, %v5847_v3 }
0x281d   :  { %v5854_v6 = vadd.f32 1e-05, %v5852_v2  ;;  %v12024_v2 = vld [vmem:[%s16209_s3 + $0x128] sm:$0xff] }
0x281e   :  { %v5853_v7 = vadd.f32 1e-05, %v5851_v4  ;;  %v14124_v3 = vpack.c.bf16 %v12024_v2, %v12023_v1 }
0x281f   :  { %14445 = vrsqrt.f32 %v5854_v6  ;;  %v12025_v6 = vld [vmem:[%s16209_s3 + $0x130] sm:$0xff] }
0x2820   :  { %14447 = vrsqrt.f32 %v5853_v7  ;;  %v12026_v7 = vld [vmem:[%s16209_s3 + $0x138] sm:$0xff] }
0x2829   :  { %v14446_v8 = vpop.eup %14445 }
0x282a   :  { %v14448_v10 = vpop.eup %14447  ;;  %v5858_v11 = vmul.f32 %v14446_v8, %v5842_v48 }
0x282b   :  { %v5857_v13 = vmul.f32 %v14448_v10, %v5841_v49 }
0x282c   :  { %v5866_v16 = vmul.f32 %v11982_v9, %v5858_v11 }
0x282d   :  { %v5865_v17 = vmul.f32 %v11982_v9, %v5857_v13  ;;  %v14128_v9 = vpack.c.bf16 %v12026_v7, %v12025_v6 }
0x282e   :  { %v15457_v23 = vadd.f32 %v11983_v15, %v5866_v16 }
0x282f   :  { %v15455_v22 = vadd.f32 %v11983_v15, %v5865_v17 }
0x2831   :  { %13336 = vmatprep.mubr.msk.f32.mxu1 %vm73_vm0, %v15455_v22  ;;  %13358 = vmatprep.mubr.msk.f32.mxu0 %vm73_vm0, %v15455_v22 }
0x2832   :  { %13337 = vmatmul.mubr.msk.f32.vlgmr.msra.gmra.mrb[64].mxu1 %vm73_vm0, %v15457_v23  ;;  %13359 = vmatmul.mubr.msk.f32.vlgmr.msra.gmra.mrb[60].mxu0 %vm73_vm0, %v15457_v23 }
0x2833   :  { %14103 = vmatpush3.bf16.msra.mxu1 %v14100_v0  ;;  %13347 = vmatprep.mubr.msk.f32.mxu1 %vm73_vm0, %v15455_v22  ;;  %v12012_v0 = vld [vmem:[%s16211_s5 + $0x40] sm:$0xff] }
0x2834   :  { %14105 = vmatprep.subr.bf16.mxu1 %v14104_v24  ;;  %13373 = vmatprep.mubr.msk.f32.mxu0 %vm14554_vm1, %v14553_v14 }
0x2837   :  { %14107 = vmatpush3.bf16.msra.mxu1 %v14104_v24 }
0x2838   :  { %13361 = vmatprep.subr.mxu1 %v14553_v14 }
0x283a   :  { %13348 = vmatmul.mubr.msk.f32.vlgmr.msra.gmra.mrb[66].mxu1 %vm73_vm0, %v15457_v23 }
0x283b   :  { %13363 = vmatprep.mubr.msk.f32.mxu1 %vm14554_vm1, %v14553_v14 }
0x2905   :  { %v13338_v25 = vpop.f32.mrb[64].mxu1  ;;  %v13360_v26 = vpop.f32.mrb[60].mxu0 }
0x2906   :  { %v5970_v27 = vpop.f32.mrb[65].mxu1  ;;  %v6130_v28 = vpop.f32.mrb[61].mxu0  ;;  %v5976_v33 = vadd.f32 %v13338_v25, %v11991_v29 }
0x2907   :  { %13372 = vmatpush3.msra.mxu0 %v6130_v28  ;;  %v5971_v32 = vadd.f32 %v11991_v29, %v5970_v27 }
0x2908   :  { %13381 = vmatprep.subr.mxu0 %v12012_v0 }
0x290d   :  { %v13349_v30 = vpop.f32.mrb[66].mxu1 }
0x290e   :  { %v6050_v31 = vpop.f32.mrb[67].mxu1 }
0x290f   :  { %13362 = vmatpush3.xpose.msk.msra.mxu1 %vm313_vm2, %v6050_v31 }
0x2910   :  { %13366 = vmatprep.subr.mxu1 %v14553_v14 }
0x2912   :  { %13364 = vmatmul.mubr.msk.f32.vlgmr.msra.gmra.mrb[68].mxu1 %vm313_vm2, %v5971_v32 }
0x2913   :  { %13367 = vmatpush3.xpose.msk.msra.mxu1 %vm313_vm2, %v13349_v30  ;;  %13368 = vmatprep.mubr.msk.f32.mxu1 %vm14554_vm1, %v14553_v14 }
0x2914   :  { %13376 = vmatprep.subr.mxu1 %v14553_v14 }
0x2916   :  { %13369 = vmatmul.mubr.msk.f32.vlgmr.msra.gmra.mrb[70].mxu1 %vm313_vm2, %v5976_v33 }
0x2917   :  { %13377 = vmatpush3.msra.mxu1 %v13360_v26  ;;  %13378 = vmatprep.mubr.msk.f32.mxu1 %vm14554_vm1, %v14553_v14 }
0x2918   :  { %14117 = vmatprep.subr.bf16.mxu1 %v14116_v12 }
0x29e5   :  { %v6211_v34 = vpop.f32.mrb[68].mxu1 }
0x29e6   :  { %v13365_v35 = vpop.f32.mrb[69].mxu1  ;;  %v6291_v36 = vsel %vm313_vm2, %v6211_v34, -inf }
0x29e7   :  { %6292 = vmax.xlane.f32.xlu0 %v6291_v36 }
0x29e9   :  { %v6287_v37 = vpop.f32.mrb[70].mxu1 }
0x29ea   :  { %v13370_v38 = vpop.f32.mrb[71].mxu1  ;;  %v6294_v39 = vsel %vm313_vm2, %v6287_v37, -inf }
0x29eb   :  { %6295 = vmax.xlane.f32.xlu1 %v6294_v39 }
0x2a74   :  { %v6293_v40 = vpop.xlane.xlu0 %6292 }
0x2a75   :  { %v6297_v41 = vsub.f32 %v6211_v34, %v6293_v40 }
0x2a77   :  { %v6299_v42 = vmul.f32 1.442695, %v6297_v41 }
0x2a78   :  { %v6296_v43 = vpop.xlane.xlu1 %6295 }
0x2a79   :  { %14449 = vpow2.f32 %v6299_v42  ;;  %v6298_v44 = vsub.f32 %v6287_v37, %v6296_v43  ;;  %v12044_v43 = vld [vmem:[%s16207_s1 + $0x140] sm:$0xff] }
0x2a7b   :  { %v6301_v45 = vmul.f32 1.442695, %v6298_v44  ;;  %v12045_v44 = vld [vmem:[%s16207_s1 + $0x148] sm:$0xff] }
0x2a7d   :  { %14451 = vpow2.f32 %v6301_v45  ;;  %v14140_v45 = vpack.c.bf16 %v12045_v44, %v12044_v43  ;;  %v12076_v43 = vld [vmem:[%s16207_s1 + $0x178] sm:$0xff] }
0x2a83   :  { %v14450_v46 = vpop.eup %14449 }
0x2a84   :  { %v6303_v47 = vsel %vm313_vm2, %v14450_v46, 0.0 }
0x2a85   :  { %6304 = vadd.xlane.f32.xlu0 %v6303_v47 }
0x2a87   :  { %v14452_v48 = vpop.eup %14451 }
0x2a88   :  { %v6306_v49 = vsel %vm313_vm2, %v14452_v48, 0.0 }
0x2a89   :  { %6307 = vadd.xlane.f32.xlu1 %v6306_v49  ;;  %v12047_v49 = vld [vmem:[%s16207_s1 + $0x158] sm:$0xff] }
0x2b12   :  { %v6305_v5 = vpop.xlane.xlu0 %6304 }
0x2b13   :  { %14453 = vrcp.f32 %v6305_v5  ;;  %v12058_v5 = vld [vmem:[%s16210_s4 + $0x140] sm:$0xff] }
0x2b16   :  { %v6308_v21 = vpop.xlane.xlu1 %6307 }
0x2b17   :  { %14455 = vrcp.f32 %v6308_v21  ;;  %v12059_v21 = vld [vmem:[%s16210_s4 + $0x148] sm:$0xff] }
0x2b18   :  { %v14156_v53 = vpack.c.bf16 %v12059_v21, %v12058_v5  ;;  %v12090_v5 = vld [vmem:[%s16210_s4 + $0x178] sm:$0xff] }
0x2b1d   :  { %v14454_v52 = vpop.eup %14453 }
0x2b1e   :  { %v6310_v20 = vmul.f32 %v14454_v52, %v14450_v46 }
0x2b20   :  { %13374 = vmatmul.mubr.msk.f32.vlgmr.msra.gmra.mrb[62].mxu0 %vm313_vm2, %v6310_v20 }
0x2b21   :  { %v14456_v55 = vpop.eup %14455  ;;  %13382 = vmatpush3.msra.mxu0 %v12012_v0 }
0x2b22   :  { %v6312_v56 = vmul.f32 %v14456_v55, %v14452_v48  ;;  %14125 = vmatprep.subr.bf16.mxu0 %v14124_v3  ;;  %v12046_v48 = vld [vmem:[%s16207_s1 + $0x150] sm:$0xff]  ;;  %v12061_v55 = vld [vmem:[%s16210_s4 + $0x158] sm:$0xff] }
0x2b24   :  { %13379 = vmatmul.mubr.msk.f32.vlgmr.msra.gmra.mrb[72].mxu1 %vm313_vm2, %v6312_v56  ;;  %v14160_v56 = vpack.c.bf16 %v12061_v55, %v12060_v54  ;;  %v12083_v54 = vld [vmem:[%s16209_s3 + $0x170] sm:$0xff]  ;;  %v12084_v55 = vld [vmem:[%s16209_s3 + $0x178] sm:$0xff] }
0x2b25   :  { %14119 = vmatpush3.bf16.msra.mxu1 %v14116_v12  ;;  %13394 = vmatprep.mubr.msk.f32.mxu1 %vm73_vm0, %v15455_v22  ;;  %v14144_v12 = vpack.c.bf16 %v12047_v49, %v12046_v48  ;;  %v12087_v49 = vld [vmem:[%s16210_s4 + $0x160] sm:$0xff] }
0x2b26   :  { %14121 = vmatprep.subr.bf16.mxu1 %v14120_v57 }
0x2b29   :  { %14123 = vmatpush3.bf16.msra.mxu1 %v14120_v57  ;;  %v12041_v57 = vld [vmem:[%s16211_s5 + $0x48] sm:$0xff] }
0x2b2a   :  { %14133 = vmatprep.subr.bf16.mxu1 %v14132_v60 }
0x2b2c   :  { %13395 = vmatmul.mubr.msk.f32.vlgmr.msra.gmra.mrb[74].mxu1 %vm73_vm0, %v15457_v23 }
0x2b2d   :  { %14135 = vmatpush3.bf16.msra.mxu1 %v14132_v60  ;;  %13416 = vmatprep.mubr.msk.f32.mxu1 %vm73_vm0, %v15455_v22  ;;  %v14148_v60 = vpack.c.bf16 %v12053_v59, %v12052_v58  ;;  %v14176_v59 = vpack.c.bf16 %v12084_v55, %v12083_v54  ;;  %v12107_v54 = vld [vmem:[%s16215_s9 + $0x48] sm:$0xff] }
0x2b2e   :  { %14137 = vmatprep.subr.bf16.mxu1 %v14136_v63 }
0x2b31   :  { %14139 = vmatpush3.bf16.msra.mxu1 %v14136_v63  ;;  %v12055_v63 = vld [vmem:[%s16209_s3 + $0x158] sm:$0xff] }
0x2b32   :  { %13429 = vmatprep.subr.mxu1 %v14553_v14  ;;  %v14152_v1 = vpack.c.bf16 %v12055_v63, %v12054_v62 }
0x2b34   :  { %13417 = vmatmul.mubr.msk.f32.vlgmr.msra.gmra.mrb[76].mxu1 %vm73_vm0, %v15457_v23 }
0x2b35   :  { %13431 = vmatprep.mubr.msk.f32.mxu1 %vm14554_vm1, %v14553_v14 }
0x2bf3   :  { %v6382_v4 = vpop.f32.mrb[62].mxu0 }
0x2bf4   :  { %v13375_v8 = vpop.f32.mrb[63].mxu0  ;;  %13383 = vmatprep.mubr.msk.f32.mxu0 %vm313_vm2, %v6382_v4 }
0x2bf7   :  { %v6455_v10 = vpop.f32.mrb[72].mxu1 }
0x2bf8   :  { %v13380_v11 = vpop.f32.mrb[73].mxu1  ;;  %13384 = vmatmul.mubr.msk.f32.vlgmr.msra.gmra.mrb[64].mxu0 %vm313_vm2, %v6455_v10 }
0x2bf9   :  { %14127 = vmatpush3.bf16.msra.mxu0 %v14124_v3  ;;  %13405 = vmatprep.mubr.msk.f32.mxu0 %vm73_vm0, %v15455_v22 }
0x2bfa   :  { %14129 = vmatprep.subr.bf16.mxu0 %v14128_v9 }
0x2bfd   :  { %14131 = vmatpush3.bf16.msra.mxu0 %v14128_v9  ;;  %v12049_v9 = vld [vmem:[%s16208_s2 + $0xa] ss:$0 sm:$0xff] }
0x2bfe   :  { %13419 = vmatprep.subr.mxu0 %v14553_v14 }
0x2bff   :  { %v13396_v13 = vpop.f32.mrb[74].mxu1 }
0x2c00   :  { %v6623_v15 = vpop.f32.mrb[75].mxu1  ;;  %13406 = vmatmul.mubr.msk.f32.vlgmr.msra.gmra.mrb[66].mxu0 %vm73_vm0, %v15457_v23  ;;  %v6629_v26 = vadd.f32 %v13396_v13, %v12020_v18 }
0x2c01   :  { %13421 = vmatprep.mubr.msk.f32.mxu0 %vm14554_vm1, %v14553_v14  ;;  %v6624_v25 = vadd.f32 %v12020_v18, %v6623_v15 }
0x2c07   :  { %v13418_v16 = vpop.f32.mrb[76].mxu1 }
0x2c08   :  { %v6783_v17 = vpop.f32.mrb[77].mxu1 }
0x2c09   :  { %13430 = vmatpush3.msra.mxu1 %v6783_v17 }
0x2c0a   :  { %14141 = vmatprep.subr.bf16.mxu1 %v14140_v45 }
0x2cd3   :  { %v13407_v19 = vpop.f32.mrb[66].mxu0 }
0x2cd4   :  { %v6703_v24 = vpop.f32.mrb[67].mxu0 }
0x2cd5   :  { %13420 = vmatpush3.xpose.msk.msra.mxu0 %vm313_vm2, %v6703_v24 }
0x2cd6   :  { %13424 = vmatprep.subr.mxu0 %v14553_v14 }
0x2cd8   :  { %13422 = vmatmul.mubr.msk.f32.vlgmr.msra.gmra.mrb[68].mxu0 %vm313_vm2, %v6624_v25 }
0x2cd9   :  { %13425 = vmatpush3.xpose.msk.msra.mxu0 %vm313_vm2, %v13407_v19  ;;  %13426 = vmatprep.mubr.msk.f32.mxu0 %vm14554_vm1, %v14553_v14 }
0x2cda   :  { %13434 = vmatprep.subr.mxu0 %v14553_v14 }
0x2cdc   :  { %13427 = vmatmul.mubr.msk.f32.vlgmr.msra.gmra.mrb[70].mxu0 %vm313_vm2, %v6629_v26 }
0x2cdd   :  { %13435 = vmatpush3.msra.mxu0 %v13418_v16  ;;  %13436 = vmatprep.mubr.msk.f32.mxu0 %vm14554_vm1, %v14553_v14 }
0x2cde   :  { %13439 = vmatprep.subr.mxu0 %v12041_v57 }
0x2dab   :  { %v6864_v27 = vpop.f32.mrb[68].mxu0 }
0x2dac   :  { %v13423_v28 = vpop.f32.mrb[69].mxu0  ;;  %v6944_v29 = vsel %vm313_vm2, %v6864_v27, -inf }
0x2dad   :  { %6945 = vmax.xlane.f32.xlu0 %v6944_v29 }
0x2daf   :  { %v6940_v30 = vpop.f32.mrb[70].mxu0 }
0x2db0   :  { %v13428_v31 = vpop.f32.mrb[71].mxu0  ;;  %v6947_v32 = vsel %vm313_vm2, %v6940_v30, -inf }
0x2db1   :  { %6948 = vmax.xlane.f32.xlu1 %v6947_v32 }
0x2e3a   :  { %v6946_v33 = vpop.xlane.xlu0 %6945 }
0x2e3b   :  { %v6950_v34 = vsub.f32 %v6864_v27, %v6946_v33 }
0x2e3d   :  { %v6952_v35 = vmul.f32 1.442695, %v6950_v34 }
0x2e3e   :  { %v6949_v36 = vpop.xlane.xlu1 %6948 }
0x2e3f   :  { %14457 = vpow2.f32 %v6952_v35  ;;  %v6951_v37 = vsub.f32 %v6940_v30, %v6949_v36  ;;  %v12073_v36 = vld [vmem:[%s16207_s1 + $0x160] sm:$0xff] }
0x2e41   :  { %v6954_v38 = vmul.f32 1.442695, %v6951_v37  ;;  %v12074_v37 = vld [vmem:[%s16207_s1 + $0x168] sm:$0xff] }
0x2e43   :  { %14459 = vpow2.f32 %v6954_v38  ;;  %v14164_v38 = vpack.c.bf16 %v12074_v37, %v12073_v36 }
0x2e49   :  { %v14458_v39 = vpop.eup %14457 }
0x2e4a   :  { %v6956_v40 = vsel %vm313_vm2, %v14458_v39, 0.0 }
0x2e4b   :  { %6957 = vadd.xlane.f32.xlu0 %v6956_v40 }
0x2e4d   :  { %v14460_v41 = vpop.eup %14459 }
0x2e4e   :  { %v6959_v42 = vsel %vm313_vm2, %v14460_v41, 0.0 }
0x2e4f   :  { %6960 = vadd.xlane.f32.xlu1 %v6959_v42  ;;  %v12075_v42 = vld [vmem:[%s16207_s1 + $0x170] sm:$0xff] }
0x2ed8   :  { %v6958_v46 = vpop.xlane.xlu0 %6957 }
0x2ed9   :  { %14461 = vrcp.f32 %v6958_v46 }
0x2edc   :  { %v6961_v47 = vpop.xlane.xlu1 %6960 }
0x2edd   :  { %14463 = vrcp.f32 %v6961_v47  ;;  %v14168_v47 = vpack.c.bf16 %v12076_v43, %v12075_v42 }
0x2ee3   :  { %v14462_v50 = vpop.eup %14461 }
0x2ee4   :  { %v6963_v51 = vmul.f32 %v14462_v50, %v14458_v39  ;;  %v12070_v39 = vld [vmem:[%s16211_s5 + $0x50] sm:$0xff]  ;;  %v12088_v50 = vld [vmem:[%s16210_s4 + $0x168] sm:$0xff] }
0x2ee6   :  { %13432 = vmatmul.mubr.msk.f32.vlgmr.msra.gmra.mrb[78].mxu1 %vm313_vm2, %v6963_v51  ;;  %v14180_v51 = vpack.c.bf16 %v12088_v50, %v12087_v49 }
0x2ee7   :  { %v14464_v52 = vpop.eup %14463  ;;  %14143 = vmatpush3.bf16.msra.mxu1 %v14140_v45  ;;  %13452 = vmatprep.mubr.msk.f32.mxu1 %vm73_vm0, %v15455_v22 }
0x2ee8   :  { %v6965_v20 = vmul.f32 %v14464_v52, %v14460_v41  ;;  %14145 = vmatprep.subr.bf16.mxu1 %v14144_v12  ;;  %v12081_v52 = vld [vmem:[%s16209_s3 + $0x160] sm:$0xff] }
0x2eea   :  { %13437 = vmatmul.mubr.msk.f32.vlgmr.msra.gmra.mrb[72].mxu0 %vm313_vm2, %v6965_v20  ;;  %v12082_v20 = vld [vmem:[%s16209_s3 + $0x168] sm:$0xff] }
0x2eeb   :  { %14147 = vmatpush3.bf16.msra.mxu1 %v14144_v12  ;;  %13440 = vmatpush3.msra.mxu0 %v12041_v57  ;;  %v12089_v12 = vld [vmem:[%s16210_s4 + $0x170] sm:$0xff] }
0x2eec   :  { %14157 = vmatprep.subr.bf16.mxu1 %v14156_v53  ;;  %14149 = vmatprep.subr.bf16.mxu0 %v14148_v60  ;;  %v14184_v21 = vpack.c.bf16 %v12090_v5, %v12089_v12 }
0x2eee   :  { %13453 = vmatmul.mubr.msk.f32.vlgmr.msra.gmra.mrb[80].mxu1 %vm73_vm0, %v15457_v23 }
0x2eef   :  { %14159 = vmatpush3.bf16.msra.mxu1 %v14156_v53  ;;  %13474 = vmatprep.mubr.msk.f32.mxu1 %vm73_vm0, %v15455_v22  ;;  %v14172_v53 = vpack.c.bf16 %v12082_v20, %v12081_v52 }
0x2ef0   :  { %14161 = vmatprep.subr.bf16.mxu1 %v14160_v56 }
0x2ef3   :  { %14163 = vmatpush3.bf16.msra.mxu1 %v14160_v56 }
0x2ef4   :  { %13482 = vmatprep.subr.mxu1 %v14553_v14 }
0x2ef6   :  { %13475 = vmatmul.mubr.msk.f32.vlgmr.msra.gmra.mrb[82].mxu1 %vm73_vm0, %v15457_v23 }
0x2ef7   :  { %13484 = vmatprep.mubr.msk.f32.mxu1 %vm14554_vm1, %v14553_v14 }
0x2fb9   :  { %v7035_v61 = vpop.f32.mrb[78].mxu1 }
0x2fba   :  { %v13433_v0 = vpop.f32.mrb[79].mxu1  ;;  %13441 = vmatprep.mubr.msk.f32.mxu0 %vm313_vm2, %v7035_v61 }
0x2fbd   :  { %v7108_v2 = vpop.f32.mrb[72].mxu0 }
0x2fbe   :  { %v13438_v3 = vpop.f32.mrb[73].mxu0  ;;  %13442 = vmatmul.mubr.msk.f32.vlgmr.msra.gmra.mrb[64].mxu0 %vm313_vm2, %v7108_v2 }
0x2fbf   :  { %14151 = vmatpush3.bf16.msra.mxu0 %v14148_v60  ;;  %13463 = vmatprep.mubr.msk.f32.mxu0 %vm73_vm0, %v15455_v22 }
0x2fc0   :  { %14153 = vmatprep.subr.bf16.mxu0 %v14152_v1 }
0x2fc1   :  { %v13454_v4 = vpop.f32.mrb[80].mxu1 }
0x2fc2   :  { %v7276_v6 = vpop.f32.mrb[81].mxu1  ;;  %v7282_v13 = vadd.f32 %v13454_v4, %v12049_v9 }
0x2fc3   :  { %14155 = vmatpush3.bf16.msra.mxu0 %v14152_v1  ;;  %v7277_v15 = vadd.f32 %v12049_v9, %v7276_v6  ;;  %v12078_v1 = vld [vmem:[%s16208_s2 + $0xb] ss:$0 sm:$0xff] }
0x2fc4   :  { %13477 = vmatprep.subr.mxu0 %v14553_v14 }
0x2fc6   :  { %13464 = vmatmul.mubr.msk.f32.vlgmr.msra.gmra.mrb[74].mxu0 %vm73_vm0, %v15457_v23 }
0x2fc7   :  { %13479 = vmatprep.mubr.msk.f32.mxu0 %vm14554_vm1, %v14553_v14 }
0x2fc9   :  { %v13476_v7 = vpop.f32.mrb[82].mxu1 }
0x2fca   :  { %v7436_v8 = vpop.f32.mrb[83].mxu1 }
0x3099   :  { %v13465_v10 = vpop.f32.mrb[74].mxu0 }
0x309a   :  { %v7356_v11 = vpop.f32.mrb[75].mxu0  ;;  %13483 = vmatpush3.xpose.msk.msra.mxu1 %vm313_vm2, %v13465_v10 }
0x309b   :  { %13478 = vmatpush3.xpose.msk.msra.mxu0 %vm313_vm2, %v7356_v11  ;;  %13492 = vmatprep.subr.mxu1 %v14553_v14 }
0x309c   :  { %13487 = vmatprep.subr.mxu0 %v14553_v14 }
0x309d   :  { %13485 = vmatmul.mubr.msk.f32.vlgmr.msra.gmra.mrb[84].mxu1 %vm313_vm2, %v7282_v13 }
0x309e   :  { %13480 = vmatmul.mubr.msk.f32.vlgmr.msra.gmra.mrb[76].mxu0 %vm313_vm2, %v7277_v15  ;;  %13493 = vmatpush3.msra.mxu1 %v13476_v7 }
0x309f   :  { %13488 = vmatpush3.msra.mxu0 %v7436_v8  ;;  %13494 = vmatprep.mubr.msk.f32.mxu1 %vm14554_vm1, %v14553_v14 }
0x30a0   :  { %13489 = vmatprep.mubr.msk.f32.mxu0 %vm14554_vm1, %v14553_v14  ;;  %14165 = vmatprep.subr.bf16.mxu1 %v14164_v38 }
0x30a1   :  { %13497 = vmatprep.subr.mxu0 %v12070_v39 }
0x3170   :  { %v7593_v16 = vpop.f32.mrb[84].mxu1 }
0x3171   :  { %v7517_v17 = vpop.f32.mrb[76].mxu0  ;;  %v13486_v18 = vpop.f32.mrb[85].mxu1  ;;  %v7600_v19 = vsel %vm313_vm2, %v7593_v16, -inf }
0x3172   :  { %7601 = vmax.xlane.f32.xlu1 %v7600_v19  ;;  %v13481_v24 = vpop.f32.mrb[77].mxu0  ;;  %v7597_v25 = vsel %vm313_vm2, %v7517_v17, -inf }
0x3173   :  { %7598 = vmax.xlane.f32.xlu0 %v7597_v25 }
0x31ff   :  { %v7602_v26 = vpop.xlane.xlu1 %7601 }
0x3200   :  { %v7604_v27 = vsub.f32 %v7593_v16, %v7602_v26  ;;  %v7599_v28 = vpop.xlane.xlu0 %7598 }
0x3201   :  { %v7603_v29 = vsub.f32 %v7517_v17, %v7599_v28 }
0x3202   :  { %v7607_v30 = vmul.f32 1.442695, %v7604_v27 }
0x3203   :  { %v7605_v31 = vmul.f32 1.442695, %v7603_v29 }
0x3204   :  { %14465 = vpow2.f32 %v7607_v30 }
0x3205   :  { %14467 = vpow2.f32 %v7605_v31 }
0x320e   :  { %v14466_v32 = vpop.eup %14465 }
0x320f   :  { %v14468_v33 = vpop.eup %14467  ;;  %v7612_v34 = vsel %vm313_vm2, %v14466_v32, 0.0 }
0x3210   :  { %7613 = vadd.xlane.f32.xlu1 %v7612_v34  ;;  %v7609_v35 = vsel %vm313_vm2, %v14468_v33, 0.0 }
0x3211   :  { %7610 = vadd.xlane.f32.xlu0 %v7609_v35  ;;  %v12099_v35 = vld [vmem:[%s16211_s5 + $0x58] sm:$0xff] }
0x329d   :  { %v7614_v40 = vpop.xlane.xlu1 %7613 }
0x329e   :  { %14469 = vrcp.f32 %v7614_v40  ;;  %v7611_v41 = vpop.xlane.xlu0 %7610  ;;  %v11985_v40 = vld [vmem:[%s16212_s6 + $0x2] ss:$0 sm:$0xff] }
0x329f   :  { %14471 = vrcp.f32 %v7611_v41  ;;  %v5884_v41 = vadd.f32 %v11985_v40, %v15457_v23  ;;  %v5883_v43 = vadd.f32 %v11985_v40, %v15455_v22 }
0x32a8   :  { %v14470_v44 = vpop.eup %14469 }
0x32a9   :  { %v14472_v45 = vpop.eup %14471  ;;  %v7618_v46 = vmul.f32 %v14470_v44, %v14466_v32 }
0x32aa   :  { %v7616_v48 = vmul.f32 %v14472_v45, %v14468_v33 }
0x32ab   :  { %13495 = vmatmul.mubr.msk.f32.vlgmr.msra.gmra.mrb[86].mxu1 %vm313_vm2, %v7618_v46 }
0x32ac   :  { %14167 = vmatpush3.bf16.msra.mxu1 %v14164_v38  ;;  %13490 = vmatmul.mubr.msk.f32.vlgmr.msra.gmra.mrb[78].mxu0 %vm313_vm2, %v7616_v48 }
0x32ad   :  { %13510 = vmatprep.mubr.msk.f32.mxu1 %vm73_vm0, %v15455_v22  ;;  %14169 = vmatprep.subr.bf16.mxu1 %v14168_v47 }
0x32ae   :  { %13498 = vmatpush3.msra.mxu0 %v12070_v39 }
0x32af   :  { %14173 = vmatprep.subr.bf16.mxu0 %v14172_v53 }
0x32b0   :  { %14171 = vmatpush3.bf16.msra.mxu1 %v14168_v47 }
0x32b1   :  { %14181 = vmatprep.subr.bf16.mxu1 %v14180_v51 }
0x32b3   :  { %13511 = vmatmul.mubr.msk.f32.vlgmr.msra.gmra.mrb[88].mxu1 %vm73_vm0, %v15457_v23 }
0x32b4   :  { %14183 = vmatpush3.bf16.msra.mxu1 %v14180_v51  ;;  %13532 = vmatprep.mubr.msk.f32.mxu1 %vm73_vm0, %v15455_v22 }
0x32b5   :  { %14185 = vmatprep.subr.bf16.mxu1 %v14184_v21 }
0x32b8   :  { %14187 = vmatpush3.bf16.msra.mxu1 %v14184_v21 }
0x32b9   :  { %13545 = vmatprep.subr.mxu1 %v14553_v14 }
0x32bb   :  { %13533 = vmatmul.mubr.msk.f32.vlgmr.msra.gmra.mrb[90].mxu1 %vm73_vm0, %v15457_v23 }
0x32bc   :  { %13547 = vmatprep.mubr.msk.f32.mxu1 %vm14554_vm1, %v14553_v14 }
0x337e   :  { %v7761_v56 = vpop.f32.mrb[86].mxu1 }
0x337f   :  { %v7688_v57 = vpop.f32.mrb[78].mxu0  ;;  %v13496_v58 = vpop.f32.mrb[87].mxu1 }
0x3380   :  { %v13491_v60 = vpop.f32.mrb[79].mxu0  ;;  %13499 = vmatprep.mubr.msk.f32.mxu0 %vm313_vm2, %v7688_v57  ;;  %v12109_v57 = vld [vmem:[%s16215_s9 + $0x58] sm:$0xff] }
0x3381   :  { %13500 = vmatmul.mubr.msk.f32.vlgmr.msra.gmra.mrb[64].mxu0 %vm313_vm2, %v7761_v56  ;;  %v12108_v56 = vld [vmem:[%s16215_s9 + $0x50] sm:$0xff]  ;;  %v12115_v60 = vld [vmem:[%s16217_s11 + $0x88] sm:$0xff] }
0x3382   :  { %14175 = vmatpush3.bf16.msra.mxu0 %v14172_v53  ;;  %13521 = vmatprep.mubr.msk.f32.mxu0 %vm73_vm0, %v15455_v22  ;;  %v12106_v53 = vld [vmem:[%s16215_s9 + $0x40] sm:$0xff]  ;;  %v14192_v58 = vpack.c.bf16 %v12109_v57, %v12108_v56  ;;  %v12134_v56 = vld [vmem:[%s16207_s1 + $0x190] sm:$0xff]  ;;  %v12135_v57 = vld [vmem:[%s16207_s1 + $0x198] sm:$0xff] }
0x3383   :  { %14177 = vmatprep.subr.bf16.mxu0 %v14176_v59  ;;  %v14188_v55 = vpack.c.bf16 %v12107_v54, %v12106_v53  ;;  %v12146_v53 = vld [vmem:[%s16210_s4 + $0x180] sm:$0xff]  ;;  %v12147_v54 = vld [vmem:[%s16210_s4 + $0x188] sm:$0xff] }
0x3386   :  { %v13512_v61 = vpop.f32.mrb[88].mxu1  ;;  %14179 = vmatpush3.bf16.msra.mxu0 %v14176_v59  ;;  %v12114_v59 = vld [vmem:[%s16217_s11 + $0x80] sm:$0xff] }
0x3387   :  { %v7929_v62 = vpop.f32.mrb[89].mxu1  ;;  %13535 = vmatprep.subr.mxu0 %v14553_v14  ;;  %v7935_v6 = vadd.f32 %v13512_v61, %v12078_v1  ;;  %v12116_v61 = vld [vmem:[%s16217_s11 + $0x90] sm:$0xff] }
0x3388   :  { %v7930_v4 = vadd.f32 %v12078_v1, %v7929_v62  ;;  %v14196_v62 = vpack.c.bf16 %v12115_v60, %v12114_v59  ;;  %v12118_v1 = vld [vmem:[%s16217_s11 + $0xa0] sm:$0xff]  ;;  %v12148_v59 = vld [vmem:[%s16210_s4 + $0x190] sm:$0xff]  ;;  %v12149_v60 = vld [vmem:[%s16210_s4 + $0x198] sm:$0xff] }
0x3389   :  { %13522 = vmatmul.mubr.msk.f32.vlgmr.msra.gmra.mrb[80].mxu0 %vm73_vm0, %v15457_v23 }
0x338a   :  { %13537 = vmatprep.mubr.msk.f32.mxu0 %vm14554_vm1, %v14553_v14 }
0x338e   :  { %v13534_v63 = vpop.f32.mrb[90].mxu1 }
0x338f   :  { %v8089_v0 = vpop.f32.mrb[91].mxu1 }
0x3390   :  { %13546 = vmatpush3.msra.mxu1 %v8089_v0 }
0x3391   :  { %14189 = vmatprep.subr.bf16.mxu1 %v14188_v55 }
0x345c   :  { %v13523_v2 = vpop.f32.mrb[80].mxu0 }
0x345d   :  { %v8009_v3 = vpop.f32.mrb[81].mxu0 }
0x345e   :  { %13536 = vmatpush3.xpose.msk.msra.mxu0 %vm313_vm2, %v8009_v3 }
0x345f   :  { %13540 = vmatprep.subr.mxu0 %v14553_v14 }
0x3461   :  { %13538 = vmatmul.mubr.msk.f32.vlgmr.msra.gmra.mrb[82].mxu0 %vm313_vm2, %v7930_v4 }
0x3462   :  { %13541 = vmatpush3.xpose.msk.msra.mxu0 %vm313_vm2, %v13523_v2  ;;  %13542 = vmatprep.mubr.msk.f32.mxu0 %vm14554_vm1, %v14553_v14  ;;  %v12119_v2 = vld [vmem:[%s16217_s11 + $0xa8] sm:$0xff] }
0x3463   :  { %13550 = vmatprep.subr.mxu0 %v14553_v14  ;;  %v14204_v3 = vpack.c.bf16 %v12119_v2, %v12118_v1 }
0x3465   :  { %13543 = vmatmul.mubr.msk.f32.vlgmr.msra.gmra.mrb[84].mxu0 %vm313_vm2, %v7935_v6 }
0x3466   :  { %13551 = vmatpush3.msra.mxu0 %v13534_v63  ;;  %13552 = vmatprep.mubr.msk.f32.mxu0 %vm14554_vm1, %v14553_v14  ;;  %v12117_v63 = vld [vmem:[%s16217_s11 + $0x98] sm:$0xff] }
0x3467   :  { %13555 = vmatprep.subr.mxu0 %v12099_v35  ;;  %v14200_v0 = vpack.c.bf16 %v12117_v63, %v12116_v61  ;;  %v14232_v61 = vpack.c.bf16 %v12149_v60, %v12148_v59  ;;  %v12141_v63 = vld [vmem:[%s16209_s3 + $0x188] sm:$0xff] }
0x3468   :  { %v12176_v59 = vld [vmem:[%s16210_s4 + $0x1a8] sm:$0xff] }
0x3534   :  { %v8170_v7 = vpop.f32.mrb[82].mxu0 }
0x3535   :  { %v13539_v8 = vpop.f32.mrb[83].mxu0  ;;  %v8250_v9 = vsel %vm313_vm2, %v8170_v7, -inf }
0x3536   :  { %8251 = vmax.xlane.f32.xlu0 %v8250_v9 }
0x3538   :  { %v8246_v10 = vpop.f32.mrb[84].mxu0 }
0x3539   :  { %v13544_v11 = vpop.f32.mrb[85].mxu0  ;;  %v8253_v13 = vsel %vm313_vm2, %v8246_v10, -inf }
0x353a   :  { %8254 = vmax.xlane.f32.xlu1 %v8253_v13  ;;  %v12104_v13 = vld [vmem:[%s16213_s7 + $0x2] ss:$0 sm:$0xff] }
0x35c3   :  { %v8252_v15 = vpop.xlane.xlu0 %8251 }
0x35c4   :  { %v8256_v16 = vsub.f32 %v8170_v7, %v8252_v15 }
0x35c6   :  { %v8258_v17 = vmul.f32 1.442695, %v8256_v16 }
0x35c7   :  { %v8255_v18 = vpop.xlane.xlu1 %8254 }
0x35c8   :  { %14473 = vpow2.f32 %v8258_v17  ;;  %v8257_v19 = vsub.f32 %v8246_v10, %v8255_v18  ;;  %v12105_v18 = vld [vmem:[%s16214_s8 + $0x2] ss:$0 sm:$0xff] }
0x35ca   :  { %v8260_v24 = vmul.f32 1.442695, %v8257_v19 }
0x35cc   :  { %14475 = vpow2.f32 %v8260_v24 }
0x35d2   :  { %v14474_v25 = vpop.eup %14473 }
0x35d3   :  { %v8262_v26 = vsel %vm313_vm2, %v14474_v25, 0.0 }
0x35d4   :  { %8263 = vadd.xlane.f32.xlu0 %v8262_v26 }
0x35d6   :  { %v14476_v27 = vpop.eup %14475 }
0x35d7   :  { %v8265_v28 = vsel %vm313_vm2, %v14476_v27, 0.0 }
0x35d8   :  { %8266 = vadd.xlane.f32.xlu1 %v8265_v28  ;;  %v12121_v28 = vld [vmem:[%s16217_s11 + $0xb8] sm:$0xff] }
0x3661   :  { %v8264_v29 = vpop.xlane.xlu0 %8263 }
0x3662   :  { %14477 = vrcp.f32 %v8264_v29 }
0x3665   :  { %v8267_v30 = vpop.xlane.xlu1 %8266 }
0x3666   :  { %14479 = vrcp.f32 %v8267_v30  ;;  %v12111_v30 = vld [vmem:[%s16216_s10 + $0x2] ss:$0 sm:$0xff] }
0x366c   :  { %v14478_v31 = vpop.eup %14477 }
0x366d   :  { %v8269_v32 = vmul.f32 %v14478_v31, %v14474_v25 }
0x366f   :  { %13548 = vmatmul.mubr.msk.f32.vlgmr.msra.gmra.mrb[92].mxu1 %vm313_vm2, %v8269_v32 }
0x3670   :  { %v14480_v33 = vpop.eup %14479  ;;  %14191 = vmatpush3.bf16.msra.mxu1 %v14188_v55  ;;  %v14228_v55 = vpack.c.bf16 %v12147_v54, %v12146_v53  ;;  %v12163_v53 = vld [vmem:[%s16207_s1 + $0x1b0] sm:$0xff]  ;;  %v12164_v54 = vld [vmem:[%s16207_s1 + $0x1b8] sm:$0xff] }
0x3671   :  { %v8271_v34 = vmul.f32 %v14480_v33, %v14476_v27  ;;  %14193 = vmatprep.subr.bf16.mxu1 %v14192_v58  ;;  %v12120_v27 = vld [vmem:[%s16217_s11 + $0xb0] sm:$0xff] }
0x3672   :  { %v14208_v29 = vpack.c.bf16 %v12121_v28, %v12120_v27 }
0x3673   :  { %13553 = vmatmul.mubr.msk.f32.vlgmr.msra.gmra.mrb[86].mxu0 %vm313_vm2, %v8271_v34 }
0x3674   :  { %13556 = vmatpush3.msra.mxu0 %v12099_v35  ;;  %14195 = vmatpush3.bf16.msra.mxu1 %v14192_v58  ;;  %v14216_v58 = vpack.c.bf16 %v12135_v57, %v12134_v56  ;;  %v14240_v57 = vpack.c.bf16 %v12164_v54, %v12163_v53  ;;  %v12206_v54 = vld [vmem:[%s16210_s4 + $0x1d0] sm:$0xff] }
0x3675   :  { %14197 = vmatprep.subr.bf16.mxu0 %v14196_v62 }
0x3742   :  { %v8341_v36 = vpop.f32.mrb[92].mxu1 }
0x3743   :  { %v13549_v37 = vpop.f32.mrb[93].mxu1  ;;  %13557 = vmatprep.mubr.msk.f32.mxu0 %vm313_vm2, %v8341_v36 }
0x3744   :  { %v12123_v37 = vld [vmem:[%s16218_s12 + $0x2] ss:$0 sm:$0xff] }
0x3746   :  { %v8414_v38 = vpop.f32.mrb[86].mxu0 }
0x3747   :  { %v13554_v39 = vpop.f32.mrb[87].mxu0  ;;  %13558 = vmatmul.mubr.msk.f32.vlgmr.msra.gmra.mrb[64].mxu0 %vm313_vm2, %v8414_v38 }
0x3748   :  { %14199 = vmatpush3.bf16.msra.mxu0 %v14196_v62  ;;  %v12140_v62 = vld [vmem:[%s16209_s3 + $0x180] sm:$0xff] }
0x3749   :  { %14201 = vmatprep.subr.bf16.mxu0 %v14200_v0 }
0x374c   :  { %14203 = vmatpush3.bf16.msra.mxu0 %v14200_v0  ;;  %v14220_v0 = vpack.c.bf16 %v12141_v63, %v12140_v62  ;;  %v12178_v62 = vld [vmem:[%s16210_s4 + $0x1b8] sm:$0xff] }
0x374d   :  { %14205 = vmatprep.subr.bf16.mxu0 %v14204_v3 }
0x3750   :  { %14207 = vmatpush3.bf16.msra.mxu0 %v14204_v3 }
0x3751   :  { %14209 = vmatprep.subr.bf16.mxu0 %v14208_v29 }
0x3754   :  { %14211 = vmatpush3.bf16.msra.mxu0 %v14208_v29 }
0x3755   :  { %14229 = vmatprep.subr.bf16.mxu0 %v14228_v55 }
0x381a   :  { %v13559_v42 = vpop.f32.mrb[64].mxu0 }
0x381b   :  { %v14336_v44 = vadd.f32 %v13559_v42, %v5884_v41  ;;  %v8492_v45 = vpop.f32.mrb[65].mxu0 }
0x381c   :  { %v14337_v46 = vadd.f32 %v8492_v45, %v5883_v43 }
0x381d   :  { %v8510_v47 = vsel %vm73_vm0, %v14336_v44, 0.0 }
0x381e   :  { %8511 = vadd.xlane.f32.xlu1 %v8510_v47  ;;  %v8507_v48 = vsel %vm73_vm0, %v14337_v46, 0.0 }
0x381f   :  { %8508 = vadd.xlane.f32.xlu0 %v8507_v48 }
0x38ab   :  { %v8512_v49 = vpop.xlane.xlu1 %8511 }
0x38ac   :  { %v8514_v50 = vmul.f32 0.03125, %v8512_v49  ;;  %v8509_v51 = vpop.xlane.xlu0 %8508 }
0x38ad   :  { %v8513_v12 = vmul.f32 0.03125, %v8509_v51 }
0x38ae   :  { %v8516_v5 = vsub.f32 %v14336_v44, %v8514_v50 }
0x38af   :  { %v8515_v21 = vsub.f32 %v14337_v46, %v8513_v12 }
0x38b0   :  { %v8518_v52 = vmul.f32 %v8516_v5, %v8516_v5 }
0x38b1   :  { %v8517_v23 = vmul.f32 %v8515_v21, %v8515_v21 }
0x38b2   :  { %v8522_v20 = vsel %vm73_vm0, %v8518_v52, 0.0 }
0x38b3   :  { %8523 = vadd.xlane.f32.xlu1 %v8522_v20  ;;  %v8519_v22 = vsel %vm73_vm0, %v8517_v23, 0.0  ;;  %v12132_v23 = vld [vmem:[%s16207_s1 + $0x180] sm:$0xff]  ;;  %v12133_v20 = vld [vmem:[%s16207_s1 + $0x188] sm:$0xff] }
0x38b4   :  { %8520 = vadd.xlane.f32.xlu0 %v8519_v22  ;;  %v14212_v22 = vpack.c.bf16 %v12133_v20, %v12132_v23 }
0x38b6   :  { %14213 = vmatprep.subr.bf16.mxu1 %v14212_v22 }
0x3940   :  { %v8524_v4 = vpop.xlane.xlu1 %8523 }
0x3941   :  { %v8526_v6 = vmul.f32 0.03125, %v8524_v4  ;;  %v8521_v7 = vpop.xlane.xlu0 %8520 }
0x3942   :  { %v8525_v8 = vmul.f32 0.03125, %v8521_v7 }
0x3943   :  { %v8528_v9 = vadd.f32 1e-05, %v8526_v6 }
0x3944   :  { %v8527_v10 = vadd.f32 1e-05, %v8525_v8 }
0x3945   :  { %14481 = vrsqrt.f32 %v8528_v9  ;;  %v12128_v9 = vld [vmem:[%s16219_s13 + $0x2] ss:$0 sm:$0xff] }
0x3946   :  { %14483 = vrsqrt.f32 %v8527_v10 }
0x394f   :  { %v14482_v11 = vpop.eup %14481 }
0x3950   :  { %v14484_v15 = vpop.eup %14483  ;;  %v8532_v16 = vmul.f32 %v14482_v11, %v8516_v5 }
0x3951   :  { %v8531_v17 = vmul.f32 %v14484_v15, %v8515_v21  ;;  %v12129_v15 = vld [vmem:[%s16220_s14 + $0x2] ss:$0 sm:$0xff] }
0x3952   :  { %v8540_v19 = vmul.f32 %v12104_v13, %v8532_v16 }
0x3953   :  { %v8539_v24 = vmul.f32 %v12104_v13, %v8531_v17 }
0x3954   :  { %v8548_v26 = vadd.f32 %v12105_v18, %v8540_v19  ;;  %v12143_v19 = vld [vmem:[%s16209_s3 + $0x198] sm:$0xff] }
0x3955   :  { %v8547_v25 = vadd.f32 %v12105_v18, %v8539_v24  ;;  %v12142_v18 = vld [vmem:[%s16209_s3 + $0x190] sm:$0xff] }
0x3957   :  { %13568 = vmatprep.mubr.msk.f32.mxu1 %vm73_vm0, %v8547_v25 }
0x3958   :  { %13569 = vmatmul.mubr.msk.f32.vlgmr.msra.gmra.mrb[94].mxu1 %vm73_vm0, %v8548_v26 }
0x3959   :  { %14215 = vmatpush3.bf16.msra.mxu1 %v14212_v22 }
0x395a   :  { %14217 = vmatprep.subr.bf16.mxu1 %v14216_v58 }
0x395d   :  { %14219 = vmatpush3.bf16.msra.mxu1 %v14216_v58  ;;  %v12175_v58 = vld [vmem:[%s16210_s4 + $0x1a0] sm:$0xff] }
0x395e   :  { %14221 = vmatprep.subr.bf16.mxu1 %v14220_v0  ;;  %v14252_v60 = vpack.c.bf16 %v12176_v59, %v12175_v58  ;;  %v12198_v58 = vld [vmem:[%s16209_s3 + $0x1c0] sm:$0xff]  ;;  %v12199_v59 = vld [vmem:[%s16209_s3 + $0x1c8] sm:$0xff] }
0x3a2b   :  { %v13570_v31 = vpop.f32.mrb[94].mxu1 }
0x3a2c   :  { %v8640_v32 = vadd.f32 %v13570_v31, %v12111_v30  ;;  %v8634_v33 = vpop.f32.mrb[95].mxu1  ;;  %v12137_v31 = vld [vmem:[%s16208_s2 + $0xc] ss:$0 sm:$0xff] }
0x3a2d   :  { %v8635_v34 = vadd.f32 %v12111_v30, %v8634_v33 }
0x3a2e   :  { %v8644_v36 = vmax.f32 %v8640_v32, 0.0 }
0x3a2f   :  { %v8643_v35 = vmax.f32 %v8635_v34, 0.0 }
0x3a31   :  { %13587 = vmatprep.mubr.msk.f32.mxu0 %vm2831_vm3, %v8643_v35 }
0x3a32   :  { %13588 = vmatmul.mubr.msk.f32.vlgmr.msra.gmra.mrb[88].mxu0 %vm2831_vm3, %v8644_v36 }
0x3a33   :  { %14231 = vmatpush3.bf16.msra.mxu0 %v14228_v55 }
0x3a34   :  { %14233 = vmatprep.subr.bf16.mxu0 %v14232_v61 }
0x3a37   :  { %14235 = vmatpush3.bf16.msra.mxu0 %v14232_v61  ;;  %v12177_v61 = vld [vmem:[%s16210_s4 + $0x1b0] sm:$0xff] }
0x3a38   :  { %13633 = vmatprep.subr.mxu0 %v14553_v14  ;;  %v14256_v63 = vpack.c.bf16 %v12178_v62, %v12177_v61  ;;  %v12200_v62 = vld [vmem:[%s16209_s3 + $0x1d0] sm:$0xff] }
0x3b05   :  { %v13589_v38 = vpop.f32.mrb[88].mxu0 }
0x3b06   :  { %v8740_v39 = vadd.f32 %v13589_v38, %v12123_v37  ;;  %v8734_v40 = vpop.f32.mrb[89].mxu0 }
0x3b07   :  { %v8735_v41 = vadd.f32 %v12123_v37, %v8734_v40 }
0x3b08   :  { %v8744_v42 = vadd.f32 %v8740_v39, %v8548_v26  ;;  %v14224_v26 = vpack.c.bf16 %v12143_v19, %v12142_v18  ;;  %v12166_v18 = vld [vmem:[%s16208_s2 + $0xd] ss:$0 sm:$0xff] }
0x3b09   :  { %v8743_v43 = vadd.f32 %v8735_v41, %v8547_v25 }
0x3b0a   :  { %v8752_v44 = vsel %vm73_vm0, %v8744_v42, 0.0 }
0x3b0b   :  { %8753 = vadd.xlane.f32.xlu1 %v8752_v44  ;;  %v8749_v45 = vsel %vm73_vm0, %v8743_v43, 0.0 }
0x3b0c   :  { %8750 = vadd.xlane.f32.xlu0 %v8749_v45 }
0x3b98   :  { %v8754_v46 = vpop.xlane.xlu1 %8753 }
0x3b99   :  { %v8756_v47 = vmul.f32 0.03125, %v8754_v46  ;;  %v8751_v48 = vpop.xlane.xlu0 %8750 }
0x3b9a   :  { %v8755_v49 = vmul.f32 0.03125, %v8751_v48 }
0x3b9b   :  { %v8758_v50 = vsub.f32 %v8744_v42, %v8756_v47 }
0x3b9c   :  { %v8757_v51 = vsub.f32 %v8743_v43, %v8755_v49 }
0x3b9d   :  { %v8760_v12 = vmul.f32 %v8758_v50, %v8758_v50 }
0x3b9e   :  { %v8759_v5 = vmul.f32 %v8757_v51, %v8757_v51 }
0x3b9f   :  { %v8764_v21 = vsel %vm73_vm0, %v8760_v12, 0.0  ;;  %v12161_v12 = vld [vmem:[%s16207_s1 + $0x1a0] sm:$0xff] }
0x3ba0   :  { %8765 = vadd.xlane.f32.xlu1 %v8764_v21  ;;  %v8761_v52 = vsel %vm73_vm0, %v8759_v5, 0.0  ;;  %v12162_v5 = vld [vmem:[%s16207_s1 + $0x1a8] sm:$0xff] }
0x3ba1   :  { %8762 = vadd.xlane.f32.xlu0 %v8761_v52  ;;  %v14236_v21 = vpack.c.bf16 %v12162_v5, %v12161_v12 }
0x3c2d   :  { %v8766_v1 = vpop.xlane.xlu1 %8765 }
0x3c2e   :  { %v8768_v2 = vmul.f32 0.03125, %v8766_v1  ;;  %v8763_v3 = vpop.xlane.xlu0 %8762  ;;  %v12169_v1 = vld [vmem:[%s16209_s3 + $0x1a0] sm:$0xff] }
0x3c2f   :  { %v8767_v4 = vmul.f32 0.03125, %v8763_v3 }
0x3c30   :  { %v8770_v6 = vadd.f32 1e-05, %v8768_v2  ;;  %v12170_v2 = vld [vmem:[%s16209_s3 + $0x1a8] sm:$0xff] }
0x3c31   :  { %v8769_v7 = vadd.f32 1e-05, %v8767_v4  ;;  %v14244_v3 = vpack.c.bf16 %v12170_v2, %v12169_v1 }
0x3c32   :  { %14485 = vrsqrt.f32 %v8770_v6  ;;  %v12171_v6 = vld [vmem:[%s16209_s3 + $0x1b0] sm:$0xff] }
0x3c33   :  { %14487 = vrsqrt.f32 %v8769_v7  ;;  %v12172_v7 = vld [vmem:[%s16209_s3 + $0x1b8] sm:$0xff] }
0x3c3c   :  { %v14486_v8 = vpop.eup %14485 }
0x3c3d   :  { %v14488_v10 = vpop.eup %14487  ;;  %v8774_v11 = vmul.f32 %v14486_v8, %v8758_v50 }
0x3c3e   :  { %v8773_v13 = vmul.f32 %v14488_v10, %v8757_v51 }
0x3c3f   :  { %v8782_v16 = vmul.f32 %v12128_v9, %v8774_v11 }
0x3c40   :  { %v8781_v17 = vmul.f32 %v12128_v9, %v8773_v13  ;;  %v14248_v9 = vpack.c.bf16 %v12172_v7, %v12171_v6 }
0x3c41   :  { %v15844_v25 = vadd.f32 %v12129_v15, %v8782_v16 }
0x3c42   :  { %v15842_v24 = vadd.f32 %v12129_v15, %v8781_v17 }
0x3c44   :  { %13598 = vmatprep.mubr.msk.f32.mxu1 %vm73_vm0, %v15842_v24  ;;  %13620 = vmatprep.mubr.msk.f32.mxu0 %vm73_vm0, %v15842_v24 }
0x3c45   :  { %13599 = vmatmul.mubr.msk.f32.vlgmr.msra.gmra.mrb[96].mxu1 %vm73_vm0, %v15844_v25  ;;  %13621 = vmatmul.mubr.msk.f32.vlgmr.msra.gmra.mrb[90].mxu0 %vm73_vm0, %v15844_v25 }
0x3c46   :  { %14223 = vmatpush3.bf16.msra.mxu1 %v14220_v0  ;;  %13609 = vmatprep.mubr.msk.f32.mxu1 %vm73_vm0, %v15842_v24  ;;  %v12158_v0 = vld [vmem:[%s16211_s5 + $0x60] sm:$0xff] }
0x3c47   :  { %14225 = vmatprep.subr.bf16.mxu1 %v14224_v26  ;;  %13635 = vmatprep.mubr.msk.f32.mxu0 %vm14554_vm1, %v14553_v14 }
0x3c4a   :  { %14227 = vmatpush3.bf16.msra.mxu1 %v14224_v26 }
0x3c4b   :  { %13623 = vmatprep.subr.mxu1 %v14553_v14 }
0x3c4d   :  { %13610 = vmatmul.mubr.msk.f32.vlgmr.msra.gmra.mrb[98].mxu1 %vm73_vm0, %v15844_v25 }
0x3c4e   :  { %13625 = vmatprep.mubr.msk.f32.mxu1 %vm14554_vm1, %v14553_v14 }
0x3d18   :  { %v13600_v27 = vpop.f32.mrb[96].mxu1  ;;  %v13622_v28 = vpop.f32.mrb[90].mxu0 }
0x3d19   :  { %v8886_v29 = vpop.f32.mrb[97].mxu1  ;;  %v9046_v30 = vpop.f32.mrb[91].mxu0  ;;  %v8892_v35 = vadd.f32 %v13600_v27, %v12137_v31 }
0x3d1a   :  { %13634 = vmatpush3.msra.mxu0 %v9046_v30  ;;  %v8887_v34 = vadd.f32 %v12137_v31, %v8886_v29 }
0x3d1b   :  { %13643 = vmatprep.subr.mxu0 %v12158_v0 }
0x3d20   :  { %v13611_v32 = vpop.f32.mrb[98].mxu1 }
0x3d21   :  { %v8966_v33 = vpop.f32.mrb[99].mxu1 }
0x3d22   :  { %13624 = vmatpush3.xpose.msk.msra.mxu1 %vm313_vm2, %v8966_v33 }
0x3d23   :  { %13628 = vmatprep.subr.mxu1 %v14553_v14 }
0x3d25   :  { %13626 = vmatmul.mubr.msk.f32.vlgmr.msra.gmra.mrb[100].mxu1 %vm313_vm2, %v8887_v34 }
0x3d26   :  { %13629 = vmatpush3.xpose.msk.msra.mxu1 %vm313_vm2, %v13611_v32  ;;  %13630 = vmatprep.mubr.msk.f32.mxu1 %vm14554_vm1, %v14553_v14 }
0x3d27   :  { %13638 = vmatprep.subr.mxu1 %v14553_v14 }
0x3d29   :  { %13631 = vmatmul.mubr.msk.f32.vlgmr.msra.gmra.mrb[102].mxu1 %vm313_vm2, %v8892_v35 }
0x3d2a   :  { %13639 = vmatpush3.msra.mxu1 %v13622_v28  ;;  %13640 = vmatprep.mubr.msk.f32.mxu1 %vm14554_vm1, %v14553_v14 }
0x3d2b   :  { %14237 = vmatprep.subr.bf16.mxu1 %v14236_v21 }
0x3df8   :  { %v9127_v36 = vpop.f32.mrb[100].mxu1 }
0x3df9   :  { %v13627_v37 = vpop.f32.mrb[101].mxu1  ;;  %v9207_v38 = vsel %vm313_vm2, %v9127_v36, -inf }
0x3dfa   :  { %9208 = vmax.xlane.f32.xlu0 %v9207_v38 }
0x3dfc   :  { %v9203_v39 = vpop.f32.mrb[102].mxu1 }
0x3dfd   :  { %v13632_v40 = vpop.f32.mrb[103].mxu1  ;;  %v9210_v41 = vsel %vm313_vm2, %v9203_v39, -inf }
0x3dfe   :  { %9211 = vmax.xlane.f32.xlu1 %v9210_v41 }
0x3e87   :  { %v9209_v42 = vpop.xlane.xlu0 %9208 }
0x3e88   :  { %v9213_v43 = vsub.f32 %v9127_v36, %v9209_v42 }
0x3e8a   :  { %v9215_v44 = vmul.f32 1.442695, %v9213_v43 }
0x3e8b   :  { %v9212_v45 = vpop.xlane.xlu1 %9211 }
0x3e8c   :  { %14489 = vpow2.f32 %v9215_v44  ;;  %v9214_v46 = vsub.f32 %v9203_v39, %v9212_v45  ;;  %v12190_v45 = vld [vmem:[%s16207_s1 + $0x1c0] sm:$0xff] }
0x3e8e   :  { %v9217_v47 = vmul.f32 1.442695, %v9214_v46  ;;  %v12191_v46 = vld [vmem:[%s16207_s1 + $0x1c8] sm:$0xff] }
0x3e90   :  { %14491 = vpow2.f32 %v9217_v47  ;;  %v14260_v47 = vpack.c.bf16 %v12191_v46, %v12190_v45  ;;  %v12222_v45 = vld [vmem:[%s16207_s1 + $0x1f8] sm:$0xff] }
0x3e96   :  { %v14490_v48 = vpop.eup %14489 }
0x3e97   :  { %v9219_v49 = vsel %vm313_vm2, %v14490_v48, 0.0 }
0x3e98   :  { %9220 = vadd.xlane.f32.xlu0 %v9219_v49 }
0x3e9a   :  { %v14492_v50 = vpop.eup %14491 }
0x3e9b   :  { %v9222_v51 = vsel %vm313_vm2, %v14492_v50, 0.0 }
0x3e9c   :  { %9223 = vadd.xlane.f32.xlu1 %v9222_v51  ;;  %v12193_v51 = vld [vmem:[%s16207_s1 + $0x1d8] sm:$0xff] }
0x3f25   :  { %v9221_v52 = vpop.xlane.xlu0 %9220 }
0x3f26   :  { %14493 = vrcp.f32 %v9221_v52  ;;  %v12204_v52 = vld [vmem:[%s16210_s4 + $0x1c0] sm:$0xff] }
0x3f29   :  { %v9224_v23 = vpop.xlane.xlu1 %9223 }
0x3f2a   :  { %14495 = vrcp.f32 %v9224_v23  ;;  %v12205_v23 = vld [vmem:[%s16210_s4 + $0x1c8] sm:$0xff] }
0x3f2b   :  { %v14276_v53 = vpack.c.bf16 %v12205_v23, %v12204_v52  ;;  %v12236_v52 = vld [vmem:[%s16210_s4 + $0x1f8] sm:$0xff] }
0x3f30   :  { %v14494_v20 = vpop.eup %14493 }
0x3f31   :  { %v9226_v22 = vmul.f32 %v14494_v20, %v14490_v48 }
0x3f33   :  { %13636 = vmatmul.mubr.msk.f32.vlgmr.msra.gmra.mrb[92].mxu0 %vm313_vm2, %v9226_v22 }
0x3f34   :  { %v14496_v55 = vpop.eup %14495  ;;  %13644 = vmatpush3.msra.mxu0 %v12158_v0 }
0x3f35   :  { %v9228_v56 = vmul.f32 %v14496_v55, %v14492_v50  ;;  %14245 = vmatprep.subr.bf16.mxu0 %v14244_v3  ;;  %v12192_v50 = vld [vmem:[%s16207_s1 + $0x1d0] sm:$0xff]  ;;  %v12207_v55 = vld [vmem:[%s16210_s4 + $0x1d8] sm:$0xff] }
0x3f37   :  { %13641 = vmatmul.mubr.msk.f32.vlgmr.msra.gmra.mrb[104].mxu1 %vm313_vm2, %v9228_v56  ;;  %v14280_v56 = vpack.c.bf16 %v12207_v55, %v12206_v54  ;;  %v12229_v54 = vld [vmem:[%s16209_s3 + $0x1f0] sm:$0xff]  ;;  %v12230_v55 = vld [vmem:[%s16209_s3 + $0x1f8] sm:$0xff] }
0x3f38   :  { %14239 = vmatpush3.bf16.msra.mxu1 %v14236_v21  ;;  %13656 = vmatprep.mubr.msk.f32.mxu1 %vm73_vm0, %v15842_v24  ;;  %v14264_v21 = vpack.c.bf16 %v12193_v51, %v12192_v50  ;;  %v12233_v51 = vld [vmem:[%s16210_s4 + $0x1e0] sm:$0xff] }
0x3f39   :  { %14241 = vmatprep.subr.bf16.mxu1 %v14240_v57 }
0x3f3c   :  { %14243 = vmatpush3.bf16.msra.mxu1 %v14240_v57  ;;  %v12187_v57 = vld [vmem:[%s16211_s5 + $0x68] sm:$0xff] }
0x3f3d   :  { %14253 = vmatprep.subr.bf16.mxu1 %v14252_v60 }
0x3f3f   :  { %13657 = vmatmul.mubr.msk.f32.vlgmr.msra.gmra.mrb[106].mxu1 %vm73_vm0, %v15844_v25 }
0x3f40   :  { %14255 = vmatpush3.bf16.msra.mxu1 %v14252_v60  ;;  %13678 = vmatprep.mubr.msk.f32.mxu1 %vm73_vm0, %v15842_v24  ;;  %v14268_v60 = vpack.c.bf16 %v12199_v59, %v12198_v58  ;;  %v14296_v59 = vpack.c.bf16 %v12230_v55, %v12229_v54  ;;  %v12254_v55 = vld [vmem:[%s16215_s9 + $0x70] sm:$0xff] }
0x3f41   :  { %14257 = vmatprep.subr.bf16.mxu1 %v14256_v63 }
0x3f44   :  { %14259 = vmatpush3.bf16.msra.mxu1 %v14256_v63  ;;  %v12201_v63 = vld [vmem:[%s16209_s3 + $0x1d8] sm:$0xff] }
0x3f45   :  { %13691 = vmatprep.subr.mxu1 %v14553_v14  ;;  %v14272_v1 = vpack.c.bf16 %v12201_v63, %v12200_v62 }
0x3f47   :  { %13679 = vmatmul.mubr.msk.f32.vlgmr.msra.gmra.mrb[108].mxu1 %vm73_vm0, %v15844_v25 }
0x3f48   :  { %13693 = vmatprep.mubr.msk.f32.mxu1 %vm14554_vm1, %v14553_v14 }
0x4006   :  { %v9298_v4 = vpop.f32.mrb[92].mxu0 }
0x4007   :  { %v13637_v8 = vpop.f32.mrb[93].mxu0  ;;  %13645 = vmatprep.mubr.msk.f32.mxu0 %vm313_vm2, %v9298_v4 }
0x400a   :  { %v9371_v10 = vpop.f32.mrb[104].mxu1 }
0x400b   :  { %v13642_v11 = vpop.f32.mrb[105].mxu1  ;;  %13646 = vmatmul.mubr.msk.f32.vlgmr.msra.gmra.mrb[94].mxu0 %vm313_vm2, %v9371_v10 }
0x400c   :  { %14247 = vmatpush3.bf16.msra.mxu0 %v14244_v3  ;;  %13667 = vmatprep.mubr.msk.f32.mxu0 %vm73_vm0, %v15842_v24 }
0x400d   :  { %14249 = vmatprep.subr.bf16.mxu0 %v14248_v9 }
0x4010   :  { %14251 = vmatpush3.bf16.msra.mxu0 %v14248_v9  ;;  %v12195_v9 = vld [vmem:[%s16208_s2 + $0xe] ss:$0 sm:$0xff] }
0x4011   :  { %13681 = vmatprep.subr.mxu0 %v14553_v14 }
0x4012   :  { %v13658_v13 = vpop.f32.mrb[106].mxu1 }
0x4013   :  { %v9539_v15 = vpop.f32.mrb[107].mxu1  ;;  %13668 = vmatmul.mubr.msk.f32.vlgmr.msra.gmra.mrb[96].mxu0 %vm73_vm0, %v15844_v25  ;;  %v9545_v28 = vadd.f32 %v13658_v13, %v12166_v18 }
0x4014   :  { %13683 = vmatprep.mubr.msk.f32.mxu0 %vm14554_vm1, %v14553_v14  ;;  %v9540_v27 = vadd.f32 %v12166_v18, %v9539_v15 }
0x401a   :  { %v13680_v16 = vpop.f32.mrb[108].mxu1 }
0x401b   :  { %v9699_v17 = vpop.f32.mrb[109].mxu1 }
0x401c   :  { %13692 = vmatpush3.msra.mxu1 %v9699_v17 }
0x401d   :  { %14261 = vmatprep.subr.bf16.mxu1 %v14260_v47 }
0x40e6   :  { %v13669_v19 = vpop.f32.mrb[96].mxu0 }
0x40e7   :  { %v9619_v26 = vpop.f32.mrb[97].mxu0 }
0x40e8   :  { %13682 = vmatpush3.xpose.msk.msra.mxu0 %vm313_vm2, %v9619_v26 }
0x40e9   :  { %13686 = vmatprep.subr.mxu0 %v14553_v14 }
0x40eb   :  { %13684 = vmatmul.mubr.msk.f32.vlgmr.msra.gmra.mrb[98].mxu0 %vm313_vm2, %v9540_v27 }
0x40ec   :  { %13687 = vmatpush3.xpose.msk.msra.mxu0 %vm313_vm2, %v13669_v19  ;;  %13688 = vmatprep.mubr.msk.f32.mxu0 %vm14554_vm1, %v14553_v14 }
0x40ed   :  { %13696 = vmatprep.subr.mxu0 %v14553_v14 }
0x40ef   :  { %13689 = vmatmul.mubr.msk.f32.vlgmr.msra.gmra.mrb[100].mxu0 %vm313_vm2, %v9545_v28 }
0x40f0   :  { %13697 = vmatpush3.msra.mxu0 %v13680_v16  ;;  %13698 = vmatprep.mubr.msk.f32.mxu0 %vm14554_vm1, %v14553_v14 }
0x40f1   :  { %13701 = vmatprep.subr.mxu0 %v12187_v57 }
0x41be   :  { %v9780_v29 = vpop.f32.mrb[98].mxu0 }
0x41bf   :  { %v13685_v30 = vpop.f32.mrb[99].mxu0  ;;  %v9860_v31 = vsel %vm313_vm2, %v9780_v29, -inf }
0x41c0   :  { %9861 = vmax.xlane.f32.xlu0 %v9860_v31 }
0x41c2   :  { %v9856_v32 = vpop.f32.mrb[100].mxu0 }
0x41c3   :  { %v13690_v33 = vpop.f32.mrb[101].mxu0  ;;  %v9863_v34 = vsel %vm313_vm2, %v9856_v32, -inf }
0x41c4   :  { %9864 = vmax.xlane.f32.xlu1 %v9863_v34 }
0x424d   :  { %v9862_v35 = vpop.xlane.xlu0 %9861 }
0x424e   :  { %v9866_v36 = vsub.f32 %v9780_v29, %v9862_v35 }
0x4250   :  { %v9868_v37 = vmul.f32 1.442695, %v9866_v36 }
0x4251   :  { %v9865_v38 = vpop.xlane.xlu1 %9864 }
0x4252   :  { %14497 = vpow2.f32 %v9868_v37  ;;  %v9867_v39 = vsub.f32 %v9856_v32, %v9865_v38  ;;  %v12219_v38 = vld [vmem:[%s16207_s1 + $0x1e0] sm:$0xff] }
0x4254   :  { %v9870_v40 = vmul.f32 1.442695, %v9867_v39  ;;  %v12220_v39 = vld [vmem:[%s16207_s1 + $0x1e8] sm:$0xff] }
0x4256   :  { %14499 = vpow2.f32 %v9870_v40  ;;  %v14284_v40 = vpack.c.bf16 %v12220_v39, %v12219_v38 }
0x425c   :  { %v14498_v41 = vpop.eup %14497 }
0x425d   :  { %v9872_v42 = vsel %vm313_vm2, %v14498_v41, 0.0 }
0x425e   :  { %9873 = vadd.xlane.f32.xlu0 %v9872_v42 }
0x4260   :  { %v14500_v43 = vpop.eup %14499 }
0x4261   :  { %v9875_v44 = vsel %vm313_vm2, %v14500_v43, 0.0 }
0x4262   :  { %9876 = vadd.xlane.f32.xlu1 %v9875_v44  ;;  %v12221_v44 = vld [vmem:[%s16207_s1 + $0x1f0] sm:$0xff] }
0x42eb   :  { %v9874_v48 = vpop.xlane.xlu0 %9873 }
0x42ec   :  { %14501 = vrcp.f32 %v9874_v48 }
0x42ef   :  { %v9877_v49 = vpop.xlane.xlu1 %9876 }
0x42f0   :  { %14503 = vrcp.f32 %v9877_v49  ;;  %v14288_v49 = vpack.c.bf16 %v12222_v45, %v12221_v44 }
0x42f6   :  { %v14502_v12 = vpop.eup %14501 }
0x42f7   :  { %v9879_v5 = vmul.f32 %v14502_v12, %v14498_v41  ;;  %v12216_v41 = vld [vmem:[%s16211_s5 + $0x70] sm:$0xff]  ;;  %v12234_v12 = vld [vmem:[%s16210_s4 + $0x1e8] sm:$0xff] }
0x42f9   :  { %13694 = vmatmul.mubr.msk.f32.vlgmr.msra.gmra.mrb[110].mxu1 %vm313_vm2, %v9879_v5  ;;  %v14300_v5 = vpack.c.bf16 %v12234_v12, %v12233_v51 }
0x42fa   :  { %v14504_v20 = vpop.eup %14503  ;;  %14263 = vmatpush3.bf16.msra.mxu1 %v14260_v47  ;;  %13714 = vmatprep.mubr.msk.f32.mxu1 %vm73_vm0, %v15842_v24 }
0x42fb   :  { %v9881_v22 = vmul.f32 %v14504_v20, %v14500_v43  ;;  %14265 = vmatprep.subr.bf16.mxu1 %v14264_v21  ;;  %v12227_v20 = vld [vmem:[%s16209_s3 + $0x1e0] sm:$0xff] }
0x42fd   :  { %13699 = vmatmul.mubr.msk.f32.vlgmr.msra.gmra.mrb[102].mxu0 %vm313_vm2, %v9881_v22  ;;  %v12228_v22 = vld [vmem:[%s16209_s3 + $0x1e8] sm:$0xff] }
0x42fe   :  { %14267 = vmatpush3.bf16.msra.mxu1 %v14264_v21  ;;  %13702 = vmatpush3.msra.mxu0 %v12187_v57  ;;  %v12235_v21 = vld [vmem:[%s16210_s4 + $0x1f0] sm:$0xff]  ;;  %s14555_s4 = smov [#allocation2]  }
0x42ff   :  { %14277 = vmatprep.subr.bf16.mxu1 %v14276_v53  ;;  %14269 = vmatprep.subr.bf16.mxu0 %v14268_v60  ;;  %v14304_v23 = vpack.c.bf16 %v12236_v52, %v12235_v21  ;;  %s11714_s27 = sshll.u32 %s14555_s4, 4  ;;  %s11715_s27 = int_to_ptr.vmem [resolvable:$true] %s11714_s27 }
0x4300   :  { %s14529_s28 = scalar_lea.vmem %s11715_s27, 256  ;;  %p14534_p1 = scmp.lt.s32.totalorder %s11715_s27, %s11715_s27 }
0x4301   :  { %13715 = vmatmul.mubr.msk.f32.vlgmr.msra.gmra.mrb[112].mxu1 %vm73_vm0, %v15844_v25  ;;  %p14530_p0 = scmp.ne.s32.totalorder %s11715_s27, %s14529_s28  ;;  %p14535_p2 = scmp.lt.s32.totalorder %s14529_s28, %s14529_s28 }
0x4302   :  { %14279 = vmatpush3.bf16.msra.mxu1 %v14276_v53  ;;  %13736 = vmatprep.mubr.msk.f32.mxu1 %vm73_vm0, %v15842_v24  ;;  %v14292_v53 = vpack.c.bf16 %v12228_v22, %v12227_v20  ;;  %v12252_v22 = vld [vmem:[%s16215_s9 + $0x60] sm:$0xff] }
0x4303   :  { %14281 = vmatprep.subr.bf16.mxu1 %v14280_v56  ;;  %p14536_p3 = por %p14535_p2, %p14534_p1 }
0x4305   :  { %p14537_p4 = pnand %p14536_p3, %p14530_p0 }
0x4306   :  { %14283 = vmatpush3.bf16.msra.mxu1 %v14280_v56 }
0x4307   :  { %13744 = vmatprep.subr.mxu1 %v14553_v14 }
0x4309   :  { %13737 = vmatmul.mubr.msk.f32.vlgmr.msra.gmra.mrb[114].mxu1 %vm73_vm0, %v15844_v25 }
0x430a   :  { %13746 = vmatprep.mubr.msk.f32.mxu1 %vm14554_vm1, %v14553_v14 }
0x43cc   :  { %v9951_v61 = vpop.f32.mrb[110].mxu1 }
0x43cd   :  { %v13695_v0 = vpop.f32.mrb[111].mxu1  ;;  %13703 = vmatprep.mubr.msk.f32.mxu0 %vm313_vm2, %v9951_v61 }
0x43d0   :  { %v10024_v2 = vpop.f32.mrb[102].mxu0 }
0x43d1   :  { %v13700_v3 = vpop.f32.mrb[103].mxu0  ;;  %13704 = vmatmul.mubr.msk.f32.vlgmr.msra.gmra.mrb[94].mxu0 %vm313_vm2, %v10024_v2 }
0x43d2   :  { %14271 = vmatpush3.bf16.msra.mxu0 %v14268_v60  ;;  %13725 = vmatprep.mubr.msk.f32.mxu0 %vm73_vm0, %v15842_v24 }
0x43d3   :  { %14273 = vmatprep.subr.bf16.mxu0 %v14272_v1 }
0x43d4   :  { %v13716_v4 = vpop.f32.mrb[112].mxu1 }
0x43d5   :  { %v10192_v6 = vpop.f32.mrb[113].mxu1  ;;  %v10198_v13 = vadd.f32 %v13716_v4, %v12195_v9 }
0x43d6   :  { %14275 = vmatpush3.bf16.msra.mxu0 %v14272_v1  ;;  %v10193_v15 = vadd.f32 %v12195_v9, %v10192_v6  ;;  %v12224_v1 = vld [vmem:[%s16208_s2 + $0xf] ss:$0 sm:$0xff] }
0x43d7   :  { %13739 = vmatprep.subr.mxu0 %v14553_v14 }
0x43d9   :  { %13726 = vmatmul.mubr.msk.f32.vlgmr.msra.gmra.mrb[104].mxu0 %vm73_vm0, %v15844_v25 }
0x43da   :  { %13741 = vmatprep.mubr.msk.f32.mxu0 %vm14554_vm1, %v14553_v14 }
0x43dc   :  { %v13738_v7 = vpop.f32.mrb[114].mxu1 }
0x43dd   :  { %v10352_v8 = vpop.f32.mrb[115].mxu1 }
0x44ac   :  { %v13727_v10 = vpop.f32.mrb[104].mxu0 }
0x44ad   :  { %v10272_v11 = vpop.f32.mrb[105].mxu0  ;;  %13745 = vmatpush3.xpose.msk.msra.mxu1 %vm313_vm2, %v13727_v10 }
0x44ae   :  { %13740 = vmatpush3.xpose.msk.msra.mxu0 %vm313_vm2, %v10272_v11  ;;  %13754 = vmatprep.subr.mxu1 %v14553_v14 }
0x44af   :  { %13749 = vmatprep.subr.mxu0 %v14553_v14 }
0x44b0   :  { %13747 = vmatmul.mubr.msk.f32.vlgmr.msra.gmra.mrb[116].mxu1 %vm313_vm2, %v10198_v13 }
0x44b1   :  { %13742 = vmatmul.mubr.msk.f32.vlgmr.msra.gmra.mrb[106].mxu0 %vm313_vm2, %v10193_v15  ;;  %13755 = vmatpush3.msra.mxu1 %v13738_v7 }
0x44b2   :  { %13750 = vmatpush3.msra.mxu0 %v10352_v8  ;;  %13756 = vmatprep.mubr.msk.f32.mxu1 %vm14554_vm1, %v14553_v14 }
0x44b3   :  { %13751 = vmatprep.mubr.msk.f32.mxu0 %vm14554_vm1, %v14553_v14  ;;  %14285 = vmatprep.subr.bf16.mxu1 %v14284_v40 }
0x44b4   :  { %13759 = vmatprep.subr.mxu0 %v12216_v41 }
0x4583   :  { %v10509_v16 = vpop.f32.mrb[116].mxu1 }
0x4584   :  { %v10433_v17 = vpop.f32.mrb[106].mxu0  ;;  %v13748_v18 = vpop.f32.mrb[117].mxu1  ;;  %v10516_v19 = vsel %vm313_vm2, %v10509_v16, -inf }
0x4585   :  { %10517 = vmax.xlane.f32.xlu1 %v10516_v19  ;;  %v13743_v26 = vpop.f32.mrb[107].mxu0  ;;  %v10513_v27 = vsel %vm313_vm2, %v10433_v17, -inf }
0x4586   :  { %10514 = vmax.xlane.f32.xlu0 %v10513_v27 }
0x4612   :  { %v10518_v28 = vpop.xlane.xlu1 %10517 }
0x4613   :  { %v10520_v29 = vsub.f32 %v10509_v16, %v10518_v28  ;;  %v10515_v30 = vpop.xlane.xlu0 %10514 }
0x4614   :  { %v10519_v31 = vsub.f32 %v10433_v17, %v10515_v30 }
0x4615   :  { %v10523_v32 = vmul.f32 1.442695, %v10520_v29 }
0x4616   :  { %v10521_v33 = vmul.f32 1.442695, %v10519_v31 }
0x4617   :  { %14505 = vpow2.f32 %v10523_v32 }
0x4618   :  { %14507 = vpow2.f32 %v10521_v33 }
0x4621   :  { %v14506_v34 = vpop.eup %14505 }
0x4622   :  { %v14508_v35 = vpop.eup %14507  ;;  %v10528_v36 = vsel %vm313_vm2, %v14506_v34, 0.0 }
0x4623   :  { %10529 = vadd.xlane.f32.xlu1 %v10528_v36  ;;  %v10525_v37 = vsel %vm313_vm2, %v14508_v35, 0.0  ;;  %v12245_v36 = vld [vmem:[%s16211_s5 + $0x78] sm:$0xff] }
0x4624   :  { %10526 = vadd.xlane.f32.xlu0 %v10525_v37 }
0x46b0   :  { %v10530_v42 = vpop.xlane.xlu1 %10529 }
0x46b1   :  { %14509 = vrcp.f32 %v10530_v42  ;;  %v10527_v43 = vpop.xlane.xlu0 %10526 }
0x46b2   :  { %14511 = vrcp.f32 %v10527_v43 }
0x46bb   :  { %v14510_v46 = vpop.eup %14509 }
0x46bc   :  { %v14512_v47 = vpop.eup %14511  ;;  %v10534_v48 = vmul.f32 %v14510_v46, %v14506_v34 }
0x46bd   :  { %v10532_v50 = vmul.f32 %v14512_v47, %v14508_v35 }
0x46be   :  { %13757 = vmatmul.mubr.msk.f32.vlgmr.msra.gmra.mrb[118].mxu1 %vm313_vm2, %v10534_v48 }
0x46bf   :  { %14287 = vmatpush3.bf16.msra.mxu1 %v14284_v40  ;;  %13752 = vmatmul.mubr.msk.f32.vlgmr.msra.gmra.mrb[108].mxu0 %vm313_vm2, %v10532_v50 }
0x46c0   :  { %13772 = vmatprep.mubr.msk.f32.mxu1 %vm73_vm0, %v15842_v24  ;;  %14289 = vmatprep.subr.bf16.mxu1 %v14288_v49 }
0x46c1   :  { %13760 = vmatpush3.msra.mxu0 %v12216_v41  ;;  %v12131_v41 = vld [vmem:[%s16212_s6 + $0x3] ss:$0 sm:$0xff] }
0x46c2   :  { %14293 = vmatprep.subr.bf16.mxu0 %v14292_v53  ;;  %v8800_v42 = vadd.f32 %v12131_v41, %v15844_v25  ;;  %v8799_v44 = vadd.f32 %v12131_v41, %v15842_v24 }
0x46c3   :  { %14291 = vmatpush3.bf16.msra.mxu1 %v14288_v49 }
0x46c4   :  { %14301 = vmatprep.subr.bf16.mxu1 %v14300_v5 }
0x46c6   :  { %13773 = vmatmul.mubr.msk.f32.vlgmr.msra.gmra.mrb[120].mxu1 %vm73_vm0, %v15844_v25 }
0x46c7   :  { %14303 = vmatpush3.bf16.msra.mxu1 %v14300_v5  ;;  %13794 = vmatprep.mubr.msk.f32.mxu1 %vm73_vm0, %v15842_v24 }
0x46c8   :  { %14305 = vmatprep.subr.bf16.mxu1 %v14304_v23 }
0x46cb   :  { %14307 = vmatpush3.bf16.msra.mxu1 %v14304_v23 }
0x46cc   :  { %13807 = vmatprep.subr.mxu1 %v14553_v14 }
0x46ce   :  { %13795 = vmatmul.mubr.msk.f32.vlgmr.msra.gmra.mrb[122].mxu1 %vm73_vm0, %v15844_v25 }
0x46cf   :  { %13809 = vmatprep.mubr.msk.f32.mxu1 %vm14554_vm1, %v14553_v14 }
0x4791   :  { %v10677_v56 = vpop.f32.mrb[118].mxu1 }
0x4792   :  { %v10604_v57 = vpop.f32.mrb[108].mxu0  ;;  %v13758_v58 = vpop.f32.mrb[119].mxu1 }
0x4793   :  { %v13753_v60 = vpop.f32.mrb[109].mxu0  ;;  %13761 = vmatprep.mubr.msk.f32.mxu0 %vm313_vm2, %v10604_v57  ;;  %v12260_v58 = vld [vmem:[%s16217_s11 + $0xc0] sm:$0xff] }
0x4794   :  { %13762 = vmatmul.mubr.msk.f32.vlgmr.msra.gmra.mrb[94].mxu0 %vm313_vm2, %v10677_v56  ;;  %v12255_v56 = vld [vmem:[%s16215_s9 + $0x78] sm:$0xff]  ;;  %v12262_v60 = vld [vmem:[%s16217_s11 + $0xd0] sm:$0xff] }
0x4795   :  { %14295 = vmatpush3.bf16.msra.mxu0 %v14292_v53  ;;  %13783 = vmatprep.mubr.msk.f32.mxu0 %vm73_vm0, %v15842_v24  ;;  %v12253_v53 = vld [vmem:[%s16215_s9 + $0x68] sm:$0xff]  ;;  %v14312_v57 = vpack.c.bf16 %v12255_v56, %v12254_v55  ;;  %v12274_v55 = vld [vmem:[%s16219_s13 + $0x3] ss:$0 sm:$0xff] }
0x4796   :  { %14297 = vmatprep.subr.bf16.mxu0 %v14296_v59  ;;  %v14308_v54 = vpack.c.bf16 %v12253_v53, %v12252_v22 }
0x4799   :  { %v13774_v61 = vpop.f32.mrb[120].mxu1  ;;  %14299 = vmatpush3.bf16.msra.mxu0 %v14296_v59  ;;  %v12261_v59 = vld [vmem:[%s16217_s11 + $0xc8] sm:$0xff] }
0x479a   :  { %v10845_v62 = vpop.f32.mrb[121].mxu1  ;;  %13797 = vmatprep.subr.mxu0 %v14553_v14  ;;  %v10851_v6 = vadd.f32 %v13774_v61, %v12224_v1  ;;  %v14316_v61 = vpack.c.bf16 %v12261_v59, %v12260_v58  ;;  %v12275_v59 = vld [vmem:[%s16220_s14 + $0x3] ss:$0 sm:$0xff] }
0x479b   :  { %v10846_v4 = vadd.f32 %v12224_v1, %v10845_v62  ;;  %v12263_v62 = vld [vmem:[%s16217_s11 + $0xd8] sm:$0xff]  ;;  %v12265_v1 = vld [vmem:[%s16217_s11 + $0xe8] sm:$0xff] }
0x479c   :  { %13784 = vmatmul.mubr.msk.f32.vlgmr.msra.gmra.mrb[110].mxu0 %vm73_vm0, %v15844_v25 }
0x479d   :  { %13799 = vmatprep.mubr.msk.f32.mxu0 %vm14554_vm1, %v14553_v14 }
0x47a1   :  { %v13796_v63 = vpop.f32.mrb[122].mxu1 }
0x47a2   :  { %v11005_v0 = vpop.f32.mrb[123].mxu1 }
0x47a3   :  { %13808 = vmatpush3.msra.mxu1 %v11005_v0  ;;  %v12264_v0 = vld [vmem:[%s16217_s11 + $0xe0] sm:$0xff] }
0x47a4   :  { %14309 = vmatprep.subr.bf16.mxu1 %v14308_v54 }
0x486f   :  { %v13785_v2 = vpop.f32.mrb[110].mxu0 }
0x4870   :  { %v10925_v3 = vpop.f32.mrb[111].mxu0 }
0x4871   :  { %13798 = vmatpush3.xpose.msk.msra.mxu0 %vm313_vm2, %v10925_v3 }
0x4872   :  { %13802 = vmatprep.subr.mxu0 %v14553_v14 }
0x4874   :  { %13800 = vmatmul.mubr.msk.f32.vlgmr.msra.gmra.mrb[112].mxu0 %vm313_vm2, %v10846_v4 }
0x4875   :  { %13803 = vmatpush3.xpose.msk.msra.mxu0 %vm313_vm2, %v13785_v2  ;;  %13804 = vmatprep.mubr.msk.f32.mxu0 %vm14554_vm1, %v14553_v14  ;;  %v14324_v2 = vpack.c.bf16 %v12265_v1, %v12264_v0 }
0x4876   :  { %13812 = vmatprep.subr.mxu0 %v14553_v14 }
0x4878   :  { %13805 = vmatmul.mubr.msk.f32.vlgmr.msra.gmra.mrb[114].mxu0 %vm313_vm2, %v10851_v6 }
0x4879   :  { %13813 = vmatpush3.msra.mxu0 %v13796_v63  ;;  %13814 = vmatprep.mubr.msk.f32.mxu0 %vm14554_vm1, %v14553_v14  ;;  %v14320_v63 = vpack.c.bf16 %v12263_v62, %v12262_v60 }
0x487a   :  { %13817 = vmatprep.subr.mxu0 %v12245_v36 }
0x4947   :  { %v11086_v7 = vpop.f32.mrb[112].mxu0 }
0x4948   :  { %v13801_v8 = vpop.f32.mrb[113].mxu0  ;;  %v11166_v9 = vsel %vm313_vm2, %v11086_v7, -inf }
0x4949   :  { %11167 = vmax.xlane.f32.xlu0 %v11166_v9 }
0x494b   :  { %v11162_v10 = vpop.f32.mrb[114].mxu0 }
0x494c   :  { %v13806_v11 = vpop.f32.mrb[115].mxu0  ;;  %v11169_v13 = vsel %vm313_vm2, %v11162_v10, -inf }
0x494d   :  { %11170 = vmax.xlane.f32.xlu1 %v11169_v13  ;;  %v12250_v11 = vld [vmem:[%s16213_s7 + $0x3] ss:$0 sm:$0xff] }
0x49d6   :  { %v11168_v15 = vpop.xlane.xlu0 %11167 }
0x49d7   :  { %v11172_v16 = vsub.f32 %v11086_v7, %v11168_v15 }
0x49d9   :  { %v11174_v17 = vmul.f32 1.442695, %v11172_v16 }
0x49da   :  { %v11171_v18 = vpop.xlane.xlu1 %11170 }
0x49db   :  { %14513 = vpow2.f32 %v11174_v17  ;;  %v11173_v19 = vsub.f32 %v11162_v10, %v11171_v18  ;;  %v12251_v17 = vld [vmem:[%s16214_s8 + $0x3] ss:$0 sm:$0xff] }
0x49dd   :  { %v11176_v26 = vmul.f32 1.442695, %v11173_v19 }
0x49df   :  { %14515 = vpow2.f32 %v11176_v26 }
0x49e5   :  { %v14514_v27 = vpop.eup %14513 }
0x49e6   :  { %v11178_v14 = vsel %vm313_vm2, %v14514_v27, 0.0 }
0x49e7   :  { %11179 = vadd.xlane.f32.xlu0 %v11178_v14  ;;  %v12266_v14 = vld [vmem:[%s16217_s11 + $0xf0] sm:$0xff] }
0x49e9   :  { %v14516_v28 = vpop.eup %14515 }
0x49ea   :  { %v11181_v29 = vsel %vm313_vm2, %v14516_v28, 0.0 }
0x49eb   :  { %11182 = vadd.xlane.f32.xlu1 %v11181_v29 }
0x4a74   :  { %v11180_v30 = vpop.xlane.xlu0 %11179 }
0x4a75   :  { %14517 = vrcp.f32 %v11180_v30  ;;  %v12257_v30 = vld [vmem:[%s16216_s10 + $0x3] ss:$0 sm:$0xff] }
0x4a78   :  { %v11183_v31 = vpop.xlane.xlu1 %11182 }
0x4a79   :  { %14519 = vrcp.f32 %v11183_v31 }
0x4a7f   :  { %v14518_v32 = vpop.eup %14517 }
0x4a80   :  { %v11185_v33 = vmul.f32 %v14518_v32, %v14514_v27 }
0x4a82   :  { %13810 = vmatmul.mubr.msk.f32.vlgmr.msra.gmra.mrb[124].mxu1 %vm313_vm2, %v11185_v33 }
0x4a83   :  { %v14520_v34 = vpop.eup %14519  ;;  %14311 = vmatpush3.bf16.msra.mxu1 %v14308_v54 }
0x4a84   :  { %v11187_v35 = vmul.f32 %v14520_v34, %v14516_v28  ;;  %14313 = vmatprep.subr.bf16.mxu1 %v14312_v57  ;;  %v12267_v28 = vld [vmem:[%s16217_s11 + $0xf8] sm:$0xff] }
0x4a85   :  { %v14328_v29 = vpack.c.bf16 %v12267_v28, %v12266_v14 }
0x4a86   :  { %13815 = vmatmul.mubr.msk.f32.vlgmr.msra.gmra.mrb[116].mxu0 %vm313_vm2, %v11187_v35 }
0x4a87   :  { %13818 = vmatpush3.msra.mxu0 %v12245_v36  ;;  %14315 = vmatpush3.bf16.msra.mxu1 %v14312_v57 }
0x4a88   :  { %14317 = vmatprep.subr.bf16.mxu0 %v14316_v61 }
0x4b55   :  { %v11257_v37 = vpop.f32.mrb[124].mxu1 }
0x4b56   :  { %v13811_v38 = vpop.f32.mrb[125].mxu1  ;;  %13819 = vmatprep.mubr.msk.f32.mxu0 %vm313_vm2, %v11257_v37  ;;  %v12269_v37 = vld [vmem:[%s16218_s12 + $0x3] ss:$0 sm:$0xff] }
0x4b59   :  { %v11330_v39 = vpop.f32.mrb[116].mxu0 }
0x4b5a   :  { %v13816_v40 = vpop.f32.mrb[117].mxu0  ;;  %13820 = vmatmul.mubr.msk.f32.vlgmr.msra.gmra.mrb[94].mxu0 %vm313_vm2, %v11330_v39 }
0x4b5b   :  { %14319 = vmatpush3.bf16.msra.mxu0 %v14316_v61 }
0x4b5c   :  { %14321 = vmatprep.subr.bf16.mxu0 %v14320_v63 }
0x4b5f   :  { %14323 = vmatpush3.bf16.msra.mxu0 %v14320_v63 }
0x4b60   :  { %14325 = vmatprep.subr.bf16.mxu0 %v14324_v2 }
0x4b63   :  { %14327 = vmatpush3.bf16.msra.mxu0 %v14324_v2 }
0x4b64   :  { %14329 = vmatprep.subr.bf16.mxu0 %v14328_v29 }
0x4b67   :  { %14331 = vmatpush3.bf16.msra.mxu0 %v14328_v29 }
0x4c2d   :  { %v13821_v43 = vpop.f32.mrb[94].mxu0 }
0x4c2e   :  { %v14338_v45 = vadd.f32 %v13821_v43, %v8800_v42  ;;  %v11408_v46 = vpop.f32.mrb[95].mxu0 }
0x4c2f   :  { %v14339_v47 = vadd.f32 %v11408_v46, %v8799_v44 }
0x4c30   :  { %v11426_v48 = vsel %vm73_vm0, %v14338_v45, 0.0 }
0x4c31   :  { %11427 = vadd.xlane.f32.xlu1 %v11426_v48  ;;  %v11423_v49 = vsel %vm73_vm0, %v14339_v47, 0.0 }
0x4c32   :  { %11424 = vadd.xlane.f32.xlu0 %v11423_v49 }
0x4cbe   :  { %v11428_v50 = vpop.xlane.xlu1 %11427 }
0x4cbf   :  { %v11430_v51 = vmul.f32 0.03125, %v11428_v50  ;;  %v11425_v12 = vpop.xlane.xlu0 %11424 }
0x4cc0   :  { %v11429_v5 = vmul.f32 0.03125, %v11425_v12 }
0x4cc1   :  { %v11432_v21 = vsub.f32 %v14338_v45, %v11430_v51 }
0x4cc2   :  { %v11431_v52 = vsub.f32 %v14339_v47, %v11429_v5 }
0x4cc3   :  { %v11434_v23 = vmul.f32 %v11432_v21, %v11432_v21 }
0x4cc4   :  { %v11433_v25 = vmul.f32 %v11431_v52, %v11431_v52 }
0x4cc5   :  { %v11438_v20 = vsel %vm73_vm0, %v11434_v23, 0.0 }
0x4cc6   :  { %11439 = vadd.xlane.f32.xlu1 %v11438_v20  ;;  %v11435_v24 = vsel %vm73_vm0, %v11433_v25, 0.0 }
0x4cc7   :  { %11436 = vadd.xlane.f32.xlu0 %v11435_v24 }
0x4d53   :  { %v11440_v3 = vpop.xlane.xlu1 %11439 }
0x4d54   :  { %v11442_v4 = vmul.f32 0.03125, %v11440_v3  ;;  %v11437_v6 = vpop.xlane.xlu0 %11436 }
0x4d55   :  { %v11441_v7 = vmul.f32 0.03125, %v11437_v6 }
0x4d56   :  { %v11444_v8 = vadd.f32 1e-05, %v11442_v4 }
0x4d57   :  { %v11443_v9 = vadd.f32 1e-05, %v11441_v7 }
0x4d58   :  { %14521 = vrsqrt.f32 %v11444_v8 }
0x4d59   :  { %14523 = vrsqrt.f32 %v11443_v9 }
0x4d62   :  { %v14522_v10 = vpop.eup %14521 }
0x4d63   :  { %v14524_v13 = vpop.eup %14523  ;;  %v11448_v15 = vmul.f32 %v14522_v10, %v11432_v21 }
0x4d64   :  { %v11447_v16 = vmul.f32 %v14524_v13, %v11431_v52 }
0x4d65   :  { %v11456_v18 = vmul.f32 %v12250_v11, %v11448_v15 }
0x4d66   :  { %v11455_v19 = vmul.f32 %v12250_v11, %v11447_v16 }
0x4d67   :  { %v11464_v27 = vadd.f32 %v12251_v17, %v11456_v18 }
0x4d68   :  { %v11463_v26 = vadd.f32 %v12251_v17, %v11455_v19 }
0x4d6a   :  { %13830 = vmatprep.mubr.msk.f32.mxu1 %vm73_vm0, %v11463_v26 }
0x4d6b   :  { %13831 = vmatmul.mubr.msk.f32.vlgmr.msra.gmra.mrb[126].mxu1 %vm73_vm0, %v11464_v27 }
0x4e3e   :  { %v13832_v31 = vpop.f32.mrb[126].mxu1 }
0x4e3f   :  { %v11556_v32 = vadd.f32 %v13832_v31, %v12257_v30  ;;  %v11550_v33 = vpop.f32.mrb[127].mxu1 }
0x4e40   :  { %v11551_v34 = vadd.f32 %v12257_v30, %v11550_v33 }
0x4e41   :  { %v11560_v36 = vmax.f32 %v11556_v32, 0.0 }
0x4e42   :  { %v11559_v35 = vmax.f32 %v11551_v34, 0.0 }
0x4e44   :  { %13849 = vmatprep.mubr.msk.f32.mxu0 %vm2831_vm3, %v11559_v35 }
0x4e45   :  { %13850 = vmatmul.mubr.msk.f32.vlgmr.msra.gmra.mrb[118].mxu0 %vm2831_vm3, %v11560_v36 }
0x4f18   :  { %v13851_v38 = vpop.f32.mrb[118].mxu0 }
0x4f19   :  { %v11656_v39 = vadd.f32 %v13851_v38, %v12269_v37  ;;  %v11650_v40 = vpop.f32.mrb[119].mxu0 }
0x4f1a   :  { %v11651_v41 = vadd.f32 %v12269_v37, %v11650_v40 }
0x4f1b   :  { %v11660_v42 = vadd.f32 %v11656_v39, %v11464_v27 }
0x4f1c   :  { %v11659_v43 = vadd.f32 %v11651_v41, %v11463_v26 }
0x4f1d   :  { %v11668_v44 = vsel %vm73_vm0, %v11660_v42, 0.0 }
0x4f1e   :  { %11669 = vadd.xlane.f32.xlu1 %v11668_v44  ;;  %v11665_v45 = vsel %vm73_vm0, %v11659_v43, 0.0 }
0x4f1f   :  { %11666 = vadd.xlane.f32.xlu0 %v11665_v45 }
0x4fab   :  { %v11670_v46 = vpop.xlane.xlu1 %11669 }
0x4fac   :  { %v11672_v47 = vmul.f32 0.03125, %v11670_v46  ;;  %v11667_v48 = vpop.xlane.xlu0 %11666 }
0x4fad   :  { %v11671_v49 = vmul.f32 0.03125, %v11667_v48 }
0x4fae   :  { %v11674_v50 = vsub.f32 %v11660_v42, %v11672_v47 }
0x4faf   :  { %v11673_v51 = vsub.f32 %v11659_v43, %v11671_v49 }
0x4fb0   :  { %v11676_v12 = vmul.f32 %v11674_v50, %v11674_v50 }
0x4fb1   :  { %v11675_v5 = vmul.f32 %v11673_v51, %v11673_v51 }
0x4fb2   :  { %v11680_v21 = vsel %vm73_vm0, %v11676_v12, 0.0 }
0x4fb3   :  { %11681 = vadd.xlane.f32.xlu1 %v11680_v21  ;;  %v11677_v52 = vsel %vm73_vm0, %v11675_v5, 0.0 }
0x4fb4   :  { %11678 = vadd.xlane.f32.xlu0 %v11677_v52 }
0x5040   :  { %v11682_v23 = vpop.xlane.xlu1 %11681 }
0x5041   :  { %v11684_v25 = vmul.f32 0.03125, %v11682_v23  ;;  %v11679_v20 = vpop.xlane.xlu0 %11678 }
0x5042   :  { %v11683_v24 = vmul.f32 0.03125, %v11679_v20 }
0x5043   :  { %v11686_v22 = vadd.f32 1e-05, %v11684_v25 }
0x5044   :  { %v11685_v53 = vadd.f32 1e-05, %v11683_v24 }
0x5045   :  { %14525 = vrsqrt.f32 %v11686_v22 }
0x5046   :  { %14527 = vrsqrt.f32 %v11685_v53 }
0x504f   :  { %v14526_v54 = vpop.eup %14525 }
0x5050   :  { %v14528_v56 = vpop.eup %14527  ;;  %v11690_v57 = vmul.f32 %v14526_v54, %v11674_v50 }
0x5051   :  { %v11689_v58 = vmul.f32 %v14528_v56, %v11673_v51 }
0x5052   :  { %v11698_v60 = vmul.f32 %v12274_v55, %v11690_v57 }
0x5053   :  { %v11697_v61 = vmul.f32 %v12274_v55, %v11689_v58 }
0x5054   :  { %v11706_v62 = vadd.f32 %v12275_v59, %v11698_v60 }
0x5055   :  { %v11705_v63 = vadd.f32 %v12275_v59, %v11697_v61 }
0x5056   :  { %11708 = vst.msk [vmem:[#allocation2 + $0x8] sm:$0xff] %vm73_vm0, %v11706_v62 }
0x5057   :  { %11707 = vst.msk [vmem:[#allocation2] sm:$0xff] %vm73_vm0, %v11705_v63 }
0x5058   :  { %14540 = shalt.err (!%p14537_p4)
}
0x5059   :  { %s14541_s29 = scalar_lea.hbm %s16221_s15, 256 }
0x505a   :  { %p14542_p5 = scmp.ne.s32.totalorder %s16221_s15, %s14541_s29  ;;  %p14545_p6 = scmp.lt.u32.totalorder %s14541_s29, %s16221_s15 }
0x505c   :  { %p14547_p7 = pnand %p14545_p6, %p14542_p5 }
0x505e   :  { %14550 = shalt.err (!%p14547_p7)
}
0x505f   :  { %s14556_s9 = smov 128   ;;  %s14557_s3 = smov 8  }
0x5060   :  { %11720 = dma.vmem_to_hbm [thread:$0]  %s11715_s27, 256, %s16221_s15, [#allocation3], %s14556_s9, %s14556_s9, %s14557_s3  }
0x5061   :  { %14551 = dma.done.wait [#allocation3], 256  }
0x5062   :  { %14552 = vsyncadd [#allocation3], 4294967040 }
0x5063   :  { %11724 = vsyncpa [#allocation3], 1 }

</bundles_post_ra>
